<compile_context>
chip_gen: v7x
topology: tpu7x:2x2x1
jax: 0.10.0
libtpu: 0.0.40
codegen_flags: <defaults>
</compile_context>

<pallas_src>
import functools
import math

import jax
import jax.numpy as jnp
from jax.experimental import pallas as pl
from jax.experimental.pallas import tpu as pltpu


# ----------------------------------------------------------------------------
# Pallas kernel: one contiguous slab of BR "window rows" (= BR*qw windows).
# ----------------------------------------------------------------------------
def _local_window_mha_kernel(x_ref, bias_ref, w_in_ref, w_out_ref, b_out_ref,
                             o_ref, *, num_heads: int):
    # x_ref    : (BR, ws, qw, ws, C)  input block (also the attention "value")
    # bias_ref : (L, 3C) f32          [ (pos@Wq + bq)*scale | pos@Wk + bk | bv ]
    # w_in_ref : (C, 3C) bf16         in_proj_weight.T, q columns pre-scaled
    # w_out_ref: (C, C)  bf16         out_proj.weight.T
    # b_out_ref: (1, C)  f32          out_proj.bias
    # o_ref    : (BR, ws, qw, ws, C)
    BR, ws, qw, _, C = x_ref.shape
    L = ws * ws
    nh = num_heads
    d = C // nh
    Bw = BR * qw                 # windows handled in this step
    M = Bw * L                   # rows handled in this step

    # Gather rows into window order (j, b, ph, pw): major-axis slices + stack
    # (cheap vreg moves, done on bf16 to halve the copied bytes).
    xb = x_ref[...].astype(jnp.bfloat16)
    xg = jnp.stack([xb[:, :, j] for j in range(qw)], axis=0)   # (qw,BR,ws,ws,C)
    xm = xg.reshape(M, C)

    # Single fused QKV projection: (M, C) @ (C, 3C), bf16 MXU, f32 accumulate.
    proj = jnp.dot(xm, w_in_ref[...], preferred_element_type=jnp.float32)
    proj = proj.reshape(Bw, L, 3 * C) + bias_ref[...]          # f32 bias add
    pb = proj.astype(jnp.bfloat16)

    q = pb[..., :C]              # already scaled by 1/sqrt(d)
    k = pb[..., C:2 * C]
    v = pb[..., 2 * C:]

    # Head-batched attention: fold heads into the leading batch axis so the
    # whole block is 2 einsums + 1 softmax (no per-head loop / lane concat of
    # nh separate matmul results).
    qs = jnp.stack([q[..., h * d:(h + 1) * d] for h in range(nh)], axis=0)
    ks = jnp.stack([k[..., h * d:(h + 1) * d] for h in range(nh)], axis=0)
    vs = jnp.stack([v[..., h * d:(h + 1) * d] for h in range(nh)], axis=0)
    qs = qs.reshape(nh * Bw, L, d)
    ks = ks.reshape(nh * Bw, L, d)
    vs = vs.reshape(nh * Bw, L, d)

    s = jnp.einsum('bld,bmd->blm', qs, ks,
                   preferred_element_type=jnp.float32)         # f32 scores
    s = s - jnp.max(s, axis=-1, keepdims=True)
    p = jnp.exp(s)
    p = p * pl.reciprocal(jnp.sum(p, axis=-1, keepdims=True), approx=True)
    o = jnp.einsum('blm,bmd->bld', p.astype(jnp.bfloat16), vs,
                   preferred_element_type=jnp.float32)         # (nh*Bw, L, d)

    # Re-interleave heads back into the channel dim.
    o = o.reshape(nh, Bw, L, d)
    attn = jnp.concatenate([o[h] for h in range(nh)], axis=-1)  # (Bw, L, C) f32

    # Single full-width output projection (K=C), bf16 MXU, f32 accumulate.
    out = jnp.dot(attn.reshape(M, C).astype(jnp.bfloat16), w_out_ref[...],
                  preferred_element_type=jnp.float32)
    out = out + b_out_ref[...]
    out = out.astype(o_ref.dtype).reshape(qw, BR, ws, ws, C)

    # Scatter back to the original row order (b, ph, j, pw).
    o_ref[...] = jnp.stack([out[j] for j in range(qw)], axis=2)


# ----------------------------------------------------------------------------
# Chip-aware tiling helpers.
# ----------------------------------------------------------------------------
def _vmem_budget_bytes() -> int:
    """~75% of physical VMEM (≈48 MiB on v7x, ≈96 MiB on v5e/v6e)."""
    try:
        phys = pltpu.get_tpu_info().vmem_capacity_bytes
    except Exception:
        phys = 64 * 1024 * 1024          # conservative (v7x-sized) fallback
    return int(phys) * 3 // 4


def _pick_row_batch(R, qw, L, C, nh, in_bytes, out_bytes, budget):
    """Largest divisor BR of R that fits the VMEM budget, keeps >=2 grid steps
    when possible, and prefers an MXU-aligned M = BR*qw*L."""
    def step_bytes(br):
        m = br * qw * L
        io = 2 * m * C * (in_bytes + out_bytes)          # double-buffered blocks
        inter = m * 44 * C + br * qw * nh * L * L * 6    # f32/bf16 intermediates
        return io + inter

    divs = [b for b in range(1, R + 1) if R % b == 0]
    fit = [b for b in divs if step_bytes(b) <= budget] or [1]
    multi = [b for b in fit if R // b >= 2] or fit        # feed both v7x cores
    for align in (256, 128):                              # MXU M-dim fill
        aligned = [b for b in multi if (b * qw * L) % align == 0]
        if aligned:
            return max(aligned)
    return max(multi)


# ----------------------------------------------------------------------------
# Wrapper: weight folding (plain JAX, once) + pallas_call.
# ----------------------------------------------------------------------------
def spatial_local_mha(x, local_pos_embed, w_in, b_in, w_out, b_out,
                      *, window_size: int, num_heads: int):
    """x: (N, T, H, W, C); local_pos_embed: (ws, ws, C).
    w_in: (C, 3C) = in_proj_weight.T; b_in: (3C,);
    w_out: (C, C) = out_proj.weight.T; b_out: (C,).
    Returns (N, T, H, W, C)."""
    N, T, H, W, C = x.shape
    ws = window_size
    # TODO(synk): pad_if_needed / depad_if_needed path skipped (pad amount 0).
    assert H % ws == 0 and W % ws == 0
    assert C % num_heads == 0
    qh, qw = H // ws, W // ws
    L = ws * ws
    d = C // num_heads
    scale = 1.0 / math.sqrt(d)

    # Fold 1/sqrt(d) into the q columns of W_in; hoist the positional-embedding
    # contribution to q/k into an (L, 3C) additive f32 bias (done once, f32).
    w_in_f = w_in.astype(jnp.float32)
    b_in_f = b_in.astype(jnp.float32)
    pos = local_pos_embed.reshape(L, C).astype(jnp.float32)
    w_all = jnp.concatenate([w_in_f[:, :C] * scale, w_in_f[:, C:]], axis=1)
    bias_q = (pos @ w_in_f[:, :C] + b_in_f[:C]) * scale
    bias_k = pos @ w_in_f[:, C:2 * C] + b_in_f[C:2 * C]
    bias_v = jnp.broadcast_to(b_in_f[2 * C:], (L, C))
    bias_all = jnp.concatenate([bias_q, bias_k, bias_v], axis=1)     # (L,3C) f32

    # bf16 weights for the MXU (accumulation stays f32 inside the kernel).
    w_all_b = w_all.astype(jnp.bfloat16)                             # (C, 3C)
    w_out_b = w_out.astype(jnp.bfloat16)                             # (C, C)
    b_out2 = b_out.reshape(1, C).astype(jnp.float32)                 # (1, C)

    # Free row-major reshape: one leading row-group index r = (n, t, qh_idx).
    R = N * T * qh
    x5 = x.reshape(R, ws, qw, ws, C)

    budget = _vmem_budget_bytes()
    weight_bytes = (w_all_b.size * 2 + bias_all.size * 4
                    + w_out_b.size * 2 + b_out2.size * 4)
    itm = x.dtype.itemsize
    BR = _pick_row_batch(R, qw, L, C, num_heads, itm, itm,
                         budget - weight_bytes - (2 << 20))
    grid = (R // BR,)

    kernel = functools.partial(_local_window_mha_kernel, num_heads=num_heads)

    out5 = pl.pallas_call(
        kernel,
        out_shape=jax.ShapeDtypeStruct((R, ws, qw, ws, C), x.dtype),
        grid=grid,
        in_specs=[
            # Fully contiguous slab of BR full window-rows per step.
            pl.BlockSpec((BR, ws, qw, ws, C), lambda r: (r, 0, 0, 0, 0)),
            # Constants: whole-array VMEM operands (not double-buffered).
            pl.BlockSpec(memory_space=pltpu.MemorySpace.VMEM),   # bias_all
            pl.BlockSpec(memory_space=pltpu.MemorySpace.VMEM),   # W_in (scaled q)
            pl.BlockSpec(memory_space=pltpu.MemorySpace.VMEM),   # W_out
            pl.BlockSpec(memory_space=pltpu.MemorySpace.VMEM),   # b_out
        ],
        out_specs=pl.BlockSpec((BR, ws, qw, ws, C), lambda r: (r, 0, 0, 0, 0)),
        compiler_params=pltpu.CompilerParams(
            dimension_semantics=("parallel",),
            vmem_limit_bytes=budget),
    )(x5, bias_all, w_all_b, w_out_b, b_out2)

    # Free reshape back (no transpose anywhere on the host side).
    return out5.reshape(N, T, H, W, C)


# ----------------------------------------------------------------------------
# Pure-JAX reference (same math as torch.nn.MultiheadAttention, dropout=0)
# ----------------------------------------------------------------------------
def _reference(x, local_pos_embed, w_in, b_in, w_out, b_out,
               *, window_size: int, num_heads: int):
    N, T, H, W, C = x.shape
    ws = window_size
    qh, qw = H // ws, W // ws
    B, L = N * T * qh * qw, ws * ws
    d = C // num_heads
    xw = x.reshape(N * T, qh, ws, qw, ws, C).transpose(0, 1, 3, 2, 4, 5)
    xw = xw.reshape(B, L, C)
    pos = local_pos_embed.reshape(L, C)

    qk_in = xw + pos[None]
    proj = qk_in @ w_in + b_in
    q, k = proj[..., :C], proj[..., C:2 * C]
    v = xw @ w_in[:, 2 * C:] + b_in[2 * C:]

    qh_ = q.reshape(B, L, num_heads, d).transpose(0, 2, 1, 3)
    kh_ = k.reshape(B, L, num_heads, d).transpose(0, 2, 1, 3)
    vh_ = v.reshape(B, L, num_heads, d).transpose(0, 2, 1, 3)
    s = jnp.einsum('bhld,bhmd->bhlm', qh_, kh_) / math.sqrt(d)
    p = jax.nn.softmax(s, axis=-1)
    o = jnp.einsum('bhlm,bhmd->bhld', p, vh_)
    o = o.transpose(0, 2, 1, 3).reshape(B, L, C)
    o = o @ w_out + b_out
    o = o.reshape(N * T, qh, qw, ws, ws, C).transpose(0, 1, 3, 2, 4, 5)
    return o.reshape(N, T, H, W, C)


if __name__ == "__main__":
    # Small shapes consistent with the module's forward (x: N,T,H,W,C).
    N, T, H, W, C = 2, 2, 8, 8, 32
    num_heads = 4
    window_size = 4

    key = jax.random.PRNGKey(0)
    kx, kp, k1, k2, k3, k4 = jax.random.split(key, 6)

    x = jax.random.normal(kx, (N, T, H, W, C), jnp.float32)
    local_pos_embed = 0.02 * jax.random.normal(
        kp, (window_size, window_size, C), jnp.float32)

    # nn.MultiheadAttention parameters (deterministic synthetic init):
    #   in_proj_weight (3C, C), in_proj_bias (3C,),
    #   out_proj.weight (C, C), out_proj.bias (C,)
    in_proj_weight = 0.2 * jax.random.normal(k1, (3 * C, C), jnp.float32)
    in_proj_bias = 0.05 * jax.random.normal(k2, (3 * C,), jnp.float32)
    out_proj_weight = 0.2 * jax.random.normal(k3, (C, C), jnp.float32)
    out_proj_bias = 0.05 * jax.random.normal(k4, (C,), jnp.float32)

    # Kernel / reference weight layout: x @ W (i.e. transposed PyTorch weights).
    w_in = in_proj_weight.T      # (C, 3C)
    w_out = out_proj_weight.T    # (C, C)

    out = spatial_local_mha(x, local_pos_embed, w_in, in_proj_bias,
                            w_out, out_proj_bias,
                            window_size=window_size, num_heads=num_heads)
    out = jax.block_until_ready(out)

    ref = _reference(x, local_pos_embed, w_in, in_proj_bias,
                     w_out, out_proj_bias,
                     window_size=window_size, num_heads=num_heads)
    assert out.shape == (N, T, H, W, C)
    # Tolerance absorbs bf16 MXU operands (f32 accumulation) and the
    # approximate (EUP) reciprocal in the softmax normalization.
    max_err = float(jnp.max(jnp.abs(out - ref)))
    assert jnp.allclose(out, ref, atol=3e-2, rtol=3e-2), max_err

    print("KERNEL_OK")
</pallas_src>

<mosaic_0001>
module attributes {stable_mosaic.version = 11 : i64} {
  func.func @_local_window_mha_kernel(%arg0: i32, %arg1: memref<4x4x2x4x32xf32, #tpu.memory_space<vmem>>, %arg2: memref<16x96xf32, #tpu.memory_space<vmem>>, %arg3: memref<32x96xbf16, #tpu.memory_space<vmem>>, %arg4: memref<32x32xbf16, #tpu.memory_space<vmem>>, %arg5: memref<1x32xf32, #tpu.memory_space<vmem>>, %arg6: memref<4x4x2x4x32xf32, #tpu.memory_space<vmem>>) attributes {dimension_semantics = [#tpu.dimension_semantics<parallel>], iteration_bounds = array<i64: 2>, scalar_prefetch = 0 : i64, scratch_operands = 0 : i64, tpu.core_type = #tpu.core_type<tc>, window_params = [{transform_indices = @transform_0, window_bounds = array<i64: 4, 4, 2, 4, 32>}, {pipeline_mode = #tpu.pipeline_mode<synchronous>, transform_indices = @transform_1, window_bounds = array<i64: 16, 96>}, {pipeline_mode = #tpu.pipeline_mode<synchronous>, transform_indices = @transform_2, window_bounds = array<i64: 32, 96>}, {pipeline_mode = #tpu.pipeline_mode<synchronous>, transform_indices = @transform_3, window_bounds = array<i64: 32, 32>}, {pipeline_mode = #tpu.pipeline_mode<synchronous>, transform_indices = @transform_4, window_bounds = array<i64: 1, 32>}, {transform_indices = @transform_5, window_bounds = array<i64: 4, 4, 2, 4, 32>}]} {
    %c0 = arith.constant 0 : index
    %c0_0 = arith.constant 0 : index
    %c0_1 = arith.constant 0 : index
    %c0_2 = arith.constant 0 : index
    %c0_3 = arith.constant 0 : index
    %0 = vector.load %arg1[%c0, %c0_0, %c0_1, %c0_2, %c0_3] : memref<4x4x2x4x32xf32, #tpu.memory_space<vmem>>, vector<4x4x2x4x32xf32>
    %1 = arith.truncf %0 : vector<4x4x2x4x32xf32> to vector<4x4x2x4x32xbf16>
    %2 = vector.extract_strided_slice %1 {offsets = [0, 0, 0, 0, 0], sizes = [4, 4, 1, 4, 32], strides = [1, 1, 1, 1, 1]} : vector<4x4x2x4x32xbf16> to vector<4x4x1x4x32xbf16>
    %3 = vector.shape_cast %2 : vector<4x4x1x4x32xbf16> to vector<4x4x4x32xbf16>
    %4 = vector.extract_strided_slice %1 {offsets = [0, 0, 1, 0, 0], sizes = [4, 4, 1, 4, 32], strides = [1, 1, 1, 1, 1]} : vector<4x4x2x4x32xbf16> to vector<4x4x1x4x32xbf16>
    %5 = vector.shape_cast %4 : vector<4x4x1x4x32xbf16> to vector<4x4x4x32xbf16>
    %6 = vector.shape_cast %3 : vector<4x4x4x32xbf16> to vector<1x4x4x4x32xbf16>
    %7 = vector.shape_cast %5 : vector<4x4x4x32xbf16> to vector<1x4x4x4x32xbf16>
    %8 = tpu.concatenate %6, %7 in 0 : vector<1x4x4x4x32xbf16>, vector<1x4x4x4x32xbf16> -> vector<2x4x4x4x32xbf16>
    %9 = vector.shape_cast %8 : vector<2x4x4x4x32xbf16> to vector<128x32xbf16>
    %c0_4 = arith.constant 0 : index
    %c0_5 = arith.constant 0 : index
    %10 = vector.load %arg3[%c0_4, %c0_5] : memref<32x96xbf16, #tpu.memory_space<vmem>>, vector<32x96xbf16>
    %cst = arith.constant dense<0.000000e+00> : vector<128x96xf32>
    %11 = tpu.matmul %9, %10, %cst {dimension_numbers = #tpu.dot_dimension_numbers<[1], [0], [0], [1], [0, 0, 1, 1], [], []>} : vector<128x32xbf16>, vector<32x96xbf16>, vector<128x96xf32> -> vector<128x96xf32>
    %12 = vector.shape_cast %11 : vector<128x96xf32> to vector<8x16x96xf32>
    %c0_6 = arith.constant 0 : index
    %c0_7 = arith.constant 0 : index
    %13 = vector.load %arg2[%c0_6, %c0_7] : memref<16x96xf32, #tpu.memory_space<vmem>>, vector<16x96xf32>
    %14 = vector.shape_cast %13 : vector<16x96xf32> to vector<1x16x96xf32>
    %15 = vector.broadcast %14 : vector<1x16x96xf32> to vector<8x16x96xf32>
    %16 = arith.addf %12, %15 : vector<8x16x96xf32>
    %17 = arith.truncf %16 : vector<8x16x96xf32> to vector<8x16x96xbf16>
    %18 = vector.extract_strided_slice %17 {offsets = [0, 0, 0], sizes = [8, 16, 32], strides = [1, 1, 1]} : vector<8x16x96xbf16> to vector<8x16x32xbf16>
    %19 = vector.extract_strided_slice %17 {offsets = [0, 0, 32], sizes = [8, 16, 32], strides = [1, 1, 1]} : vector<8x16x96xbf16> to vector<8x16x32xbf16>
    %20 = vector.extract_strided_slice %17 {offsets = [0, 0, 64], sizes = [8, 16, 32], strides = [1, 1, 1]} : vector<8x16x96xbf16> to vector<8x16x32xbf16>
    %21 = vector.extract_strided_slice %18 {offsets = [0, 0, 0], sizes = [8, 16, 8], strides = [1, 1, 1]} : vector<8x16x32xbf16> to vector<8x16x8xbf16>
    %22 = vector.extract_strided_slice %18 {offsets = [0, 0, 8], sizes = [8, 16, 8], strides = [1, 1, 1]} : vector<8x16x32xbf16> to vector<8x16x8xbf16>
    %23 = vector.extract_strided_slice %18 {offsets = [0, 0, 16], sizes = [8, 16, 8], strides = [1, 1, 1]} : vector<8x16x32xbf16> to vector<8x16x8xbf16>
    %24 = vector.extract_strided_slice %18 {offsets = [0, 0, 24], sizes = [8, 16, 8], strides = [1, 1, 1]} : vector<8x16x32xbf16> to vector<8x16x8xbf16>
    %25 = vector.shape_cast %21 : vector<8x16x8xbf16> to vector<1x8x16x8xbf16>
    %26 = vector.shape_cast %22 : vector<8x16x8xbf16> to vector<1x8x16x8xbf16>
    %27 = vector.shape_cast %23 : vector<8x16x8xbf16> to vector<1x8x16x8xbf16>
    %28 = vector.shape_cast %24 : vector<8x16x8xbf16> to vector<1x8x16x8xbf16>
    %29 = tpu.concatenate %25, %26, %27, %28 in 0 : vector<1x8x16x8xbf16>, vector<1x8x16x8xbf16>, vector<1x8x16x8xbf16>, vector<1x8x16x8xbf16> -> vector<4x8x16x8xbf16>
    %30 = vector.extract_strided_slice %19 {offsets = [0, 0, 0], sizes = [8, 16, 8], strides = [1, 1, 1]} : vector<8x16x32xbf16> to vector<8x16x8xbf16>
    %31 = vector.extract_strided_slice %19 {offsets = [0, 0, 8], sizes = [8, 16, 8], strides = [1, 1, 1]} : vector<8x16x32xbf16> to vector<8x16x8xbf16>
    %32 = vector.extract_strided_slice %19 {offsets = [0, 0, 16], sizes = [8, 16, 8], strides = [1, 1, 1]} : vector<8x16x32xbf16> to vector<8x16x8xbf16>
    %33 = vector.extract_strided_slice %19 {offsets = [0, 0, 24], sizes = [8, 16, 8], strides = [1, 1, 1]} : vector<8x16x32xbf16> to vector<8x16x8xbf16>
    %34 = vector.shape_cast %30 : vector<8x16x8xbf16> to vector<1x8x16x8xbf16>
    %35 = vector.shape_cast %31 : vector<8x16x8xbf16> to vector<1x8x16x8xbf16>
    %36 = vector.shape_cast %32 : vector<8x16x8xbf16> to vector<1x8x16x8xbf16>
    %37 = vector.shape_cast %33 : vector<8x16x8xbf16> to vector<1x8x16x8xbf16>
    %38 = tpu.concatenate %34, %35, %36, %37 in 0 : vector<1x8x16x8xbf16>, vector<1x8x16x8xbf16>, vector<1x8x16x8xbf16>, vector<1x8x16x8xbf16> -> vector<4x8x16x8xbf16>
    %39 = vector.extract_strided_slice %20 {offsets = [0, 0, 0], sizes = [8, 16, 8], strides = [1, 1, 1]} : vector<8x16x32xbf16> to vector<8x16x8xbf16>
    %40 = vector.extract_strided_slice %20 {offsets = [0, 0, 8], sizes = [8, 16, 8], strides = [1, 1, 1]} : vector<8x16x32xbf16> to vector<8x16x8xbf16>
    %41 = vector.extract_strided_slice %20 {offsets = [0, 0, 16], sizes = [8, 16, 8], strides = [1, 1, 1]} : vector<8x16x32xbf16> to vector<8x16x8xbf16>
    %42 = vector.extract_strided_slice %20 {offsets = [0, 0, 24], sizes = [8, 16, 8], strides = [1, 1, 1]} : vector<8x16x32xbf16> to vector<8x16x8xbf16>
    %43 = vector.shape_cast %39 : vector<8x16x8xbf16> to vector<1x8x16x8xbf16>
    %44 = vector.shape_cast %40 : vector<8x16x8xbf16> to vector<1x8x16x8xbf16>
    %45 = vector.shape_cast %41 : vector<8x16x8xbf16> to vector<1x8x16x8xbf16>
    %46 = vector.shape_cast %42 : vector<8x16x8xbf16> to vector<1x8x16x8xbf16>
    %47 = tpu.concatenate %43, %44, %45, %46 in 0 : vector<1x8x16x8xbf16>, vector<1x8x16x8xbf16>, vector<1x8x16x8xbf16>, vector<1x8x16x8xbf16> -> vector<4x8x16x8xbf16>
    %48 = vector.shape_cast %29 : vector<4x8x16x8xbf16> to vector<32x16x8xbf16>
    %49 = vector.shape_cast %38 : vector<4x8x16x8xbf16> to vector<32x16x8xbf16>
    %50 = vector.shape_cast %47 : vector<4x8x16x8xbf16> to vector<32x16x8xbf16>
    "tpu.trace_start"() <{level = 10 : i32, message = "bld,bmd->blm"}> : () -> ()
    %cst_8 = arith.constant dense<0.000000e+00> : vector<32x16x16xf32>
    %51 = tpu.matmul %48, %49, %cst_8 {dimension_numbers = #tpu.dot_dimension_numbers<[2], [2], [1], [1], [0, 0, 0, 1, 1, 1], [0], [0]>} : vector<32x16x8xbf16>, vector<32x16x8xbf16>, vector<32x16x16xf32> -> vector<32x16x16xf32>
    "tpu.trace_stop"() : () -> ()
    %cst_9 = arith.constant dense<0xFF800000> : vector<32x16xf32>
    %52 = vector.multi_reduction <maximumf>, %51, %cst_9 [2] : vector<32x16x16xf32> to vector<32x16xf32>
    %53 = vector.shape_cast %52 : vector<32x16xf32> to vector<32x16x1xf32>
    %54 = vector.broadcast %53 : vector<32x16x1xf32> to vector<32x16x16xf32>
    %55 = arith.subf %51, %54 : vector<32x16x16xf32>
    %56 = math.exp %55 : vector<32x16x16xf32>
    %cst_10 = arith.constant dense<0.000000e+00> : vector<32x16xf32>
    %57 = vector.multi_reduction <add>, %56, %cst_10 [2] : vector<32x16x16xf32> to vector<32x16xf32>
    %58 = vector.shape_cast %57 : vector<32x16xf32> to vector<32x16x1xf32>
    %59 = tpu.reciprocal %58 {approx = true} : vector<32x16x1xf32> -> vector<32x16x1xf32>
    %60 = vector.broadcast %59 : vector<32x16x1xf32> to vector<32x16x16xf32>
    %61 = arith.mulf %56, %60 : vector<32x16x16xf32>
    %62 = arith.truncf %61 : vector<32x16x16xf32> to vector<32x16x16xbf16>
    "tpu.trace_start"() <{level = 10 : i32, message = "blm,bmd->bld"}> : () -> ()
    %cst_11 = arith.constant dense<0.000000e+00> : vector<32x16x8xf32>
    %63 = tpu.matmul %62, %50, %cst_11 {dimension_numbers = #tpu.dot_dimension_numbers<[2], [1], [1], [2], [0, 0, 0, 1, 1, 2], [0], [0]>} : vector<32x16x16xbf16>, vector<32x16x8xbf16>, vector<32x16x8xf32> -> vector<32x16x8xf32>
    "tpu.trace_stop"() : () -> ()
    %64 = vector.shape_cast %63 : vector<32x16x8xf32> to vector<4x8x16x8xf32>
    %65 = vector.extract_strided_slice %64 {offsets = [0, 0, 0, 0], sizes = [1, 8, 16, 8], strides = [1, 1, 1, 1]} : vector<4x8x16x8xf32> to vector<1x8x16x8xf32>
    %66 = vector.shape_cast %65 : vector<1x8x16x8xf32> to vector<8x16x8xf32>
    %67 = vector.extract_strided_slice %64 {offsets = [1, 0, 0, 0], sizes = [1, 8, 16, 8], strides = [1, 1, 1, 1]} : vector<4x8x16x8xf32> to vector<1x8x16x8xf32>
    %68 = vector.shape_cast %67 : vector<1x8x16x8xf32> to vector<8x16x8xf32>
    %69 = vector.extract_strided_slice %64 {offsets = [2, 0, 0, 0], sizes = [1, 8, 16, 8], strides = [1, 1, 1, 1]} : vector<4x8x16x8xf32> to vector<1x8x16x8xf32>
    %70 = vector.shape_cast %69 : vector<1x8x16x8xf32> to vector<8x16x8xf32>
    %71 = vector.extract_strided_slice %64 {offsets = [3, 0, 0, 0], sizes = [1, 8, 16, 8], strides = [1, 1, 1, 1]} : vector<4x8x16x8xf32> to vector<1x8x16x8xf32>
    %72 = vector.shape_cast %71 : vector<1x8x16x8xf32> to vector<8x16x8xf32>
    %73 = tpu.concatenate %66, %68, %70, %72 in 2 : vector<8x16x8xf32>, vector<8x16x8xf32>, vector<8x16x8xf32>, vector<8x16x8xf32> -> vector<8x16x32xf32>
    %74 = vector.shape_cast %73 : vector<8x16x32xf32> to vector<128x32xf32>
    %75 = arith.truncf %74 : vector<128x32xf32> to vector<128x32xbf16>
    %c0_12 = arith.constant 0 : index
    %c0_13 = arith.constant 0 : index
    %76 = vector.load %arg4[%c0_12, %c0_13] : memref<32x32xbf16, #tpu.memory_space<vmem>>, vector<32x32xbf16>
    %cst_14 = arith.constant dense<0.000000e+00> : vector<128x32xf32>
    %77 = tpu.matmul %75, %76, %cst_14 {dimension_numbers = #tpu.dot_dimension_numbers<[1], [0], [0], [1], [0, 0, 1, 1], [], []>} : vector<128x32xbf16>, vector<32x32xbf16>, vector<128x32xf32> -> vector<128x32xf32>
    %c0_15 = arith.constant 0 : index
    %c0_16 = arith.constant 0 : index
    %78 = vector.load %arg5[%c0_15, %c0_16] : memref<1x32xf32, #tpu.memory_space<vmem>>, vector<1x32xf32>
    %79 = vector.broadcast %78 : vector<1x32xf32> to vector<128x32xf32>
    %80 = arith.addf %77, %79 : vector<128x32xf32>
    %81 = vector.shape_cast %80 : vector<128x32xf32> to vector<2x4x4x4x32xf32>
    %82 = vector.extract_strided_slice %81 {offsets = [0, 0, 0, 0, 0], sizes = [1, 4, 4, 4, 32], strides = [1, 1, 1, 1, 1]} : vector<2x4x4x4x32xf32> to vector<1x4x4x4x32xf32>
    %83 = vector.shape_cast %82 : vector<1x4x4x4x32xf32> to vector<4x4x4x32xf32>
    %84 = vector.extract_strided_slice %81 {offsets = [1, 0, 0, 0, 0], sizes = [1, 4, 4, 4, 32], strides = [1, 1, 1, 1, 1]} : vector<2x4x4x4x32xf32> to vector<1x4x4x4x32xf32>
    %85 = vector.shape_cast %84 : vector<1x4x4x4x32xf32> to vector<4x4x4x32xf32>
    %86 = vector.shape_cast %83 : vector<4x4x4x32xf32> to vector<4x4x1x4x32xf32>
    %87 = vector.shape_cast %85 : vector<4x4x4x32xf32> to vector<4x4x1x4x32xf32>
    %88 = tpu.concatenate %86, %87 in 2 : vector<4x4x1x4x32xf32>, vector<4x4x1x4x32xf32> -> vector<4x4x2x4x32xf32>
    %c0_17 = arith.constant 0 : index
    %c0_18 = arith.constant 0 : index
    %c0_19 = arith.constant 0 : index
    %c0_20 = arith.constant 0 : index
    %c0_21 = arith.constant 0 : index
    %89 = vector.load %arg6[%c0_17, %c0_18, %c0_19, %c0_20, %c0_21] : memref<4x4x2x4x32xf32, #tpu.memory_space<vmem>>, vector<4x4x2x4x32xf32>
    tpu.vector_store %arg6[%c0_17, %c0_18, %c0_19, %c0_20, %c0_21], %88 {strides = array<i32>} : memref<4x4x2x4x32xf32, #tpu.memory_space<vmem>>, vector<4x4x2x4x32xf32>,
    return
  }
  func.func @transform_0(%arg0: i32) -> (i32, i32, i32, i32, i32) {
    %c0_i32 = arith.constant 0 : i32
    %c0_i32_0 = arith.constant 0 : i32
    %c0_i32_1 = arith.constant 0 : i32
    %c0_i32_2 = arith.constant 0 : i32
    %c0_i32_3 = arith.constant 0 : i32
    return %arg0, %c0_i32, %c0_i32_0, %c0_i32_1, %c0_i32_2 : i32, i32, i32, i32, i32
  }
  func.func @transform_1(%arg0: i32) -> (i32, i32) {
    %c0_i32 = arith.constant 0 : i32
    %c0_i32_0 = arith.constant 0 : i32
    %c0_i32_1 = arith.constant 0 : i32
    return %c0_i32, %c0_i32_0 : i32, i32
  }
  func.func @transform_2(%arg0: i32) -> (i32, i32) {
    %c0_i32 = arith.constant 0 : i32
    %c0_i32_0 = arith.constant 0 : i32
    %c0_i32_1 = arith.constant 0 : i32
    return %c0_i32, %c0_i32_0 : i32, i32
  }
  func.func @transform_3(%arg0: i32) -> (i32, i32) {
    %c0_i32 = arith.constant 0 : i32
    %c0_i32_0 = arith.constant 0 : i32
    %c0_i32_1 = arith.constant 0 : i32
    return %c0_i32, %c0_i32_0 : i32, i32
  }
  func.func @transform_4(%arg0: i32) -> (i32, i32) {
    %c0_i32 = arith.constant 0 : i32
    %c0_i32_0 = arith.constant 0 : i32
    %c0_i32_1 = arith.constant 0 : i32
    return %c0_i32, %c0_i32_0 : i32, i32
  }
  func.func @transform_5(%arg0: i32) -> (i32, i32, i32, i32, i32) {
    %c0_i32 = arith.constant 0 : i32
    %c0_i32_0 = arith.constant 0 : i32
    %c0_i32_1 = arith.constant 0 : i32
    %c0_i32_2 = arith.constant 0 : i32
    %c0_i32_3 = arith.constant 0 : i32
    return %arg0, %c0_i32, %c0_i32_0, %c0_i32_1, %c0_i32_2 : i32, i32, i32, i32, i32
  }
}

</mosaic_0001>

<bundles_post_ra>
// kernel: tpu_custom_call.1
= control target key start
LH: loop header
LB: loop body
LE: loop exit
PB: predicated region body
PF: predicated region fallthrough
CT: control target
= control target key end

     0   :  { %10 = vsyncpa [#allocation3], 0  ;;  %s8506_s0 = inlined_call_operand.hbm [shape: f32[8,4,2,4,32], index: 0, kind: input, shape index: {}]   ;;  %s8507_s1 = inlined_call_operand.hbm [shape: f32[16,96], index: 1, kind: input, shape index: {}]   ;;  %s8508_s2 = inlined_call_operand.hbm [shape: bf16[32,96], index: 2, kind: input, shape index: {}]   ;;  %s8509_s3 = inlined_call_operand.hbm [shape: bf16[32,32], index: 3, kind: input, shape index: {}]   ;;  %s8510_s4 = inlined_call_operand.vmem [shape: f32[1,32], index: 4, kind: input, shape index: {}]   ;;  %s8511_s5 = inlined_call_operand.hbm [shape: f32[8,4,2,4,32], index: 5, kind: output, shape index: {}]  }
   0x1   :  { %12 = vsyncpa [#allocation3 + $0x1], 0 }
   0x2   :  { %13 = vsyncpa [#allocation6], 0 }
   0x3   :  { %14 = vsyncpa [#allocation9], 0 }
   0x4   :  { %15 = vsyncpa [#allocation4], 0 }
   0x5   :  { %17 = vsyncpa [#allocation4 + $0x1], 0  ;;  %s6561_s18 = smov 0   ;;  %s6563_s19 = smov 0  }
   0x6   :  { %s6565_s20 = smov 0   ;;  %s6567_s21 = smov 0  }
   0x7 LB: > { %s6582_s22 = sadd.s32 4294967295, %s6508_s21   ;;  %s5144_s23 = sadd.s32 4294967294, %s6508_s21   ;;  %s6508_s21 = sphi %s6567_s21, %s8674_s21   ;;  %s6504_s20 = sphi %s6565_s20, %s8673_s20   ;;  %s6500_s19 = sphi %s6563_s19, %s8672_s19   ;;  %s6496_s18 = sphi %s6561_s18, %s8671_s18  }
   0x8   : > { %p43_p0 = scmp.ne.s32.totalorder %s6500_s19, %s6496_s18  ;;  %p8512_p1 = scmp.eq.s32.totalorder %s6582_s22, 0 }
   0x9   : > { %p157_p3 = scmp.eq.s32.totalorder %s5144_s23, 1  ;;  %p5145_p5 = scmp.ge.s32.totalorder %s6508_s21, 1 }
   0xa   : > { %p6591_p4 = por %p8512_p1, %p43_p0  ;;  %p164_p7 = scmp.lt.s32.totalorder %s6508_s21, 3 }
   0xb   : > { %p6596_p6 = por %p157_p3, %p43_p0  ;;  %s6510_s27 = smov [#allocation5]  }
   0xc   : > { %s8550_s24 = scalar_select %p6591_p4, 1, 0 }
   0xd   : > { %s8551_s25 = scalar_select %p6596_p6, 1, 0 }
   0xe   : > { %p6601_p8 = pnand %p5145_p5, %p164_p7  ;;  %s176_s28 = sshll.u32 %s6510_s27, 4  ;;  %s6605_s28 = int_to_ptr.vmem [resolvable:$true] %s176_s28 }
   0xf   : > { %s6511_s30 = smov [#allocation7]   ;;  %s6320_s9 = scalar_lea.hbm %s8507_s1, 256 }
  0x10   : > { %s8552_s26 = scalar_select %p6601_p8, 1, 0 }
  0x11   : > { %p5863_p9 = pneg %p6601_p8  ;;  %s189_s6 = sshll.u32 %s6511_s30, 4  ;;  %s6616_s6 = int_to_ptr.vmem [resolvable:$true] %s189_s6 }
  0x12   : > { %p6321_p12 = scmp.ne.s32.totalorder %s8507_s1, %s6320_s9  ;;  %p6327_p5 = scmp.lt.u32.totalorder %s6320_s9, %s8507_s1 }
  0x13   : > { %p6612_p11 = pnand %p5863_p9, %p8512_p1 }
  0x15   : > { %p6626_p13 = pneg %p6612_p11 }
  0x17   : > { %p6323_p0 = pnand %p6626_p13, %p6321_p12 }
  0x19   : > { %p6324_p3 = pneg %p6323_p0 }
  0x1b   : > { %p6329_p7 = pnand %p6327_p5, %p6324_p3 }
  0x1d   : > { %6332 = shalt.err (!%p6329_p7)
}
  0x1e   : > { %s6333_s15 = scalar_lea.vmem %s6605_s28, 256  ;;  %p6341_p2 = scmp.lt.s32.totalorder %s6605_s28, %s6605_s28 }
  0x1f   : > { %p6334_p9 = scmp.ne.s32.totalorder %s6605_s28, %s6333_s15  ;;  %p6342_p6 = scmp.lt.s32.totalorder %s6333_s15, %s6333_s15 }
  0x21   : > { %p6336_p10 = pnand %p6334_p9, %p6626_p13  ;;  %p6343_p12 = por %p6342_p6, %p6341_p2 }
  0x23   : > { %p6337_p1 = pneg %p6336_p10 }
  0x25   : > { %p6344_p0 = pnand %p6343_p12, %p6337_p1 }
  0x27   : > { %6347 = shalt.err (!%p6344_p0)
}
  0x28   : > { %s6512_s16 = smov 128   ;;  %s6513_s17 = smov 8  }
  0x29   : > { %5866 = dma.hbm_to_vmem [thread:$0]  (!%p6612_p11), %s8507_s1, 256, %s6605_s28, [#allocation6], %s6512_s16, %s6512_s16, %s6513_s17  }
  0x2a   : > { %s6348_s8 = scalar_lea.hbm %s8508_s2, 256 }
  0x2b   : > { %p6349_p2 = scmp.ne.s32.totalorder %s8508_s2, %s6348_s8  ;;  %p6355_p10 = scmp.lt.u32.totalorder %s6348_s8, %s8508_s2 }
  0x2d   : > { %p6351_p1 = pnand %p6349_p2, %p6626_p13 }
  0x2f   : > { %p6352_p6 = pneg %p6351_p1 }
  0x31   : > { %p6357_p3 = pnand %p6355_p10, %p6352_p6 }
  0x33   : > { %6360 = shalt.err (!%p6357_p3)
}
  0x34   : > { %s6361_s28 = scalar_lea.vmem %s6616_s6, 256  ;;  %p6369_p12 = scmp.lt.s32.totalorder %s6616_s6, %s6616_s6 }
  0x35   : > { %p6362_p5 = scmp.ne.s32.totalorder %s6616_s6, %s6361_s28  ;;  %p6370_p0 = scmp.lt.s32.totalorder %s6361_s28, %s6361_s28 }
  0x37   : > { %p6364_p7 = pnand %p6362_p5, %p6626_p13  ;;  %p6371_p2 = por %p6370_p0, %p6369_p12 }
  0x39   : > { %p6365_p9 = pneg %p6364_p7 }
  0x3b   : > { %p6372_p1 = pnand %p6371_p2, %p6365_p9 }
  0x3d   : > { %6375 = shalt.err (!%p6372_p1)
}
  0x3e   : > { %s6514_s14 = smov 64   ;;  %s6515_s15 = smov 4  }
  0x3f   : > { %5869 = dma.hbm_to_vmem [thread:$0]  (!%p6612_p11), %s8508_s2, 256, %s6616_s6, [#allocation6], %s6514_s14, %s6514_s14, %s6515_s15  }
  0x40   : > { %s6516_s23 = smov [#allocation8]   ;;  %s6674_s30 = sadd.s32 1, %s6508_s21  }
  0x41   : > { %s202_s27 = sshll.u32 %s6516_s23, 4  ;;  %s6376_s9 = scalar_lea.hbm %s8509_s3, 256  ;;  %s203_s27 = int_to_ptr.vmem [resolvable:$true] %s202_s27 }
  0x42   : > { %p6377_p6 = scmp.ne.s32.totalorder %s8509_s3, %s6376_s9  ;;  %p6383_p5 = scmp.lt.u32.totalorder %s6376_s9, %s8509_s3 }
  0x44   : > { %p6379_p10 = pnand %p6377_p6, %p6626_p13 }
  0x46   : > { %p6380_p3 = pneg %p6379_p10 }
  0x48   : > { %p6385_p7 = pnand %p6383_p5, %p6380_p3 }
  0x4a   : > { %6388 = shalt.err (!%p6385_p7)
}
  0x4b   : > { %s6389_s6 = scalar_lea.vmem %s203_s27, 256  ;;  %p6397_p2 = scmp.lt.s32.totalorder %s203_s27, %s203_s27 }
  0x4c   : > { %p6390_p9 = scmp.ne.s32.totalorder %s203_s27, %s6389_s6  ;;  %p6398_p1 = scmp.lt.s32.totalorder %s6389_s6, %s6389_s6 }
  0x4e   : > { %p6392_p12 = pnand %p6390_p9, %p6626_p13  ;;  %p6399_p4 = por %p6398_p1, %p6397_p2 }
  0x50   : > { %p6393_p0 = pneg %p6392_p12 }
  0x52   : > { %p6400_p8 = pnand %p6399_p4, %p6393_p0 }
  0x54   : > { %6403 = shalt.err (!%p6400_p8)
}
  0x55   : > { %5872 = dma.hbm_to_vmem [thread:$0]  (!%p6612_p11), %s8509_s3, 256, %s203_s27, [#allocation9], %s6514_s14, %s6514_s14, %s6515_s15  }
  0x56   : > { %s27_s12 = ssub.s32 %s6508_s21, %s6674_s30  ;;  %s30_s29 = sadd.s32 1, %s6504_s20 }
  0x57   : > { %p28_p4 = scmp.eq.s32.totalorder %s27_s12, 0  ;;  %p37_p8 = scmp.ne.s32.totalorder %s6504_s20, %s6500_s19 }
  0x58   : > { %p38_p13 = scmp.eq.s32.totalorder %s6508_s21, 0  ;;  %p5884_p6 = scmp.lt.s32.totalorder %s6508_s21, 2 }
  0x59   : > { %s6705_s23 = scalar_select %p28_p4, %s6504_s20, %s30_s29  }
  0x5a   : > { %p39_p10 = por %p38_p13, %p37_p8  ;;  %p8555_p3 = scmp.eq.s32.totalorder %s6582_s22, 1 }
  0x5b   : > { %s219_s8 = sand.u32 1, %s6504_s20   ;;  %s5268_s9 = sshll.u32 %s6508_s21, 11 }
  0x5c   : > { %p6709_p5 = por %p8555_p3, %p37_p8  ;;  %s5150_s10 = sshll.u32 %s219_s8, 7 }
  0x5d   : > { %s6718_s27 = scalar_lea.hbm %s8506_s0, %s5268_s9  ;;  %s223_s28 = scalar_lea.vmem [#allocation2], %s5150_s10 }
  0x5e   : > { %s231_s6 = sshll.u32 %s223_s28, 4  ;;  %p6720_p11 = pnand %p5884_p6, %p39_p10  ;;  %s6724_s6 = int_to_ptr.vmem [resolvable:$true] %s231_s6 }
  0x5f   : > { %s6726_s17 = scalar_lea.sflag [#allocation3], %s219_s8  ;;  %s6404_s12 = scalar_lea.hbm %s6718_s27, 2048 }
  0x60   : > { %p6405_p7 = scmp.ne.s32.totalorder %s6718_s27, %s6404_s12  ;;  %p6406_p9 = pneg %p6720_p11 }
  0x61   : > { %s6409_s10 = scalar_lea.hbm %s8506_s0, 4096  ;;  %p6410_p2 = scmp.lt.u32.totalorder %s6718_s27, %s8506_s0 }
  0x62   : > { %p6407_p12 = pnand %p6406_p9, %p6405_p7  ;;  %p6411_p1 = scmp.lt.u32.totalorder %s6409_s10, %s6404_s12 }
  0x63   : > { %p6413_p8 = scmp.lt.u32.totalorder %s6404_s12, %s6718_s27 }
  0x64   : > { %p6408_p0 = pneg %p6407_p12  ;;  %p6412_p4 = por %p6411_p1, %p6410_p2 }
  0x66   : > { %p6414_p13 = por %p6413_p8, %p6412_p4 }
  0x68   : > { %p6415_p6 = pnand %p6414_p13, %p6408_p0 }
  0x6a   : > { %6418 = shalt.err (!%p6415_p6)
}
  0x6b   : > { %s6419_s8 = scalar_lea.vmem %s6724_s6, 2048  ;;  %s6517_s28 = smov [#allocation2]  }
  0x6c   : > { %p6420_p10 = scmp.ne.s32.totalorder %s6724_s6, %s6419_s8  ;;  %s6424_s29 = sshll.u32 %s6517_s28, 4  ;;  %s6425_s29 = int_to_ptr.vmem [resolvable:$false] %s6424_s29 }
  0x6d   : > { %s6426_s9 = scalar_lea.vmem %s6425_s29, 4096  ;;  %p6427_p12 = scmp.lt.s32.totalorder %s6724_s6, %s6425_s29 }
  0x6e   : > { %p6422_p3 = pnand %p6420_p10, %p6406_p9  ;;  %p6428_p2 = scmp.lt.s32.totalorder %s6426_s9, %s6419_s8 }
  0x70   : > { %p6423_p7 = pneg %p6422_p3  ;;  %p6429_p1 = por %p6428_p2, %p6427_p12 }
  0x72   : > { %p6430_p4 = pnand %p6429_p1, %p6423_p7 }
  0x74   : > { %6433 = shalt.err (!%p6430_p4)
}
  0x75   : > { %5876 = dma.hbm_to_vmem [thread:$0]  (!%p6720_p11), %s6718_s27, 2048, %s6724_s6, %s6726_s17, %s6514_s14, %s6514_s14, %s6515_s15  }
  0x76   : > { %p8558_p9 = scmp.ne.s32.totalorder %s8552_s26, 0 }
  0x78   : > { %243 = sbr.rel (%p8558_p9) target bundleno = 1960 (0x7a8), region = 40 }
  0x7f   : > { %s6760_s12 = sand.u32 1, %s6500_s19   ;;  %p8559_p0 = scmp.ne.s32.totalorder %s8550_s24, 0 }
  0x80   : > { %s5155_s10 = sshll.u32 %s6760_s12, 7  ;;  %s246_s11 = scalar_lea.sflag [#allocation3], %s6760_s12 }
  0x81   : > { %s6766_s16 = scalar_lea.vmem [#allocation2], %s5155_s10 }
  0x82   : > { %6479 = dma.done.wait (%p8559_p0), %s246_s11, 2048  }
  0x83   : > { %6481 = vsyncadd (%p8559_p0), %s246_s11, 4294965248  ;;  %p8560_p11 = scmp.eq.s32.totalorder %s6582_s22, 0 }
  0x85   : > { %6483 = dma.done.wait (%p8560_p11), [#allocation6], 512   ;;  %p8561_p8 = pmov %p8560_p11 }
  0x87   : > { %6485 = vsyncadd (%p8561_p8), [#allocation6], 4294966784  ;;  %p8562_p13 = pmov %p8561_p8 }
  0x88   : > { %p8563_p6 = pmov %p8561_p8 }
  0x89   : > { %6487 = dma.done.wait (%p8562_p13), [#allocation9], 256  }
  0x8a   : > { %6489 = vsyncadd (%p8563_p6), [#allocation9], 4294967040  ;;  %v396_v0 = vlaneseq  ;;  %v6518_v1 = vmov 1983009808   ;;  %v6060_v5 = vld [vmem:[#allocation7] sm:$0xff]   ;;  %v6061_v6 = vld [vmem:[#allocation7 + $0x8] sm:$0xff]  }
  0x8b   : > { %v394_v2 = vunpack.c.l.s4 %v6518_v1  ;;  %vm539_vm0 = vcmask 261120   ;;  %5419 = vmatprep.subr.bf16.mxu0 %v6060_v5  ;;  %v291_v8 = vld [vmem:[%s6766_s16] sm:$0xf]  ;;  %v293_v9 = vld [vmem:[%s6766_s16 + $0x8] sm:$0xf]  ;;  %5843 = vmatprep.subr.bf16.mxu1 %v6060_v5  ;;  %s6520_s24 = smov 120  }
  0x8c   : > { %v397_v4 = vshrl.u32 %v396_v0, 7  ;;  %v295_v10 = vld [vmem:[%s6766_s16 + $0x10] sm:$0xf]  ;;  %5420 = vmatpush3.bf16.msra.mxu0 %v6060_v5  ;;  %v297_v11 = vld [vmem:[%s6766_s16 + $0x18] sm:$0xf]  ;;  %v5160_v12 = vpack.c.bf16 %v293_v9, %v291_v8  ;;  %5845 = vmatpush3.bf16.msra.mxu1 %v6060_v5  ;;  %vm6521_vm1 = vmmov 0  }
  0x8d   : > { %v395_v3 = vunpack.c.0.s8 %v394_v2  ;;  %v299_v13 = vld [vmem:[%s6766_s16 + $0x20] sm:$0xf]  ;;  %v301_v14 = vld [vmem:[%s6766_s16 + $0x28] sm:$0xf]  ;;  %5421 = vmatprep.subr.bf16.mxu0 %v6061_v6  ;;  %v5161_v15 = vpack.c.bf16 %v297_v11, %v295_v10  ;;  %v303_v16 = vld [vmem:[%s6766_s16 + $0x30] sm:$0xf]  ;;  %5844 = vmatprep.subr.bf16.mxu1 %v6061_v6 }
  0x8e   : > { %v305_v17 = vld [vmem:[%s6766_s16 + $0x38] sm:$0xf]  ;;  %v5162_v18 = vpack.c.bf16 %v301_v14, %v299_v13  ;;  %v307_v19 = vld [vmem:[%s6766_s16 + $0x40] sm:$0xf]  ;;  %v309_v22 = vld [vmem:[%s6766_s16 + $0x48] sm:$0xf] }
  0x8f   : > { %v6780_v7 = vsub.s32 %v395_v3, %v397_v4  ;;  %v5163_v21 = vpack.c.bf16 %v305_v17, %v303_v16  ;;  %v311_v23 = vld [vmem:[%s6766_s16 + $0x50] sm:$0xf]  ;;  %v313_v24 = vld [vmem:[%s6766_s16 + $0x58] sm:$0xf]  ;;  %v5164_v27 = vpack.c.bf16 %v309_v22, %v307_v19  ;;  %v292_v29 = vld [vmem:[%s6766_s16 + $0x4] sm:$0xf] }
  0x90   : > { %v5165_v28 = vpack.c.bf16 %v313_v24, %v311_v23  ;;  %v294_v30 = vld [vmem:[%s6766_s16 + $0xc] sm:$0xf]  ;;  %v296_v31 = vld [vmem:[%s6766_s16 + $0x14] sm:$0xf]  ;;  %5422 = vmatpush3.bf16.msra.mxu0 %v6061_v6  ;;  %5846 = vmatpush3.bf16.msra.mxu1 %v6061_v6  ;;  %v298_v33 = vld [vmem:[%s6766_s16 + $0x1c] sm:$0xf] }
  0x91   : > { %v399_v20 = vrot.slane %v5160_v12, %v6780_v7  ;;  %v406_v25 = vrot.slane %v5161_v15, %v6780_v7  ;;  %v416_v26 = vrot.slane %v5162_v18, %v6780_v7  ;;  %v423_v32 = vrot.slane %v5163_v21, %v6780_v7  ;;  %v315_v35 = vld [vmem:[%s6766_s16 + $0x60] sm:$0xf]  ;;  %v317_v36 = vld [vmem:[%s6766_s16 + $0x68] sm:$0xf]  ;;  %v319_v41 = vld [vmem:[%s6766_s16 + $0x70] sm:$0xf] }
  0x92   : > { %v5168_v34 = vpack.c.bf16 %v294_v30, %v292_v29  ;;  %v433_v38 = vrot.slane %v5164_v27, %v6780_v7  ;;  %v440_v39 = vrot.slane %v5165_v28, %v6780_v7  ;;  %v5169_v40 = vpack.c.bf16 %v298_v33, %v296_v31  ;;  %v321_v42 = vld [vmem:[%s6766_s16 + $0x78] sm:$0xf]  ;;  %v300_v43 = vld [vmem:[%s6766_s16 + $0x24] sm:$0xf]  ;;  %v302_v48 = vld [vmem:[%s6766_s16 + $0x2c] sm:$0xf] }
  0x93   : > { %v407_v37 = vcombine.low %v399_v20, %v406_v25  ;;  %v424_v44 = vcombine.low %v416_v26, %v423_v32  ;;  %v5166_v46 = vpack.c.bf16 %v317_v36, %v315_v35  ;;  %v5167_v47 = vpack.c.bf16 %v321_v42, %v319_v41  ;;  %v304_v49 = vld [vmem:[%s6766_s16 + $0x34] sm:$0xf]  ;;  %v306_v50 = vld [vmem:[%s6766_s16 + $0x3c] sm:$0xf]  ;;  %v308_v55 = vld [vmem:[%s6766_s16 + $0x44] sm:$0xf] }
  0x94   : > { %v467_v45 = vrot.slane %v5168_v34, %v6780_v7  ;;  %v441_v51 = vcombine.low %v433_v38, %v440_v39  ;;  %v474_v52 = vrot.slane %v5169_v40, %v6780_v7  ;;  %v5170_v53 = vpack.c.bf16 %v302_v48, %v300_v43  ;;  %v310_v56 = vld [vmem:[%s6766_s16 + $0x4c] sm:$0xf]  ;;  %v312_v57 = vld [vmem:[%s6766_s16 + $0x54] sm:$0xf]  ;;  %v314_v60 = vld [vmem:[%s6766_s16 + $0x5c] sm:$0xf] }
  0x95   : > { %5423 = vmatprep.mubr.msk.bf16.mxu0 %vm539_vm0, %v407_v37  ;;  %v5171_v54 = vpack.c.bf16 %v306_v50, %v304_v49  ;;  %v450_v58 = vrot.slane %v5166_v46, %v6780_v7  ;;  %v457_v59 = vrot.slane %v5167_v47, %v6780_v7  ;;  %v5172_v61 = vpack.c.bf16 %v310_v56, %v308_v55  ;;  %v316_v62 = vld [vmem:[%s6766_s16 + $0x64] sm:$0xf]  ;;  %v318_v63 = vld [vmem:[%s6766_s16 + $0x6c] sm:$0xf]  ;;  %v320_v4 = vld [vmem:[%s6766_s16 + $0x74] sm:$0xf] }
  0x96   : > { %5424 = vmatmul.mubr.msk.bf16.vlgmr.msra.gmra.mrb[0].mxu0 %vm539_vm0, %v424_v44  ;;  %v475_v0 = vcombine.low %v467_v45, %v474_v52  ;;  %v484_v1 = vrot.slane %v5170_v53, %v6780_v7  ;;  %v5173_v3 = vpack.c.bf16 %v314_v60, %v312_v57  ;;  %v322_v5 = vld [vmem:[%s6766_s16 + $0x7c] sm:$0xf]  ;;  %v5174_v8 = vpack.c.bf16 %v318_v63, %v316_v62  ;;  %v661_v18 = vld [vmem:[#allocation5] sm:$0xff]  ;;  %v662_v19 = vld [vmem:[#allocation5 + $0x8] sm:$0xff]  ;;  %s6522_s26 = smov 96   ;;  %s6523_s14 = smov 112  }
  0x97   : > { %5427 = vmatprep.mubr.msk.bf16.mxu0 %vm539_vm0, %v441_v51  ;;  %v491_v2 = vrot.slane %v5171_v54, %v6780_v7  ;;  %v501_v6 = vrot.slane %v5172_v61, %v6780_v7  ;;  %v5175_v9 = vpack.c.bf16 %v322_v5, %v320_v4  ;;  %v458_v12 = vcombine.low %v450_v58, %v457_v59  ;;  %s6524_s15 = smov 104   ;;  %s6525_s27 = smov 64  }
  0x98   : > { %5431 = vmatprep.mubr.msk.bf16.mxu1 %vm539_vm0, %v475_v0  ;;  %v508_v11 = vrot.slane %v5173_v3, %v6780_v7  ;;  %v518_v14 = vrot.slane %v5174_v8, %v6780_v7  ;;  %v8515_v25 = vmov 0.0   ;;  %vm745_vm2 = vcmask 64512   ;;  %s6526_s6 = smov 8   ;;  %s6527_s17 = smov 16  }
  0x99   : > { %v492_v10 = vcombine.low %v484_v1, %v491_v2  ;;  %v525_v15 = vrot.slane %v5175_v9, %v6780_v7  ;;  %5439 = vmatprep.subr.bf16.mxu1 %v8515_v25  ;;  %5463 = vmatprep.subr.bf16.mxu0 %v8515_v25  ;;  %vm2312_vm3 = vcmask 130048   ;;  %s6528_s13 = smov 24   ;;  %vm4777_vm4 = vcmask 195584   ;;  %s8373_s29 = scalar_lea.vmem [#allocation10], %s5155_s10 }
  0x9a   : > { %v509_v13 = vcombine.low %v501_v6, %v508_v11  ;;  %vm4994_vm5 = vcmask 257024   ;;  %s5270_s9 = sshll.u32 %s6582_s22, 11  ;;  %s5042_s10 = sshll.u32 %s8373_s29, 4  ;;  %s8456_s10 = int_to_ptr.vmem [resolvable:$true] %s5042_s10 }
  0x9b   : > { %5432 = vmatmul.mubr.msk.bf16.vlgmr.msra.gmra.mrb[0].mxu1 %vm539_vm0, %v492_v10  ;;  %v526_v16 = vcombine.low %v518_v14, %v525_v15  ;;  %s8450_s16 = scalar_lea.hbm %s8511_s5, %s5270_s9 }
  0x9c   : > { %5435 = vmatprep.mubr.msk.bf16.mxu1 %vm539_vm0, %v509_v13 }
  0x9e   : > { %5428 = vmatmul.mubr.msk.bf16.gmra.mrb[4].mxu0 %vm539_vm0, %v458_v12 }
  0x9f   : > { %5465 = vmatprep.mubr.msk.bf16.mxu0 %vm6521_vm1, %v8515_v25 }
  0xa3   : > { %5436 = vmatmul.mubr.msk.bf16.gmra.mrb[4].mxu1 %vm539_vm0, %v526_v16 }
  0xa4   : > { %5441 = vmatprep.mubr.msk.bf16.mxu1 %vm6521_vm1, %v8515_v25 }
 0x169   : > { %v5425_v17 = vpop.f32.mrb[0].mxu0 }
 0x16a   : > { %v598_v20 = vpop.f32.mrb[1].mxu0  ;;  %v665_v22 = vadd.f32 %v5425_v17, %v661_v18 }
 0x16b   : > { %v5426_v21 = vpop.f32.mrb[2].mxu0  ;;  %v663_v7 = vadd.f32 %v661_v18, %v598_v20 }
 0x16c   : > { %v666_v23 = vadd.f32 %v5426_v21, %v662_v19  ;;  %v601_v24 = vpop.f32.mrb[3].mxu0 }
 0x16d   : > { %v664_v26 = vadd.f32 %v662_v19, %v601_v24 }
 0x16e   : > { %v6840_v27 = vpack.c.bf16 %v666_v23, %v665_v22  ;;  %v5433_v28 = vpop.f32.mrb[0].mxu1 }
 0x16f   : > { %v6842_v29 = vpack.c.bf16 %v664_v26, %v663_v7  ;;  %v673_v30 = vadd.f32 %v5433_v28, %v661_v18  ;;  %v630_v31 = vpop.f32.mrb[1].mxu1 }
 0x170   : > { %v671_v32 = vadd.f32 %v661_v18, %v630_v31  ;;  %v5434_v33 = vpop.f32.mrb[2].mxu1 }
 0x171   : > { %695 = vrot.lane.b32.xlu0 %v6842_v29, %s6520_s24  ;;  %v5429_v34 = vpop.f32.mrb[4].mxu0  ;;  %v674_v35 = vadd.f32 %v5434_v33, %v662_v19  ;;  %v633_v36 = vpop.f32.mrb[3].mxu1 }
 0x172   : > { %v614_v37 = vpop.f32.mrb[5].mxu0  ;;  %v672_v38 = vadd.f32 %v662_v19, %v633_v36  ;;  %v669_v41 = vadd.f32 %v5429_v34, %v661_v18 }
 0x173   : > { %v5430_v39 = vpop.f32.mrb[6].mxu0  ;;  %v6850_v40 = vpack.c.bf16 %v674_v35, %v673_v30  ;;  %v667_v45 = vadd.f32 %v661_v18, %v614_v37 }
 0x174   : > { %v670_v42 = vadd.f32 %v5430_v39, %v662_v19  ;;  %v617_v43 = vpop.f32.mrb[7].mxu0  ;;  %v6852_v44 = vpack.c.bf16 %v672_v38, %v671_v32 }
 0x175   : > { %v668_v46 = vadd.f32 %v662_v19, %v617_v43  ;;  %697 = vrot.lane.b32.xlu0 %v6840_v27, %s6520_s24 }
 0x176   : > { %v6856_v47 = vpack.c.bf16 %v670_v42, %v669_v41  ;;  %v5437_v48 = vpop.f32.mrb[4].mxu1 }
 0x177   : > { %v6858_v49 = vpack.c.bf16 %v668_v46, %v667_v45  ;;  %v677_v50 = vadd.f32 %v5437_v48, %v661_v18  ;;  %v646_v51 = vpop.f32.mrb[5].mxu1 }
 0x178   : > { %v675_v52 = vadd.f32 %v661_v18, %v646_v51  ;;  %v5438_v53 = vpop.f32.mrb[6].mxu1 }
 0x179   : > { %743 = vrot.lane.b32.xlu0 %v6842_v29, %s6522_s26  ;;  %699 = vrot.lane.b32.xlu1 %v6858_v49, %s6520_s24  ;;  %v678_v54 = vadd.f32 %v5438_v53, %v662_v19  ;;  %v649_v55 = vpop.f32.mrb[7].mxu1 }
 0x17a   : > { %v676_v56 = vadd.f32 %v662_v19, %v649_v55 }
 0x17b   : > { %v6864_v57 = vpack.c.bf16 %v678_v54, %v677_v50 }
 0x17c   : > { %v6866_v58 = vpack.c.bf16 %v676_v56, %v675_v52 }
 0x17d   : > { %705 = vrot.lane.b32.xlu0 %v6850_v40, %s6520_s24  ;;  %701 = vrot.lane.b32.xlu1 %v6856_v47, %s6520_s24 }
 0x181   : > { %707 = vrot.lane.b32.xlu0 %v6866_v58, %s6520_s24  ;;  %703 = vrot.lane.b32.xlu1 %v6852_v44, %s6520_s24 }
 0x185   : > { %842 = vrot.lane.b32.xlu0 %v6858_v49, %s6522_s26  ;;  %793 = vrot.lane.b32.xlu1 %v6840_v27, %s6522_s26 }
 0x189   : > { %713 = vrot.lane.b32.xlu0 %v6840_v27, %s6523_s14  ;;  %709 = vrot.lane.b32.xlu1 %v6864_v57, %s6520_s24  ;;  %s5028_s24 = scalar_lea.sflag [#allocation4], %s6760_s12 }
 0x18d   : > { %940 = vrot.lane.b32.xlu0 %v6852_v44, %s6522_s26  ;;  %711 = vrot.lane.b32.xlu1 %v6842_v29, %s6523_s14 }
 0x191   : > { %715 = vrot.lane.b32.xlu0 %v6858_v49, %s6523_s14  ;;  %891 = vrot.lane.b32.xlu1 %v6856_v47, %s6522_s26 }
 0x195   : > { %719 = vrot.lane.b32.xlu0 %v6852_v44, %s6523_s14  ;;  %717 = vrot.lane.b32.xlu1 %v6856_v47, %s6523_s14 }
 0x199   : > { %1038 = vrot.lane.b32.xlu0 %v6866_v58, %s6522_s26  ;;  %989 = vrot.lane.b32.xlu1 %v6850_v40, %s6522_s26 }
 0x19d   : > { %721 = vrot.lane.b32.xlu1 %v6850_v40, %s6523_s14  ;;  %723 = vrot.lane.b32.xlu0 %v6866_v58, %s6523_s14 }
 0x1a1   : > { %1087 = vrot.lane.b32.xlu1 %v6864_v57, %s6522_s26 }
 0x1a5   : > { %725 = vrot.lane.b32.xlu1 %v6864_v57, %s6523_s14  ;;  %s6529_s14 = smov [#allocation10]  }
 0x1e3   : > { %v6900_v59 = vpop.permute.xlu0 %695 }
 0x1e4   : > { %1136 = vrot.lane.b32.xlu0 %v6900_v59, %s6522_s26 }
 0x1e7   : > { %v6904_v60 = vpop.permute.xlu0 %697 }
 0x1e8   : > { %727 = vrot.lane.b32.xlu0 %v6842_v29, %s6524_s15  ;;  %1185 = vrot.lane.b32.xlu1 %v6904_v60, %s6522_s26 }
 0x1eb   : > { %v744_v61 = vpop.permute.xlu0 %743  ;;  %v6910_v62 = vpop.permute.xlu1 %699 }
 0x1ec   : > { %v750_v63 = vsel %vm745_vm2, %v744_v61, 0  ;;  %729 = vrot.lane.b32.xlu1 %v6840_v27, %s6524_s15  ;;  %1234 = vrot.lane.b32.xlu0 %v6910_v62, %s6522_s26 }
 0x1ed   : > { %5440 = vmatpush3.bf16.xpose.msra.mxu1 %v750_v63 }
 0x1ee   : > { %5445 = vmatprep.subr.bf16.mxu1 %v8515_v25 }
 0x1ef   : > { %v6918_v0 = vpop.permute.xlu0 %705  ;;  %v6920_v1 = vpop.permute.xlu1 %701 }
 0x1f0   : > { %731 = vrot.lane.b32.xlu0 %v6858_v49, %s6524_s15  ;;  %1283 = vrot.lane.b32.xlu1 %v6920_v1, %s6522_s26 }
 0x1f3   : > { %v6926_v2 = vpop.permute.xlu0 %707  ;;  %v6928_v3 = vpop.permute.xlu1 %703 }
 0x1f4   : > { %5442 = vmatmul.mubr.msk.bf16.vlgmr.msra.gmra.mrb[8].mxu1 %vm745_vm2, %v6842_v29  ;;  %733 = vrot.lane.b32.xlu1 %v6856_v47, %s6524_s15 }
 0x1f5   : > { %1332 = vrot.lane.b32.xlu0 %v6928_v3, %s6522_s26  ;;  %5447 = vmatprep.mubr.msk.bf16.mxu1 %vm6521_vm1, %v8515_v25 }
 0x1f7   : > { %v843_v4 = vpop.permute.xlu0 %842  ;;  %v794_v5 = vpop.permute.xlu1 %793 }
 0x1f8   : > { %v799_v6 = vsel %vm745_vm2, %v794_v5, 0  ;;  %1381 = vrot.lane.b32.xlu1 %v6918_v0, %s6522_s26  ;;  %v848_v12 = vsel %vm745_vm2, %v843_v4, 0 }
 0x1f9   : > { %735 = vrot.lane.b32.xlu0 %v6852_v44, %s6524_s15  ;;  %5446 = vmatpush3.bf16.xpose.msra.mxu1 %v799_v6 }
 0x1fa   : > { %5451 = vmatprep.subr.bf16.mxu1 %v8515_v25 }
 0x1fb   : > { %v6944_v8 = vpop.permute.xlu0 %713  ;;  %v6946_v9 = vpop.permute.xlu1 %709 }
 0x1fc   : > { %737 = vrot.lane.b32.xlu1 %v6850_v40, %s6524_s15 }
 0x1fd   : > { %1430 = vrot.lane.b32.xlu0 %v6926_v2, %s6522_s26 }
 0x1ff   : > { %v941_v10 = vpop.permute.xlu0 %940  ;;  %v6952_v11 = vpop.permute.xlu1 %711 }
 0x200   : > { %v946_v13 = vsel %vm745_vm2, %v941_v10, 0  ;;  %5448 = vmatmul.mubr.msk.bf16.vlgmr.msra.gmra.mrb[12].mxu1 %vm745_vm2, %v6840_v27  ;;  %1479 = vrot.lane.b32.xlu1 %v6946_v9, %s6522_s26 }
 0x201   : > { %739 = vrot.lane.b32.xlu0 %v6866_v58, %s6524_s15  ;;  %5452 = vmatpush3.bf16.xpose.msra.mxu1 %v848_v12 }
 0x202   : > { %5464 = vmatpush3.bf16.xpose.msra.mxu0 %v946_v13  ;;  %5453 = vmatprep.mubr.msk.bf16.mxu1 %vm6521_vm1, %v8515_v25 }
 0x203   : > { %v6964_v14 = vpop.permute.xlu0 %715  ;;  %v892_v15 = vpop.permute.xlu1 %891  ;;  %5457 = vmatprep.subr.bf16.mxu1 %v8515_v25  ;;  %5475 = vmatprep.subr.bf16.mxu0 %v8515_v25 }
 0x204   : > { %741 = vrot.lane.b32.xlu1 %v6864_v57, %s6524_s15  ;;  %v897_v18 = vsel %vm745_vm2, %v892_v15, 0  ;;  %s6438_s15 = sshll.u32 %s6529_s14, 4  ;;  %s6439_s15 = int_to_ptr.vmem [resolvable:$false] %s6438_s15 }
 0x205   : > { %1528 = vrot.lane.b32.xlu0 %v6952_v11, %s6522_s26  ;;  %p6441_p12 = scmp.lt.s32.totalorder %s8456_s10, %s6439_s15 }
 0x207   : > { %v6972_v16 = vpop.permute.xlu0 %719  ;;  %v6974_v17 = vpop.permute.xlu1 %717 }
 0x208   : > { %5454 = vmatmul.mubr.msk.bf16.vlgmr.msra.gmra.mrb[16].mxu1 %vm745_vm2, %v6858_v49  ;;  %1577 = vrot.lane.b32.xlu1 %v6944_v8, %s6522_s26 }
 0x209   : > { %5466 = vmatmul.mubr.msk.bf16.vlgmr.msra.gmra.mrb[8].mxu0 %vm745_vm2, %v6852_v44  ;;  %1724 = vrot.lane.b32.xlu0 %v6972_v16, %s6522_s26 }
 0x20a   : > { %5458 = vmatpush3.bf16.xpose.msra.mxu1 %v897_v18  ;;  %5459 = vmatprep.mubr.msk.bf16.mxu1 %vm6521_vm1, %v8515_v25 }
 0x20b   : > { %v1039_v19 = vpop.permute.xlu0 %1038  ;;  %v990_v20 = vpop.permute.xlu1 %989  ;;  %5469 = vmatprep.subr.bf16.mxu1 %v8515_v25  ;;  %5477 = vmatprep.mubr.msk.bf16.mxu0 %vm6521_vm1, %v8515_v25 }
 0x20c   : > { %v1044_v21 = vsel %vm745_vm2, %v1039_v19, 0  ;;  %1675 = vrot.lane.b32.xlu1 %v6974_v17, %s6522_s26  ;;  %v995_v23 = vsel %vm745_vm2, %v990_v20, 0 }
 0x20d   : > { %1626 = vrot.lane.b32.xlu0 %v6964_v14, %s6522_s26  ;;  %5476 = vmatpush3.bf16.xpose.msra.mxu0 %v1044_v21 }
 0x20e   : > { %5487 = vmatprep.subr.bf16.mxu0 %v8515_v25 }
 0x20f   : > { %v6996_v22 = vpop.permute.xlu1 %721  ;;  %v7024_v28 = vpop.permute.xlu0 %723 }
 0x210   : > { %1773 = vrot.lane.b32.xlu1 %v6996_v22, %s6522_s26  ;;  %8565 = vst [vmem:[#allocation16_spill] sm:$0xff] %v7024_v28 }
 0x211   : > { %5460 = vmatmul.mubr.msk.bf16.vlgmr.msra.gmra.mrb[20].mxu1 %vm745_vm2, %v6856_v47 }
 0x212   : > { %5470 = vmatpush3.bf16.xpose.msra.mxu1 %v995_v23  ;;  %5471 = vmatprep.mubr.msk.bf16.mxu1 %vm6521_vm1, %v8515_v25 }
 0x213   : > { %v1088_v24 = vpop.permute.xlu1 %1087  ;;  %5481 = vmatprep.subr.bf16.mxu1 %v8515_v25 }
 0x214   : > { %5478 = vmatmul.mubr.msk.bf16.vlgmr.msra.gmra.mrb[12].mxu0 %vm745_vm2, %v6866_v58  ;;  %v1093_v7 = vsel %vm745_vm2, %v1088_v24, 0 }
 0x215   : > { %5489 = vmatprep.mubr.msk.bf16.mxu0 %vm6521_vm1, %v8515_v25 }
 0x217   : > { %v7011_v26 = vpop.permute.xlu1 %725 }
 0x218   : > { %8564 = vst [vmem:[#allocation15_spill] sm:$0xff] %v7011_v26  ;;  %1871 = vrot.lane.b32.xlu1 %v7011_v26, %s6522_s26 }
 0x219   : > { %5472 = vmatmul.mubr.msk.bf16.vlgmr.msra.gmra.mrb[24].mxu1 %vm745_vm2, %v6850_v40 }
 0x21a   : > { %5482 = vmatpush3.bf16.xpose.msra.mxu1 %v1093_v7  ;;  %5483 = vmatprep.mubr.msk.bf16.mxu1 %vm6521_vm1, %v8515_v25 }
 0x21b   : > { %5493 = vmatprep.subr.bf16.mxu1 %v8515_v25 }
 0x221   : > { %5484 = vmatmul.mubr.msk.bf16.vlgmr.msra.gmra.mrb[28].mxu1 %vm745_vm2, %v6864_v57 }
 0x222   : > { %5495 = vmatprep.mubr.msk.bf16.mxu1 %vm6521_vm1, %v8515_v25 }
 0x256   : > { %v1137_v30 = vpop.permute.xlu0 %1136 }
 0x257   : > { %v1142_v31 = vsel %vm745_vm2, %v1137_v30, 0 }
 0x258   : > { %5488 = vmatpush3.bf16.xpose.msra.mxu0 %v1142_v31 }
 0x259   : > { %5499 = vmatprep.subr.bf16.mxu0 %v8515_v25 }
 0x25a   : > { %v7028_v32 = vpop.permute.xlu0 %727  ;;  %v1186_v33 = vpop.permute.xlu1 %1185 }
 0x25b   : > { %8566 = vst [vmem:[#allocation17_spill] sm:$0xff] %v7028_v32  ;;  %v1191_v34 = vsel %vm745_vm2, %v1186_v33, 0  ;;  %1920 = vrot.lane.b32.xlu0 %v7028_v32, %s6522_s26 }
 0x25c   : > { %5494 = vmatpush3.bf16.xpose.msra.mxu1 %v1191_v34 }
 0x25d   : > { %5505 = vmatprep.subr.bf16.mxu1 %v8515_v25 }
 0x25e   : > { %v1235_v35 = vpop.permute.xlu0 %1234  ;;  %v7034_v36 = vpop.permute.xlu1 %729 }
 0x25f   : > { %8567 = vst [vmem:[#allocation18_spill] sm:$0xff] %v7034_v36  ;;  %v1240_v37 = vsel %vm745_vm2, %v1235_v35, 0  ;;  %5490 = vmatmul.mubr.msk.bf16.vlgmr.msra.gmra.mrb[16].mxu0 %vm745_vm2, %v6900_v59  ;;  %1969 = vrot.lane.b32.xlu1 %v7034_v36, %s6522_s26 }
 0x260   : > { %5500 = vmatpush3.bf16.xpose.msra.mxu0 %v1240_v37  ;;  %5501 = vmatprep.mubr.msk.bf16.mxu0 %vm6521_vm1, %v8515_v25 }
 0x261   : > { %5511 = vmatprep.subr.bf16.mxu0 %v8515_v25 }
 0x262   : > { %v7044_v38 = vpop.permute.xlu0 %731  ;;  %v1284_v39 = vpop.permute.xlu1 %1283 }
 0x263   : > { %8568 = vst [vmem:[#allocation19_spill] sm:$0xff] %v7044_v38  ;;  %v1289_v41 = vsel %vm745_vm2, %v1284_v39, 0  ;;  %5496 = vmatmul.mubr.msk.bf16.vlgmr.msra.gmra.mrb[32].mxu1 %vm745_vm2, %v6904_v60 }
 0x264   : > { %5506 = vmatpush3.bf16.xpose.msra.mxu1 %v1289_v41  ;;  %5507 = vmatprep.mubr.msk.bf16.mxu1 %vm6521_vm1, %v8515_v25 }
 0x265   : > { %5517 = vmatprep.subr.bf16.mxu1 %v8515_v25 }
 0x266   : > { %v7052_v42 = vpop.permute.xlu1 %733 }
 0x267   : > { %8569 = vst [vmem:[#allocation20_spill] sm:$0xff] %v7052_v42  ;;  %v1333_v43 = vpop.permute.xlu0 %1332  ;;  %5502 = vmatmul.mubr.msk.bf16.vlgmr.msra.gmra.mrb[20].mxu0 %vm745_vm2, %v6910_v62  ;;  %2067 = vrot.lane.b32.xlu1 %v7052_v42, %s6522_s26 }
 0x268   : > { %v1338_v45 = vsel %vm745_vm2, %v1333_v43, 0  ;;  %5513 = vmatprep.mubr.msk.bf16.mxu0 %vm6521_vm1, %v8515_v25 }
 0x269   : > { %5512 = vmatpush3.bf16.xpose.msra.mxu0 %v1338_v45 }
 0x26a   : > { %v1382_v46 = vpop.permute.xlu1 %1381  ;;  %5523 = vmatprep.subr.bf16.mxu0 %v8515_v25 }
 0x26b   : > { %v7062_v48 = vpop.permute.xlu0 %735  ;;  %v1387_v50 = vsel %vm745_vm2, %v1382_v46, 0  ;;  %5508 = vmatmul.mubr.msk.bf16.vlgmr.msra.gmra.mrb[36].mxu1 %vm745_vm2, %v6920_v1 }
 0x26c   : > { %8570 = vst [vmem:[#allocation21_spill] sm:$0xff] %v7062_v48  ;;  %2116 = vrot.lane.b32.xlu0 %v7062_v48, %s6522_s26  ;;  %5518 = vmatpush3.bf16.xpose.msra.mxu1 %v1387_v50 }
 0x26d   : > { %5519 = vmatprep.mubr.msk.bf16.mxu1 %vm6521_vm1, %v8515_v25  ;;  %5529 = vmatprep.subr.bf16.mxu1 %v8515_v25 }
 0x26e   : > { %v7072_v51 = vpop.permute.xlu1 %737 }
 0x26f   : > { %8571 = vst [vmem:[#allocation22_spill] sm:$0xff] %v7072_v51  ;;  %v1431_v52 = vpop.permute.xlu0 %1430  ;;  %2165 = vrot.lane.b32.xlu1 %v7072_v51, %s6522_s26 }
 0x270   : > { %v1436_v53 = vsel %vm745_vm2, %v1431_v52, 0  ;;  %5514 = vmatmul.mubr.msk.bf16.vlgmr.msra.gmra.mrb[24].mxu0 %vm745_vm2, %v6928_v3  ;;  %3096 = vrot.lane.b32.xlu0 %v6840_v27, %s6525_s27 }
 0x271   : > { %5524 = vmatpush3.bf16.xpose.msra.mxu0 %v1436_v53  ;;  %5525 = vmatprep.mubr.msk.bf16.mxu0 %vm6521_vm1, %v8515_v25 }
 0x272   : > { %v1480_v54 = vpop.permute.xlu1 %1479  ;;  %5535 = vmatprep.subr.bf16.mxu0 %v8515_v25 }
 0x273   : > { %v7084_v55 = vpop.permute.xlu0 %739  ;;  %v1485_v56 = vsel %vm745_vm2, %v1480_v54, 0  ;;  %5520 = vmatmul.mubr.msk.bf16.vlgmr.msra.gmra.mrb[40].mxu1 %vm745_vm2, %v6918_v0 }
 0x274   : > { %8572 = vst [vmem:[#allocation23_spill] sm:$0xff] %v7084_v55  ;;  %1822 = vrot.lane.b32.xlu0 %v7024_v28, %s6522_s26  ;;  %5530 = vmatpush3.bf16.xpose.msra.mxu1 %v1485_v56 }
 0x275   : > { %5531 = vmatprep.mubr.msk.bf16.mxu1 %vm6521_vm1, %v8515_v25  ;;  %5541 = vmatprep.subr.bf16.mxu1 %v8515_v25 }
 0x276   : > { %v7094_v27 = vpop.permute.xlu1 %741 }
 0x277   : > { %8573 = vst [vmem:[#allocation24_spill] sm:$0xff] %v7094_v27  ;;  %v1529_v61 = vpop.permute.xlu0 %1528  ;;  %2263 = vrot.lane.b32.xlu1 %v7094_v27, %s6522_s26 }
 0x278   : > { %v1534_v63 = vsel %vm745_vm2, %v1529_v61, 0  ;;  %5526 = vmatmul.mubr.msk.bf16.vlgmr.msra.gmra.mrb[28].mxu0 %vm745_vm2, %v6926_v2  ;;  %3190 = vrot.lane.b32.xlu0 %v6856_v47, %s6525_s27 }
 0x279   : > { %5536 = vmatpush3.bf16.xpose.msra.mxu0 %v1534_v63  ;;  %5537 = vmatprep.mubr.msk.bf16.mxu0 %vm6521_vm1, %v8515_v25 }
 0x27a   : > { %v1578_v4 = vpop.permute.xlu1 %1577  ;;  %5547 = vmatprep.subr.bf16.mxu0 %v8515_v25 }
 0x27b   : > { %v1725_v5 = vpop.permute.xlu0 %1724  ;;  %v1583_v6 = vsel %vm745_vm2, %v1578_v4, 0  ;;  %5532 = vmatmul.mubr.msk.bf16.vlgmr.msra.gmra.mrb[44].mxu1 %vm745_vm2, %v6946_v9  ;;  %3049 = vrot.lane.b32.xlu1 %v6842_v29, %s6525_s27 }
 0x27c   : > { %3284 = vrot.lane.b32.xlu0 %v6850_v40, %s6525_s27  ;;  %5542 = vmatpush3.bf16.xpose.msra.mxu1 %v1583_v6  ;;  %v1730_v40 = vsel %vm745_vm2, %v1725_v5, 0 }
 0x27d   : > { %5543 = vmatprep.mubr.msk.bf16.mxu1 %vm6521_vm1, %v8515_v25  ;;  %5553 = vmatprep.subr.bf16.mxu1 %v8515_v25 }
 0x27e   : > { %v1676_v12 = vpop.permute.xlu1 %1675 }
 0x27f   : > { %v1627_v47 = vpop.permute.xlu0 %1626  ;;  %3143 = vrot.lane.b32.xlu1 %v6858_v49, %s6525_s27  ;;  %v1681_v29 = vsel %vm745_vm2, %v1676_v12, 0 }
 0x280   : > { %v1632_v10 = vsel %vm745_vm2, %v1627_v47, 0  ;;  %3378 = vrot.lane.b32.xlu0 %v6864_v57, %s6525_s27  ;;  %5538 = vmatmul.mubr.msk.bf16.vlgmr.msra.gmra.mrb[32].mxu0 %vm745_vm2, %v6952_v11 }
 0x281   : > { %5548 = vmatpush3.bf16.xpose.msra.mxu0 %v1632_v10  ;;  %5549 = vmatprep.mubr.msk.bf16.mxu0 %vm6521_vm1, %v8515_v25 }
 0x282   : > { %5559 = vmatprep.subr.bf16.mxu0 %v8515_v25  ;;  %v1774_v49 = vpop.permute.xlu1 %1773 }
 0x283   : > { %3237 = vrot.lane.b32.xlu1 %v6852_v44, %s6525_s27  ;;  %5544 = vmatmul.mubr.msk.bf16.vlgmr.msra.gmra.mrb[48].mxu1 %vm745_vm2, %v6944_v8  ;;  %v1779_v44 = vsel %vm745_vm2, %v1774_v49, 0 }
 0x284   : > { %2018 = vrot.lane.b32.xlu0 %v7044_v38, %s6522_s26  ;;  %5554 = vmatpush3.bf16.xpose.msra.mxu1 %v1681_v29 }
 0x285   : > { %5555 = vmatprep.mubr.msk.bf16.mxu1 %vm6521_vm1, %v8515_v25  ;;  %5565 = vmatprep.subr.bf16.mxu1 %v8515_v25 }
 0x287   : > { %3331 = vrot.lane.b32.xlu1 %v6866_v58, %s6525_s27 }
 0x288   : > { %3472 = vrot.lane.b32.xlu0 %v6904_v60, %s6525_s27  ;;  %5550 = vmatmul.mubr.msk.bf16.vlgmr.msra.gmra.mrb[36].mxu0 %vm745_vm2, %v6964_v14 }
 0x289   : > { %5560 = vmatpush3.bf16.xpose.msra.mxu0 %v1730_v40  ;;  %5561 = vmatprep.mubr.msk.bf16.mxu0 %vm6521_vm1, %v8515_v25 }
 0x28a   : > { %5571 = vmatprep.subr.bf16.mxu0 %v8515_v25  ;;  %v1872_v57 = vpop.permute.xlu1 %1871 }
 0x28b   : > { %3425 = vrot.lane.b32.xlu1 %v6900_v59, %s6525_s27  ;;  %5556 = vmatmul.mubr.msk.bf16.vlgmr.msra.gmra.mrb[52].mxu1 %vm745_vm2, %v6974_v17  ;;  %v1877_v58 = vsel %vm745_vm2, %v1872_v57, 0 }
 0x28c   : > { %3566 = vrot.lane.b32.xlu0 %v6920_v1, %s6525_s27  ;;  %5566 = vmatpush3.bf16.xpose.msra.mxu1 %v1779_v44 }
 0x28d   : > { %5567 = vmatprep.mubr.msk.bf16.mxu1 %vm6521_vm1, %v8515_v25  ;;  %5577 = vmatprep.subr.bf16.mxu1 %v8515_v25 }
 0x28f   : > { %3613 = vrot.lane.b32.xlu1 %v6928_v3, %s6525_s27 }
 0x290   : > { %3660 = vrot.lane.b32.xlu0 %v6918_v0, %s6525_s27  ;;  %5562 = vmatmul.mubr.msk.bf16.vlgmr.msra.gmra.mrb[40].mxu0 %vm745_vm2, %v6972_v16 }
 0x291   : > { %5573 = vmatprep.mubr.msk.bf16.mxu0 %vm6521_vm1, %v8515_v25 }
 0x293   : > { %3801 = vrot.lane.b32.xlu1 %v6952_v11, %s6525_s27  ;;  %5568 = vmatmul.mubr.msk.bf16.vlgmr.msra.gmra.mrb[56].mxu1 %vm745_vm2, %v6996_v22 }
 0x294   : > { %2214 = vrot.lane.b32.xlu0 %v7084_v55, %s6522_s26  ;;  %5578 = vmatpush3.bf16.xpose.msra.mxu1 %v1877_v58  ;;  %s6434_s26 = scalar_lea.vmem %s8456_s10, 2048 }
 0x295   : > { %5579 = vmatprep.mubr.msk.bf16.mxu1 %vm6521_vm1, %v8515_v25  ;;  %5589 = vmatprep.subr.bf16.mxu1 %v8515_v25  ;;  %p6435_p10 = scmp.ne.s32.totalorder %s8456_s10, %s6434_s26 }
 0x297   : > { %3989 = vrot.lane.b32.xlu1 %v6972_v16, %s6525_s27  ;;  %p6436_p3 = pnand %p6435_p10, %p6709_p5 }
 0x298   : > { %3754 = vrot.lane.b32.xlu0 %v6946_v9, %s6525_s27 }
 0x299   : > { %p6437_p7 = pneg %p6436_p3 }
 0x29b   : > { %3519 = vrot.lane.b32.xlu1 %v6910_v62, %s6525_s27  ;;  %5580 = vmatmul.mubr.msk.bf16.vlgmr.msra.gmra.mrb[60].mxu1 %vm745_vm2, %v7011_v26 }
 0x29c   : > { %3848 = vrot.lane.b32.xlu0 %v6944_v8, %s6525_s27  ;;  %5591 = vmatprep.mubr.msk.bf16.mxu1 %vm6521_vm1, %v8515_v25 }
 0x29f   : > { %3707 = vrot.lane.b32.xlu1 %v6926_v2, %s6525_s27 }
 0x2a0   : > { %3942 = vrot.lane.b32.xlu0 %v6974_v17, %s6525_s27 }
 0x2a3   : > { %3895 = vrot.lane.b32.xlu1 %v6964_v14, %s6525_s27 }
 0x2a4   : > { %4036 = vrot.lane.b32.xlu0 %v6996_v22, %s6525_s27 }
 0x2c7   : > { %v7194_v59 = vpop.f32.mrb[8].mxu1 }
 0x2c8   : > { %v5443_v60 = vpop.f32.mrb[9].mxu1  ;;  %v2313_v62 = vsel %vm2312_vm3, %v7194_v59, -inf }
 0x2c9   : > { %v7198_v0 = vpop.f32.mrb[10].mxu1  ;;  %2314 = vmax.xlane.f32.xlu0 %v2313_v62 }
 0x2ca   : > { %v5444_v1 = vpop.f32.mrb[11].mxu1  ;;  %v2316_v33 = vsel %vm2312_vm3, %v7198_v0, -inf }
 0x2cd   : > { %v1921_v15 = vpop.permute.xlu0 %1920 }
 0x2ce   : > { %v1926_v57 = vsel %vm745_vm2, %v1921_v15, 0 }
 0x2d1   : > { %v1970_v2 = vpop.permute.xlu1 %1969 }
 0x2d2   : > { %v1975_v3 = vsel %vm745_vm2, %v1970_v2, 0 }
 0x2d3   : > { %v7201_v8 = vpop.f32.mrb[12].mxu1  ;;  %5590 = vmatpush3.bf16.xpose.msra.mxu1 %v1975_v3 }
 0x2d4   : > { %v5449_v9 = vpop.f32.mrb[13].mxu1  ;;  %5601 = vmatprep.subr.bf16.mxu1 %v8515_v25  ;;  %v2319_v39 = vsel %vm2312_vm3, %v7201_v8, -inf }
 0x2d5   : > { %v7204_v11 = vpop.f32.mrb[14].mxu1 }
 0x2d6   : > { %v5450_v13 = vpop.f32.mrb[15].mxu1  ;;  %v2322_v54 = vsel %vm2312_vm3, %v7204_v11, -inf }
 0x2d9   : > { %v2068_v14 = vpop.permute.xlu1 %2067 }
 0x2da   : > { %v2073_v16 = vsel %vm745_vm2, %v2068_v14, 0  ;;  %5592 = vmatmul.mubr.msk.bf16.vlgmr.msra.gmra.mrb[64].mxu1 %vm745_vm2, %v7034_v36 }
 0x2db   : > { %v7209_v17 = vpop.f32.mrb[16].mxu1  ;;  %5602 = vmatpush3.bf16.xpose.msra.mxu1 %v2073_v16  ;;  %5603 = vmatprep.mubr.msk.bf16.mxu1 %vm6521_vm1, %v8515_v25 }
 0x2dc   : > { %v7213_v18 = vpop.f32.mrb[8].mxu0  ;;  %v5455_v19 = vpop.f32.mrb[17].mxu1  ;;  %5613 = vmatprep.subr.bf16.mxu1 %v8515_v25  ;;  %v2325_v29 = vsel %vm2312_vm3, %v7209_v17, -inf }
 0x2dd   : > { %v5467_v20 = vpop.f32.mrb[9].mxu0  ;;  %v7216_v21 = vpop.f32.mrb[18].mxu1  ;;  %v2337_v22 = vsel %vm2312_vm3, %v7213_v18, -inf }
 0x2de   : > { %v7220_v23 = vpop.f32.mrb[10].mxu0  ;;  %v7222_v24 = vpop.permute.xlu0 %2116  ;;  %2338 = vmax.xlane.f32.xlu1 %v2337_v22  ;;  %v2328_v60 = vsel %vm2312_vm3, %v7216_v21, -inf }
 0x2df   : > { %v5456_v7 = vpop.f32.mrb[19].mxu1  ;;  %v5468_v30 = vpop.f32.mrb[11].mxu0  ;;  %v2340_v31 = vsel %vm2312_vm3, %v7220_v23, -inf }
 0x2e0   : > { %2341 = vmax.xlane.f32.xlu0 %v2340_v31 }
 0x2e1   : > { %v2166_v34 = vpop.permute.xlu1 %2165 }
 0x2e2   : > { %v3097_v35 = vpop.permute.xlu0 %3096  ;;  %2317 = vmax.xlane.f32.xlu1 %v2316_v33  ;;  %v2171_v37 = vsel %vm745_vm2, %v2166_v34, 0  ;;  %5604 = vmatmul.mubr.msk.bf16.vlgmr.msra.gmra.mrb[68].mxu1 %vm745_vm2, %v7052_v42  ;;  %v2122_v33 = vsel %vm745_vm2, %v7222_v24, 0 }
 0x2e3   : > { %5614 = vmatpush3.bf16.xpose.msra.mxu1 %v2171_v37  ;;  %5615 = vmatprep.mubr.msk.bf16.mxu1 %vm6521_vm1, %v8515_v25 }
 0x2e4   : > { %v7235_v41 = vpop.f32.mrb[20].mxu1  ;;  %2320 = vmax.xlane.f32.xlu0 %v2319_v39  ;;  %5625 = vmatprep.subr.bf16.mxu1 %v8515_v25 }
 0x2e5   : > { %v5461_v43 = vpop.f32.mrb[21].mxu1  ;;  %v2331_v62 = vsel %vm2312_vm3, %v7235_v41, -inf }
 0x2e6   : > { %v1823_v45 = vpop.permute.xlu0 %1822  ;;  %v7238_v46 = vpop.f32.mrb[22].mxu1 }
 0x2e7   : > { %v1828_v50 = vsel %vm745_vm2, %v1823_v45, 0  ;;  %v5462_v52 = vpop.f32.mrb[23].mxu1  ;;  %v7241_v53 = vpop.f32.mrb[12].mxu0  ;;  %v2334_v2 = vsel %vm2312_vm3, %v7238_v46, -inf }
 0x2e8   : > { %5572 = vmatpush3.bf16.xpose.msra.mxu0 %v1828_v50  ;;  %2323 = vmax.xlane.f32.xlu0 %v2322_v54  ;;  %v5479_v56 = vpop.f32.mrb[13].mxu0  ;;  %v2349_v61 = vsel %vm2312_vm3, %v7241_v53, -inf }
 0x2e9   : > { %v7247_v63 = vpop.f32.mrb[14].mxu0  ;;  %2350 = vmax.xlane.f32.xlu1 %v2349_v61  ;;  %v2264_v4 = vpop.permute.xlu1 %2263  ;;  %5583 = vmatprep.subr.bf16.mxu0 %v8515_v25 }
 0x2ea   : > { %v7250_v5 = vpop.permute.xlu0 %3190  ;;  %v2269_v6 = vsel %vm745_vm2, %v2264_v4, 0  ;;  %v5480_v47 = vpop.f32.mrb[15].mxu0  ;;  %5616 = vmatmul.mubr.msk.bf16.vlgmr.msra.gmra.mrb[72].mxu1 %vm745_vm2, %v7072_v51  ;;  %v2352_v10 = vsel %vm2312_vm3, %v7247_v63, -inf }
 0x2eb   : > { %8574 = vst [vmem:[#allocation25_spill] sm:$0xff] %v7250_v5  ;;  %5626 = vmatpush3.bf16.xpose.msra.mxu1 %v2269_v6  ;;  %5627 = vmatprep.mubr.msk.bf16.mxu1 %vm6521_vm1, %v8515_v25 }
 0x2ec   : > { %v7259_v12 = vpop.f32.mrb[24].mxu1  ;;  %2353 = vmax.xlane.f32.xlu0 %v2352_v10  ;;  %5637 = vmatprep.subr.bf16.mxu1 %v8515_v25 }
 0x2ed   : > { %v5473_v40 = vpop.f32.mrb[25].mxu1  ;;  %2326 = vmax.xlane.f32.xlu1 %v2325_v29  ;;  %v2343_v9 = vsel %vm2312_vm3, %v7259_v12, -inf  ;;  %v3050_v24 = vpop.permute.xlu1 %3049 }
 0x2ee   : > { %v7264_v49 = vpop.permute.xlu0 %3284  ;;  %v7266_v44 = vpop.f32.mrb[26].mxu1 }
 0x2ef   : > { %8575 = vst [vmem:[#allocation26_spill] sm:$0xff] %v7264_v49  ;;  %v5474_v58 = vpop.f32.mrb[27].mxu1  ;;  %5574 = vmatmul.mubr.msk.bf16.vlgmr.msra.gmra.mrb[44].mxu0 %vm745_vm2, %v7024_v28  ;;  %v2346_v20 = vsel %vm2312_vm3, %v7266_v44, -inf }
 0x2f0   : > { %5584 = vmatpush3.bf16.xpose.msra.mxu0 %v1926_v57  ;;  %2329 = vmax.xlane.f32.xlu0 %v2328_v60 }
 0x2f1   : > { %2332 = vmax.xlane.f32.xlu1 %v2331_v62  ;;  %5585 = vmatprep.mubr.msk.bf16.mxu0 %vm6521_vm1, %v8515_v25  ;;  %v7329_v39 = vpop.permute.xlu1 %3143 }
 0x2f2   : > { %v7277_v1 = vpop.permute.xlu0 %3378  ;;  %5628 = vmatmul.mubr.msk.bf16.vlgmr.msra.gmra.mrb[76].mxu1 %vm745_vm2, %v7094_v27  ;;  %5595 = vmatprep.subr.bf16.mxu0 %v8515_v25 }
 0x2f3   : > { %8576 = vst [vmem:[#allocation27_spill] sm:$0xff] %v7277_v1  ;;  %5638 = vmatpush3.bf16.msra.mxu1 %v3097_v35  ;;  %5639 = vmatprep.mubr.msk.bf16.mxu1 %vm6521_vm1, %v8515_v25 }
 0x2f4   : > { %2335 = vmax.xlane.f32.xlu0 %v2334_v2  ;;  %v7286_v3 = vpop.f32.mrb[28].mxu1  ;;  %5649 = vmatprep.subr.bf16.mxu1 %v8515_v25 }
 0x2f5   : > { %v5485_v13 = vpop.f32.mrb[29].mxu1  ;;  %2344 = vmax.xlane.f32.xlu1 %v2343_v9  ;;  %v2355_v22 = vsel %vm2312_vm3, %v7286_v3, -inf  ;;  %v7337_v56 = vpop.permute.xlu1 %3237 }
 0x2f6   : > { %v2019_v14 = vpop.permute.xlu0 %2018  ;;  %v7291_v15 = vpop.f32.mrb[30].mxu1  ;;  %8580 = vst [vmem:[#allocation31_spill] sm:$0xff] %v7337_v56 }
 0x2f7   : > { %v2024_v16 = vsel %vm745_vm2, %v2019_v14, 0  ;;  %v5486_v19 = vpop.f32.mrb[31].mxu1  ;;  %5586 = vmatmul.mubr.msk.bf16.vlgmr.msra.gmra.mrb[48].mxu0 %vm745_vm2, %v7028_v32  ;;  %v2358_v30 = vsel %vm2312_vm3, %v7291_v15, -inf }
 0x2f8   : > { %5596 = vmatpush3.bf16.xpose.msra.mxu0 %v2024_v16  ;;  %2347 = vmax.xlane.f32.xlu0 %v2346_v20 }
 0x2f9   : > { %2356 = vmax.xlane.f32.xlu1 %v2355_v22  ;;  %5597 = vmatprep.mubr.msk.bf16.mxu0 %vm6521_vm1, %v8515_v25  ;;  %v7351_v60 = vpop.permute.xlu1 %3331 }
 0x2fa   : > { %v7302_v7 = vpop.permute.xlu0 %3472  ;;  %5607 = vmatprep.subr.bf16.mxu0 %v8515_v25  ;;  %8581 = vst [vmem:[#allocation32_spill] sm:$0xff] %v7351_v60 }
 0x2fb   : > { %8577 = vst [vmem:[#allocation28_spill] sm:$0xff] %v7302_v7 }
 0x2fc   : > { %2359 = vmax.xlane.f32.xlu0 %v2358_v30 }
 0x2fd   : > { %v7365_v30 = vpop.permute.xlu1 %3425 }
 0x2fe   : > { %v7307_v31 = vpop.permute.xlu0 %3566  ;;  %8583 = vst [vmem:[#allocation34_spill] sm:$0xff] %v7365_v30 }
 0x2ff   : > { %8578 = vst [vmem:[#allocation29_spill] sm:$0xff] %v7307_v31  ;;  %5598 = vmatmul.mubr.msk.bf16.vlgmr.msra.gmra.mrb[52].mxu0 %vm745_vm2, %v7044_v38 }
 0x300   : > { %5608 = vmatpush3.bf16.xpose.msra.mxu0 %v2122_v33  ;;  %5609 = vmatprep.mubr.msk.bf16.mxu0 %vm6521_vm1, %v8515_v25 }
 0x301   : > { %5619 = vmatprep.subr.bf16.mxu0 %v8515_v25 }
 0x302   : > { %v7316_v34 = vpop.permute.xlu0 %3660 }
 0x303   : > { %8579 = vst [vmem:[#allocation30_spill] sm:$0xff] %v7316_v34 }
 0x306   : > { %v2215_v35 = vpop.permute.xlu0 %2214 }
 0x307   : > { %v2220_v37 = vsel %vm745_vm2, %v2215_v35, 0  ;;  %5610 = vmatmul.mubr.msk.bf16.vlgmr.msra.gmra.mrb[56].mxu0 %vm745_vm2, %v7062_v48 }
 0x308   : > { %5620 = vmatpush3.bf16.xpose.msra.mxu0 %v2220_v37  ;;  %5621 = vmatprep.mubr.msk.bf16.mxu0 %vm6521_vm1, %v8515_v25 }
 0x309   : > { %5631 = vmatprep.subr.bf16.mxu0 %v8515_v25 }
 0x30a   : > { %v7357_v13 = vpop.permute.xlu0 %3754 }
 0x30b   : > { %8582 = vst [vmem:[#allocation33_spill] sm:$0xff] %v7357_v13 }
 0x30f   : > { %5622 = vmatmul.mubr.msk.bf16.vlgmr.msra.gmra.mrb[60].mxu0 %vm745_vm2, %v7084_v55 }
 0x310   : > { %5632 = vmatpush3.bf16.msra.mxu0 %v3050_v24  ;;  %5633 = vmatprep.mubr.msk.bf16.mxu0 %vm6521_vm1, %v8515_v25  ;;  %v7371_v24 = vpop.permute.xlu0 %3848 }
 0x311   : > { %5643 = vmatprep.subr.bf16.mxu0 %v8515_v25  ;;  %8584 = vst [vmem:[#allocation35_spill] sm:$0xff] %v7371_v24 }
 0x332   : > { %v7331_v43 = vpop.f32.mrb[16].mxu0 }
 0x333   : > { %v5491_v45 = vpop.f32.mrb[17].mxu0  ;;  %v2361_v57 = vsel %vm2312_vm3, %v7331_v43, -inf }
 0x334   : > { %v7333_v50 = vpop.f32.mrb[18].mxu0 }
 0x335   : > { %v5492_v52 = vpop.f32.mrb[19].mxu0  ;;  %v2364_v2 = vsel %vm2312_vm3, %v7333_v50, -inf }
 0x336   : > { %v7335_v54 = vpop.f32.mrb[32].mxu1 }
 0x337   : > { %v5497_v61 = vpop.f32.mrb[33].mxu1  ;;  %v2367_v4 = vsel %vm2312_vm3, %v7335_v54, -inf }
 0x338   : > { %v7341_v6 = vpop.f32.mrb[34].mxu1  ;;  %2368 = vmax.xlane.f32.xlu1 %v2367_v4 }
 0x339   : > { %v5498_v47 = vpop.f32.mrb[35].mxu1  ;;  %v2370_v10 = vsel %vm2312_vm3, %v7341_v6, -inf }
 0x33a   : > { %v7345_v29 = vpop.f32.mrb[20].mxu0  ;;  %2371 = vmax.xlane.f32.xlu0 %v2370_v10 }
 0x33b   : > { %v5503_v40 = vpop.f32.mrb[21].mxu0  ;;  %v2373_v35 = vsel %vm2312_vm3, %v7345_v29, -inf }
 0x33c   : > { %v7349_v58 = vpop.f32.mrb[22].mxu0  ;;  %2362 = vmax.xlane.f32.xlu1 %v2361_v57  ;;  %v7383_v57 = vpop.permute.xlu1 %3613 }
 0x33d   : > { %v5504_v62 = vpop.f32.mrb[23].mxu0  ;;  %v2376_v52 = vsel %vm2312_vm3, %v7349_v58, -inf  ;;  %8585 = vst [vmem:[#allocation36_spill] sm:$0xff] %v7383_v57 }
 0x33e   : > { %2365 = vmax.xlane.f32.xlu0 %v2364_v2  ;;  %v7355_v9 = vpop.f32.mrb[36].mxu1 }
 0x33f   : > { %v5509_v14 = vpop.f32.mrb[37].mxu1  ;;  %v2379_v16 = vsel %vm2312_vm3, %v7355_v9, -inf }
 0x340   : > { %v7361_v19 = vpop.f32.mrb[38].mxu1  ;;  %2380 = vmax.xlane.f32.xlu1 %v2379_v16 }
 0x341   : > { %v5510_v20 = vpop.f32.mrb[39].mxu1  ;;  %v2382_v22 = vsel %vm2312_vm3, %v7361_v19, -inf }
 0x342   : > { %2383 = vmax.xlane.f32.xlu0 %v2382_v22  ;;  %v7391_v20 = vpop.permute.xlu0 %3942 }
 0x343   : > { %v7367_v33 = vpop.f32.mrb[24].mxu0  ;;  %8586 = vst [vmem:[#allocation37_spill] sm:$0xff] %v7391_v20 }
 0x344   : > { %v5515_v37 = vpop.f32.mrb[25].mxu0  ;;  %2374 = vmax.xlane.f32.xlu1 %v2373_v35  ;;  %v2385_v16 = vsel %vm2312_vm3, %v7367_v33, -inf }
 0x345   : > { %v7373_v45 = vpop.f32.mrb[26].mxu0 }
 0x346   : > { %v5516_v61 = vpop.f32.mrb[27].mxu0  ;;  %2377 = vmax.xlane.f32.xlu0 %v2376_v52  ;;  %v7377_v4 = vpop.f32.mrb[40].mxu1  ;;  %v2388_v37 = vsel %vm2312_vm3, %v7373_v45, -inf }
 0x347   : > { %v5521_v47 = vpop.f32.mrb[41].mxu1  ;;  %v2391_v10 = vsel %vm2312_vm3, %v7377_v4, -inf  ;;  %v7407_v25 = vpop.permute.xlu0 %4036 }
 0x348   : > { %v7381_v40 = vpop.f32.mrb[42].mxu1  ;;  %2392 = vmax.xlane.f32.xlu1 %v2391_v10  ;;  %v7399_v47 = vpop.permute.xlu1 %3801  ;;  %8588 = vst [vmem:[#allocation39_spill] sm:$0xff] %v7407_v25 }
 0x349   : > { %v5522_v62 = vpop.f32.mrb[43].mxu1  ;;  %v2394_v2 = vsel %vm2312_vm3, %v7381_v40, -inf  ;;  %8587 = vst [vmem:[#allocation38_spill] sm:$0xff] %v7399_v47 }
 0x34a   : > { %2395 = vmax.xlane.f32.xlu0 %v2394_v2 }
 0x34b   : > { %v7387_v14 = vpop.f32.mrb[28].mxu0 }
 0x34c   : > { %v5527_v22 = vpop.f32.mrb[29].mxu0  ;;  %2386 = vmax.xlane.f32.xlu1 %v2385_v16 }
 0x34d   : > { %v7393_v35 = vpop.f32.mrb[30].mxu0 }
 0x34e   : > { %v5528_v52 = vpop.f32.mrb[31].mxu0  ;;  %2389 = vmax.xlane.f32.xlu0 %v2388_v37  ;;  %v7397_v61 = vpop.f32.mrb[44].mxu1  ;;  %v2397_v37 = vsel %vm2312_vm3, %v7387_v14, -inf }
 0x34f   : > { %v5533_v10 = vpop.f32.mrb[45].mxu1  ;;  %v2403_v62 = vsel %vm2312_vm3, %v7397_v61, -inf }
 0x350   : > { %v7403_v2 = vpop.f32.mrb[46].mxu1  ;;  %2404 = vmax.xlane.f32.xlu1 %v2403_v62  ;;  %v7413_v10 = vpop.permute.xlu1 %3989  ;;  %v2400_v62 = vsel %vm2312_vm3, %v7393_v35, -inf }
 0x351   : > { %v5534_v22 = vpop.f32.mrb[47].mxu1  ;;  %v2406_v16 = vsel %vm2312_vm3, %v7403_v2, -inf  ;;  %8589 = vst [vmem:[#allocation40_spill] sm:$0xff] %v7413_v10 }
 0x352   : > { %2407 = vmax.xlane.f32.xlu0 %v2406_v16 }
 0x353   : > { %v7409_v52 = vpop.f32.mrb[32].mxu0 }
 0x354   : > { %v5539_v27 = vpop.f32.mrb[33].mxu0  ;;  %2398 = vmax.xlane.f32.xlu1 %v2397_v37  ;;  %v7428_v10 = vpop.permute.xlu1 %3519 }
 0x355   : > { %v7415_v55 = vpop.f32.mrb[34].mxu0  ;;  %8590 = vst [vmem:[#allocation41_spill] sm:$0xff] %v7428_v10 }
 0x356   : > { %v5540_v22 = vpop.f32.mrb[35].mxu0  ;;  %v2315_v51 = vpop.xlane.xlu0 %2314  ;;  %2401 = vmax.xlane.f32.xlu0 %v2400_v62 }
 0x357   : > { %v2505_v48 = vsub.f32 %v7194_v59, %v2315_v51  ;;  %v7420_v16 = vpop.f32.mrb[48].mxu1 }
 0x358   : > { %v5545_v42 = vpop.f32.mrb[49].mxu1  ;;  %v2415_v36 = vsel %vm2312_vm3, %v7420_v16, -inf }
 0x359   : > { %v2569_v27 = vmul.f32 1.442695, %v2505_v48  ;;  %2416 = vmax.xlane.f32.xlu1 %v2415_v36  ;;  %v7424_v37 = vpop.f32.mrb[50].mxu1  ;;  %v2409_v42 = vsel %vm2312_vm3, %v7409_v52, -inf }
 0x35a   : > { %v5546_v38 = vpop.f32.mrb[51].mxu1  ;;  %v2418_v32 = vsel %vm2312_vm3, %v7424_v37, -inf }
 0x35b   : > { %6064 = vpow2.f32 %v2569_v27  ;;  %v7430_v62 = vpop.f32.mrb[36].mxu0  ;;  %2419 = vmax.xlane.f32.xlu0 %v2418_v32  ;;  %v2412_v38 = vsel %vm2312_vm3, %v7415_v55, -inf  ;;  %v7444_v32 = vpop.permute.xlu1 %3707 }
 0x35c   : > { %v5551_v51 = vpop.f32.mrb[37].mxu0  ;;  %8591 = vst [vmem:[#allocation42_spill] sm:$0xff] %v7444_v32 }
 0x35d   : > { %v7434_v59 = vpop.f32.mrb[38].mxu0  ;;  %2410 = vmax.xlane.f32.xlu1 %v2409_v42 }
 0x35e   : > { %v5552_v36 = vpop.f32.mrb[39].mxu0  ;;  %v7438_v48 = vpop.f32.mrb[52].mxu1 }
 0x35f   : > { %2413 = vmax.xlane.f32.xlu0 %v2412_v38  ;;  %v5557_v22 = vpop.f32.mrb[53].mxu1  ;;  %v2427_v27 = vsel %vm2312_vm3, %v7438_v48, -inf  ;;  %v2421_v38 = vsel %vm2312_vm3, %v7430_v62, -inf  ;;  %v7462_v13 = vpop.permute.xlu1 %3895 }
 0x360   : > { %v7442_v25 = vpop.f32.mrb[54].mxu1  ;;  %8592 = vst [vmem:[#allocation43_spill] sm:$0xff] %v7462_v13 }
 0x361   : > { %2428 = vmax.xlane.f32.xlu1 %v2427_v27  ;;  %v5558_v51 = vpop.f32.mrb[55].mxu1  ;;  %v2430_v42 = vsel %vm2312_vm3, %v7442_v25, -inf  ;;  %v2424_v27 = vsel %vm2312_vm3, %v7434_v59, -inf }
 0x363   : > { %v7448_v36 = vpop.f32.mrb[40].mxu0  ;;  %2431 = vmax.xlane.f32.xlu0 %v2430_v42 }
 0x364   : > { %v5563_v20 = vpop.f32.mrb[41].mxu0 }
 0x365   : > { %v7452_v22 = vpop.eup %6064  ;;  %v7454_v47 = vpop.f32.mrb[42].mxu0  ;;  %2422 = vmax.xlane.f32.xlu1 %v2421_v38 }
 0x366   : > { %v5564_v24 = vpop.f32.mrb[43].mxu0  ;;  %v7458_v51 = vpop.f32.mrb[56].mxu1  ;;  %v2697_v32 = vsel %vm2312_vm3, %v7452_v22, 0.0 }
 0x367   : > { %2425 = vmax.xlane.f32.xlu0 %v2424_v27  ;;  %v5569_v20 = vpop.f32.mrb[57].mxu1 }
 0x368   : > { %v7464_v42 = vpop.f32.mrb[58].mxu1 }
 0x369   : > { %2698 = vadd.xlane.f32.xlu1 %v2697_v32  ;;  %v5570_v57 = vpop.f32.mrb[59].mxu1 }
 0x36b   : > { %v2339_v34 = vpop.xlane.xlu1 %2338 }
 0x36c   : > { %v2513_v38 = vsub.f32 %v7213_v18, %v2339_v34 }
 0x36d   : > { %v2342_v24 = vpop.xlane.xlu0 %2341 }
 0x36e   : > { %v2585_v26 = vmul.f32 1.442695, %v2513_v38  ;;  %v2514_v10 = vsub.f32 %v7220_v23, %v2342_v24  ;;  %v7468_v31 = vpop.f32.mrb[60].mxu1 }
 0x36f   : > { %v2318_v28 = vpop.xlane.xlu1 %2317  ;;  %v5581_v7 = vpop.f32.mrb[61].mxu1 }
 0x370   : > { %6066 = vpow2.f32 %v2585_v26  ;;  %v2506_v13 = vsub.f32 %v7198_v0, %v2318_v28  ;;  %v7471_v27 = vpop.f32.mrb[62].mxu1  ;;  %v2587_v32 = vmul.f32 1.442695, %v2514_v10 }
 0x371   : > { %v2321_v20 = vpop.xlane.xlu0 %2320  ;;  %v5582_v1 = vpop.f32.mrb[63].mxu1 }
 0x372   : > { %v2571_v57 = vmul.f32 1.442695, %v2506_v13  ;;  %v2507_v30 = vsub.f32 %v7201_v8, %v2321_v20  ;;  %v2433_v20 = vsel %vm2312_vm3, %v7448_v36, -inf }
 0x374   : > { %6068 = vpow2.f32 %v2571_v57  ;;  %v2573_v34 = vmul.f32 1.442695, %v2507_v30 }
 0x375   : > { %v2324_v18 = vpop.xlane.xlu0 %2323  ;;  %6070 = vpow2.f32 %v2587_v32 }
 0x376   : > { %v2351_v23 = vpop.xlane.xlu1 %2350  ;;  %6072 = vpow2.f32 %v2573_v34  ;;  %v2508_v26 = vsub.f32 %v7204_v11, %v2324_v18  ;;  %v2442_v18 = vsel %vm2312_vm3, %v7464_v42, -inf }
 0x377   : > { %v2517_v38 = vsub.f32 %v7241_v53, %v2351_v23  ;;  %v2439_v53 = vsel %vm2312_vm3, %v7458_v51, -inf  ;;  %v2436_v23 = vsel %vm2312_vm3, %v7454_v47, -inf }
 0x378   : > { %v2575_v8 = vmul.f32 1.442695, %v2508_v26 }
 0x379   : > { %v2593_v28 = vmul.f32 1.442695, %v2517_v38  ;;  %v2354_v0 = vpop.xlane.xlu0 %2353 }
 0x37a   : > { %v7475_v24 = vpop.eup %6066  ;;  %v2518_v13 = vsub.f32 %v7247_v63, %v2354_v0  ;;  %v2451_v0 = vsel %vm2312_vm3, %v7468_v31, -inf }
 0x37b   : > { %8593 = vst [vmem:[#allocation44_spill] sm:$0xff] %v7475_v24  ;;  %v2721_v1 = vsel %vm2312_vm3, %v7475_v24, 0.0  ;;  %6074 = vpow2.f32 %v2593_v28 }
 0x37c   : > { %2722 = vadd.xlane.f32.xlu1 %v2721_v1  ;;  %6076 = vpow2.f32 %v2575_v8  ;;  %v2595_v11 = vmul.f32 1.442695, %v2518_v13  ;;  %v2454_v13 = vsel %vm2312_vm3, %v7471_v27, -inf }
 0x37e   : > { %v7480_v7 = vpop.eup %6068  ;;  %6078 = vpow2.f32 %v2595_v11  ;;  %v2327_v11 = vpop.xlane.xlu1 %2326 }
 0x37f   : > { %v2700_v30 = vsel %vm2312_vm3, %v7480_v7, 0.0  ;;  %v7487_v10 = vpop.eup %6070 }
 0x380   : > { %8594 = vst [vmem:[#allocation45_spill] sm:$0xff] %v7487_v10  ;;  %2440 = vmax.xlane.f32.xlu1 %v2439_v53  ;;  %2701 = vadd.xlane.f32.xlu0 %v2700_v30  ;;  %v2724_v32 = vsel %vm2312_vm3, %v7487_v10, 0.0  ;;  %v7493_v57 = vpop.eup %6072 }
 0x381   : > { %v2703_v63 = vsel %vm2312_vm3, %v7493_v57, 0.0 }
 0x384   : > { %2434 = vmax.xlane.f32.xlu1 %v2433_v20  ;;  %2725 = vadd.xlane.f32.xlu0 %v2724_v32 }
 0x385   : > { %v7499_v34 = vpop.eup %6074 }
 0x386   : > { %8595 = vst [vmem:[#allocation46_spill] sm:$0xff] %v7499_v34  ;;  %v2733_v38 = vsel %vm2312_vm3, %v7499_v34, 0.0  ;;  %v7505_v26 = vpop.eup %6076 }
 0x387   : > { %8596 = vst [vmem:[#allocation47_spill] sm:$0xff] %v7505_v26  ;;  %v2706_v28 = vsel %vm2312_vm3, %v7505_v26, 0.0 }
 0x388   : > { %2704 = vadd.xlane.f32.xlu1 %v2703_v63  ;;  %2443 = vmax.xlane.f32.xlu0 %v2442_v18  ;;  %v7511_v1 = vpop.eup %6078  ;;  %v2330_v63 = vpop.xlane.xlu0 %2329  ;;  %v2509_v18 = vsub.f32 %v7209_v17, %v2327_v11 }
 0x389   : > { %8597 = vst [vmem:[#allocation48_spill] sm:$0xff] %v7511_v1  ;;  %v2736_v8 = vsel %vm2312_vm3, %v7511_v1, 0.0 }
 0x38c   : > { %2437 = vmax.xlane.f32.xlu0 %v2436_v23  ;;  %2734 = vadd.xlane.f32.xlu1 %v2733_v38  ;;  %v2510_v23 = vsub.f32 %v7216_v21, %v2330_v63  ;;  %v2336_v49 = vpop.xlane.xlu0 %2335 }
 0x38d   : > { %v2512_v63 = vsub.f32 %v7238_v46, %v2336_v49 }
 0x390   : > { %2707 = vadd.xlane.f32.xlu0 %v2706_v28  ;;  %2452 = vmax.xlane.f32.xlu1 %v2451_v0  ;;  %v2577_v28 = vmul.f32 1.442695, %v2509_v18  ;;  %v2333_v0 = vpop.xlane.xlu1 %2332  ;;  %v2348_v60 = vpop.xlane.xlu0 %2347 }
 0x391   : > { %v2511_v17 = vsub.f32 %v7235_v41, %v2333_v0  ;;  %v2583_v41 = vmul.f32 1.442695, %v2512_v63  ;;  %v2516_v26 = vsub.f32 %v7266_v44, %v2348_v60 }
 0x392   : > { %6080 = vpow2.f32 %v2577_v28 }
 0x394   : > { %2737 = vadd.xlane.f32.xlu0 %v2736_v8 }
 0x398   : > { %2455 = vmax.xlane.f32.xlu0 %v2454_v13  ;;  %v2579_v13 = vmul.f32 1.442695, %v2510_v23 }
 0x39a   : > { %6082 = vpow2.f32 %v2579_v13 }
 0x39c   : > { %v7541_v13 = vpop.eup %6080 }
 0x39d   : > { %8601 = vst [vmem:[#allocation52_spill] sm:$0xff] %v7541_v13  ;;  %v2709_v63 = vsel %vm2312_vm3, %v7541_v13, 0.0 }
 0x3ad   : > { %v7517_v53 = vpop.f32.mrb[64].mxu1 }
 0x3ae   : > { %v5593_v30 = vpop.f32.mrb[65].mxu1  ;;  %v2463_v5 = vsel %vm2312_vm3, %v7517_v53, -inf }
 0x3af   : > { %v7519_v20 = vpop.f32.mrb[66].mxu1  ;;  %v2345_v30 = vpop.xlane.xlu1 %2344 }
 0x3b0   : > { %8598 = vst [vmem:[#allocation49_spill] sm:$0xff] %v7519_v20  ;;  %v5594_v32 = vpop.f32.mrb[67].mxu1 }
 0x3b3   : > { %v7533_v24 = vpop.xlane.xlu1 %2356 }
 0x3b5   : > { %v7523_v38 = vpop.f32.mrb[68].mxu1 }
 0x3b6   : > { %8599 = vst [vmem:[#allocation50_spill] sm:$0xff] %v7523_v38  ;;  %v5605_v8 = vpop.f32.mrb[69].mxu1 }
 0x3b7   : > { %v7525_v34 = vpop.f32.mrb[70].mxu1  ;;  %v2581_v8 = vmul.f32 1.442695, %v2511_v17  ;;  %v7549_v17 = vpop.eup %6082 }
 0x3b8   : > { %v5606_v1 = vpop.f32.mrb[71].mxu1  ;;  %8603 = vst [vmem:[#allocation54_spill] sm:$0xff] %v7549_v17 }
 0x3b9   : > { %v7537_v1 = vpop.xlane.xlu0 %2359  ;;  %6084 = vpow2.f32 %v2581_v8 }
 0x3ba   : > { %6086 = vpow2.f32 %v2583_v41 }
 0x3bd   : > { %v7527_v32 = vpop.f32.mrb[72].mxu1 }
 0x3be   : > { %v5617_v11 = vpop.f32.mrb[73].mxu1 }
 0x3bf   : > { %v7530_v21 = vpop.f32.mrb[74].mxu1 }
 0x3c0   : > { %v5618_v18 = vpop.f32.mrb[75].mxu1 }
 0x3c2   : > { %v7535_v10 = vpop.f32.mrb[44].mxu0 }
 0x3c3   : > { %8600 = vst [vmem:[#allocation51_spill] sm:$0xff] %v7535_v10  ;;  %v5575_v23 = vpop.f32.mrb[45].mxu0  ;;  %v2445_v28 = vsel %vm2312_vm3, %v7535_v10, -inf }
 0x3c4   : > { %v7543_v0 = vpop.f32.mrb[46].mxu0  ;;  %2446 = vmax.xlane.f32.xlu1 %v2445_v28 }
 0x3c5   : > { %8602 = vst [vmem:[#allocation53_spill] sm:$0xff] %v7543_v0  ;;  %v5576_v11 = vpop.f32.mrb[47].mxu0  ;;  %v7545_v46 = vpop.f32.mrb[76].mxu1  ;;  %v2448_v49 = vsel %vm2312_vm3, %v7543_v0, -inf  ;;  %v2515_v0 = vsub.f32 %v7259_v12, %v2345_v30  ;;  %v2466_v12 = vsel %vm2312_vm3, %v7519_v20, -inf }
 0x3c6   : > { %2449 = vmax.xlane.f32.xlu0 %v2448_v49  ;;  %v7551_v18 = vpop.xlane.xlu1 %2368  ;;  %v5629_v23 = vpop.f32.mrb[77].mxu1  ;;  %v2712_v11 = vsel %vm2312_vm3, %v7549_v17, 0.0  ;;  %v2591_v17 = vmul.f32 1.442695, %v2516_v26 }
 0x3c7   : > { %v7553_v56 = vpop.xlane.xlu0 %2371  ;;  %v7555_v10 = vpop.f32.mrb[78].mxu1  ;;  %v2589_v30 = vmul.f32 1.442695, %v2515_v0 }
 0x3c8   : > { %2710 = vadd.xlane.f32.xlu1 %v2709_v63  ;;  %v5630_v28 = vpop.f32.mrb[79].mxu1 }
 0x3c9   : > { %6088 = vpow2.f32 %v2589_v30  ;;  %v2519_v30 = vsub.f32 %v7286_v3, %v7533_v24 }
 0x3ca   : > { %v7562_v8 = vpop.f32.mrb[48].mxu0  ;;  %2713 = vadd.xlane.f32.xlu0 %v2712_v11  ;;  %v7564_v49 = vpop.xlane.xlu1 %2362  ;;  %6090 = vpow2.f32 %v2591_v17 }
 0x3cb   : > { %8604 = vst [vmem:[#allocation55_spill] sm:$0xff] %v7562_v8  ;;  %v5587_v23 = vpop.f32.mrb[49].mxu0  ;;  %v7571_v41 = vpop.xlane.xlu0 %2365  ;;  %v2457_v11 = vsel %vm2312_vm3, %v7562_v8, -inf }
 0x3cc   : > { %v7569_v13 = vpop.f32.mrb[50].mxu0  ;;  %2464 = vmax.xlane.f32.xlu1 %v2463_v5  ;;  %v7579_v23 = vpop.eup %6084 }
 0x3cd   : > { %8605 = vst [vmem:[#allocation56_spill] sm:$0xff] %v7569_v13  ;;  %v5588_v63 = vpop.f32.mrb[51].mxu0  ;;  %8606 = vst [vmem:[#allocation57_spill] sm:$0xff] %v7579_v23  ;;  %v2460_v5 = vsel %vm2312_vm3, %v7569_v13, -inf  ;;  %v7583_v44 = vpop.eup %6086  ;;  %v2715_v8 = vsel %vm2312_vm3, %v7579_v23, 0.0  ;;  %v2520_v23 = vsub.f32 %v7291_v15, %v7537_v1 }
 0x3ce   : > { %2467 = vmax.xlane.f32.xlu0 %v2466_v12  ;;  %v7575_v28 = vpop.xlane.xlu1 %2380  ;;  %8607 = vst [vmem:[#allocation58_spill] sm:$0xff] %v7583_v44  ;;  %v2718_v13 = vsel %vm2312_vm3, %v7583_v44, 0.0 }
 0x3cf   : > { %v7589_v63 = vpop.xlane.xlu0 %2383  ;;  %v2599_v20 = vmul.f32 1.442695, %v2520_v23 }
 0x3d0   : > { %2458 = vmax.xlane.f32.xlu1 %v2457_v11 }
 0x3d2   : > { %v7585_v60 = vpop.f32.mrb[52].mxu0  ;;  %2461 = vmax.xlane.f32.xlu0 %v2460_v5  ;;  %v7587_v0 = vpop.xlane.xlu1 %2374 }
 0x3d3   : > { %8608 = vst [vmem:[#allocation59_spill] sm:$0xff] %v7585_v60  ;;  %v5599_v12 = vpop.f32.mrb[53].mxu0  ;;  %v7605_v17 = vpop.xlane.xlu0 %2377 }
 0x3d4   : > { %v7593_v26 = vpop.f32.mrb[54].mxu0  ;;  %2716 = vadd.xlane.f32.xlu1 %v2715_v8  ;;  %v2475_v12 = vsel %vm2312_vm3, %v7523_v38, -inf  ;;  %v2478_v8 = vsel %vm2312_vm3, %v7525_v34, -inf  ;;  %v7615_v38 = vpop.eup %6088 }
 0x3d5   : > { %8609 = vst [vmem:[#allocation60_spill] sm:$0xff] %v7593_v26  ;;  %v5600_v11 = vpop.f32.mrb[55].mxu0  ;;  %8611 = vst [vmem:[#allocation62_spill] sm:$0xff] %v7615_v38 }
 0x3d6   : > { %2719 = vadd.xlane.f32.xlu0 %v2718_v13  ;;  %v7599_v5 = vpop.xlane.xlu1 %2392  ;;  %v2597_v11 = vmul.f32 1.442695, %v2519_v30  ;;  %v2469_v13 = vsel %vm2312_vm3, %v7585_v60, -inf  ;;  %v7621_v30 = vpop.eup %6090 }
 0x3d7   : > { %8612 = vst [vmem:[#allocation63_spill] sm:$0xff] %v7621_v30  ;;  %v2730_v23 = vsel %vm2312_vm3, %v7621_v30, 0.0  ;;  %v2490_v30 = vsel %vm2312_vm3, %v7530_v21, -inf }
 0x3d8   : > { %2476 = vmax.xlane.f32.xlu1 %v2475_v12  ;;  %v2472_v12 = vsel %vm2312_vm3, %v7593_v26, -inf  ;;  %6092 = vpow2.f32 %v2597_v11 }
 0x3d9   : > { %6094 = vpow2.f32 %v2599_v20 }
 0x3da   : > { %v7609_v44 = vpop.f32.mrb[56].mxu0  ;;  %2479 = vmax.xlane.f32.xlu0 %v2478_v8  ;;  %v7611_v3 = vpop.xlane.xlu1 %2386 }
 0x3db   : > { %8610 = vst [vmem:[#allocation61_spill] sm:$0xff] %v7609_v44  ;;  %v5611_v24 = vpop.f32.mrb[57].mxu0  ;;  %v7623_v8 = vpop.xlane.xlu0 %2395 }
 0x3dc   : > { %v7617_v15 = vpop.f32.mrb[58].mxu0  ;;  %2470 = vmax.xlane.f32.xlu1 %v2469_v13  ;;  %v2727_v24 = vsel %vm2312_vm3, %v7615_v38, 0.0  ;;  %v2523_v13 = vsub.f32 %v7335_v54, %v7551_v18  ;;  %v2524_v38 = vsub.f32 %v7341_v6, %v7553_v56  ;;  %v2521_v18 = vsub.f32 %v7331_v43, %v7564_v49 }
 0x3dd   : > { %v5612_v1 = vpop.f32.mrb[59].mxu0  ;;  %v2527_v49 = vsub.f32 %v7355_v9, %v7575_v28  ;;  %v2525_v9 = vsub.f32 %v7345_v29, %v7587_v0  ;;  %v2499_v28 = vsel %vm2312_vm3, %v7545_v46, -inf  ;;  %v2531_v29 = vsub.f32 %v7377_v4, %v7599_v5 }
 0x3de   : > { %2473 = vmax.xlane.f32.xlu0 %v2472_v12  ;;  %v7627_v60 = vpop.xlane.xlu1 %2404  ;;  %v2487_v12 = vsel %vm2312_vm3, %v7527_v32, -inf  ;;  %v2605_v54 = vmul.f32 1.442695, %v2523_v13  ;;  %v2607_v6 = vmul.f32 1.442695, %v2524_v38  ;;  %v2529_v5 = vsub.f32 %v7367_v33, %v7611_v3 }
 0x3df   : > { %v2601_v43 = vmul.f32 1.442695, %v2521_v18  ;;  %v2613_v18 = vmul.f32 1.442695, %v2527_v49  ;;  %v2621_v4 = vmul.f32 1.442695, %v2531_v29  ;;  %v2535_v3 = vsub.f32 %v7397_v61, %v7627_v60 }
 0x3e0   : > { %2728 = vadd.xlane.f32.xlu1 %v2727_v24  ;;  %v7641_v24 = vpop.xlane.xlu0 %2389  ;;  %6096 = vpow2.f32 %v2605_v54  ;;  %v2617_v33 = vmul.f32 1.442695, %v2529_v5 }
 0x3e1   : > { %6098 = vpow2.f32 %v2607_v6  ;;  %v2502_v6 = vsel %vm2312_vm3, %v7555_v10, -inf  ;;  %v2629_v61 = vmul.f32 1.442695, %v2535_v3 }
 0x3e2   : > { %v7633_v1 = vpop.f32.mrb[60].mxu0  ;;  %2731 = vadd.xlane.f32.xlu0 %v2730_v23  ;;  %v7647_v23 = vpop.xlane.xlu1 %2398  ;;  %6100 = vpow2.f32 %v2601_v43 }
 0x3e3   : > { %v5623_v11 = vpop.f32.mrb[61].mxu0  ;;  %v7651_v56 = vpop.eup %6092  ;;  %v2533_v60 = vsub.f32 %v7387_v14, %v7647_v23 }
 0x3e4   : > { %v7639_v20 = vpop.f32.mrb[62].mxu0  ;;  %2488 = vmax.xlane.f32.xlu1 %v2487_v12  ;;  %v2481_v11 = vsel %vm2312_vm3, %v7609_v44, -inf  ;;  %v2522_v12 = vsub.f32 %v7333_v50, %v7571_v41  ;;  %v7657_v13 = vpop.eup %6094  ;;  %v2739_v38 = vsel %vm2312_vm3, %v7651_v56, 0.0  ;;  %v2528_v50 = vsub.f32 %v7361_v19, %v7589_v63 }
 0x3e5   : > { %v5624_v26 = vpop.f32.mrb[63].mxu0  ;;  %v2742_v54 = vsel %vm2312_vm3, %v7657_v13, 0.0  ;;  %v2526_v19 = vsub.f32 %v7349_v58, %v7605_v17  ;;  %v2532_v17 = vsub.f32 %v7381_v40, %v7623_v8  ;;  %v2496_v43 = vsel %vm2312_vm3, %v7639_v20, -inf }
 0x3e6   : > { %2491 = vmax.xlane.f32.xlu0 %v2490_v30  ;;  %v2484_v26 = vsel %vm2312_vm3, %v7617_v15, -inf  ;;  %v7661_v30 = vpop.xlane.xlu0 %2407  ;;  %v2603_v44 = vmul.f32 1.442695, %v2522_v12  ;;  %v7667_v41 = vpop.xlane.xlu1 %2416  ;;  %v2609_v12 = vmul.f32 1.442695, %v2525_v9  ;;  %v2530_v8 = vsub.f32 %v7373_v45, %v7641_v24 }
 0x3e7   : > { %v2611_v58 = vmul.f32 1.442695, %v2526_v19  ;;  %v2623_v40 = vmul.f32 1.442695, %v2532_v17  ;;  %v2536_v24 = vsub.f32 %v7403_v2, %v7661_v30  ;;  %v2625_v14 = vmul.f32 1.442695, %v2533_v60 }
 0x3e8   : > { %2482 = vmax.xlane.f32.xlu1 %v2481_v11  ;;  %6102 = vpow2.f32 %v2603_v44  ;;  %v2615_v11 = vmul.f32 1.442695, %v2528_v50  ;;  %v2493_v44 = vsel %vm2312_vm3, %v7633_v1, -inf  ;;  %v2619_v45 = vmul.f32 1.442695, %v2530_v8 }
 0x3e9   : > { %6104 = vpow2.f32 %v2613_v18  ;;  %v2631_v2 = vmul.f32 1.442695, %v2536_v24  ;;  %v2539_v23 = vsub.f32 %v7420_v16, %v7667_v41 }
 0x3ea   : > { %2485 = vmax.xlane.f32.xlu0 %v2484_v26  ;;  %v7677_v63 = vpop.xlane.xlu0 %2401  ;;  %v7683_v0 = vpop.xlane.xlu1 %2410  ;;  %6106 = vpow2.f32 %v2615_v11 }
 0x3eb   : > { %v7687_v26 = vpop.eup %6096  ;;  %6108 = vpow2.f32 %v2609_v12  ;;  %v2534_v30 = vsub.f32 %v7393_v35, %v7677_v63  ;;  %v2537_v63 = vsub.f32 %v7409_v52, %v7683_v0 }
 0x3ec   : > { %2740 = vadd.xlane.f32.xlu1 %v2739_v38  ;;  %v7693_v49 = vpop.eup %6098  ;;  %v2751_v50 = vsel %vm2312_vm3, %v7687_v26, 0.0  ;;  %6110 = vpow2.f32 %v2611_v58 }
 0x3ed   : > { %v2754_v9 = vsel %vm2312_vm3, %v7693_v49, 0.0  ;;  %6112 = vpow2.f32 %v2621_v4  ;;  %v2627_v35 = vmul.f32 1.442695, %v2534_v30  ;;  %v2633_v52 = vmul.f32 1.442695, %v2537_v63 }
 0x3ee   : > { %2743 = vadd.xlane.f32.xlu0 %v2742_v54  ;;  %v2420_v38 = vpop.xlane.xlu0 %2419  ;;  %v7699_v54 = vpop.eup %6100  ;;  %6114 = vpow2.f32 %v2623_v40 }
 0x3ef   : > { %v7703_v18 = vpop.xlane.xlu1 %2428  ;;  %v2745_v11 = vsel %vm2312_vm3, %v7699_v54, 0.0  ;;  %6116 = vpow2.f32 %v2617_v33  ;;  %v2540_v5 = vsub.f32 %v7424_v37, %v2420_v38  ;;  %v2637_v37 = vmul.f32 1.442695, %v2539_v23 }
 0x3f0   : > { %2500 = vmax.xlane.f32.xlu1 %v2499_v28  ;;  %6118 = vpow2.f32 %v2619_v45 }
 0x3f1   : > { %6120 = vpow2.f32 %v2629_v61  ;;  %v2639_v41 = vmul.f32 1.442695, %v2540_v5  ;;  %v2543_v61 = vsub.f32 %v7438_v48, %v7703_v18 }
 0x3f2   : > { %2503 = vmax.xlane.f32.xlu0 %v2502_v6  ;;  %v7707_v28 = vpop.eup %6102  ;;  %v2414_v6 = vpop.xlane.xlu0 %2413  ;;  %6122 = vpow2.f32 %v2631_v2 }
 0x3f3   : > { %v7713_v19 = vpop.eup %6104  ;;  %v2748_v12 = vsel %vm2312_vm3, %v7707_v28, 0.0  ;;  %6124 = vpow2.f32 %v2625_v14  ;;  %v2645_v48 = vmul.f32 1.442695, %v2543_v61 }
 0x3f4   : > { %2494 = vmax.xlane.f32.xlu1 %v2493_v44  ;;  %v7719_v29 = vpop.eup %6106  ;;  %v7723_v44 = vpop.xlane.xlu1 %2422  ;;  %v2763_v58 = vsel %vm2312_vm3, %v7713_v19, 0.0  ;;  %6126 = vpow2.f32 %v2627_v35 }
 0x3f5   : > { %v7727_v17 = vpop.eup %6108  ;;  %6128 = vpow2.f32 %v2637_v37  ;;  %v2541_v18 = vsub.f32 %v7430_v62, %v7723_v44 }
 0x3f6   : > { %2497 = vmax.xlane.f32.xlu0 %v2496_v43  ;;  %v2766_v43 = vsel %vm2312_vm3, %v7719_v29, 0.0  ;;  %v7733_v4 = vpop.eup %6110  ;;  %v2757_v40 = vsel %vm2312_vm3, %v7727_v17, 0.0  ;;  %6130 = vpow2.f32 %v2639_v41 }
 0x3f7   : > { %v7740_v8 = vpop.eup %6112  ;;  %v2760_v33 = vsel %vm2312_vm3, %v7733_v4, 0.0  ;;  %v2641_v62 = vmul.f32 1.442695, %v2541_v18 }
 0x3f8   : > { %2752 = vadd.xlane.f32.xlu1 %v2751_v50  ;;  %v2432_v50 = vpop.xlane.xlu0 %2431  ;;  %v7746_v16 = vpop.eup %6114  ;;  %v2775_v38 = vsel %vm2312_vm3, %v7740_v8, 0.0 }
 0x3f9   : > { %v7750_v3 = vpop.eup %6116  ;;  %v2778_v24 = vsel %vm2312_vm3, %v7746_v16, 0.0 }
 0x3fa   : > { %2755 = vadd.xlane.f32.xlu0 %v2754_v9  ;;  %v2699_v9 = vpop.xlane.xlu1 %2698  ;;  %v2769_v60 = vsel %vm2312_vm3, %v7750_v3, 0.0 }
 0x3fb   : > { %6132 = vrcp.f32 %v2699_v9 }
 0x3fc   : > { %2746 = vadd.xlane.f32.xlu1 %v2745_v11  ;;  %v2538_v11 = vsub.f32 %v7415_v55, %v2414_v6  ;;  %v2426_v0 = vpop.xlane.xlu0 %2425  ;;  %6134 = vpow2.f32 %v2633_v52 }
 0x3fe   : > { %2749 = vadd.xlane.f32.xlu0 %v2748_v12  ;;  %v7757_v12 = vpop.eup %6118  ;;  %v2635_v6 = vmul.f32 1.442695, %v2538_v11 }
 0x3ff   : > { %v7763_v55 = vpop.eup %6120 }
 0x400   : > { %2764 = vadd.xlane.f32.xlu1 %v2763_v58  ;;  %v2544_v58 = vsub.f32 %v7442_v25, %v2432_v50  ;;  %v7768_v14 = vpop.eup %6122  ;;  %v2787_v23 = vsel %vm2312_vm3, %v7763_v55, 0.0  ;;  %v2542_v50 = vsub.f32 %v7434_v59, %v2426_v0 }
 0x401   : > { %v7774_v25 = vpop.eup %6124  ;;  %v2790_v63 = vsel %vm2312_vm3, %v7768_v14, 0.0 }
 0x402   : > { %2767 = vadd.xlane.f32.xlu0 %v2766_v43  ;;  %v2772_v43 = vsel %vm2312_vm3, %v7757_v12, 0.0  ;;  %v2647_v5 = vmul.f32 1.442695, %v2544_v58  ;;  %v7781_v9 = vpop.eup %6126  ;;  %v2643_v59 = vmul.f32 1.442695, %v2542_v50 }
 0x403   : > { %v7786_v37 = vpop.eup %6128  ;;  %v2784_v52 = vsel %vm2312_vm3, %v7781_v9, 0.0 }
 0x404   : > { %2758 = vadd.xlane.f32.xlu1 %v2757_v40  ;;  %v7788_v41 = vpop.eup %6130 }
 0x405   : > { %v6133_v0 = vpop.eup %6132 }
 0x406   : > { %2761 = vadd.xlane.f32.xlu0 %v2760_v33  ;;  %v2781_v33 = vsel %vm2312_vm3, %v7774_v25, 0.0 }
 0x408   : > { %2776 = vadd.xlane.f32.xlu1 %v2775_v38 }
 0x409   : > { %v7753_v45 = vpop.xlane.xlu1 %2722 }
 0x40a   : > { %2779 = vadd.xlane.f32.xlu0 %v2778_v24 }
 0x40c   : > { %2770 = vadd.xlane.f32.xlu1 %v2769_v60  ;;  %v7794_v60 = vpop.eup %6134 }
 0x40d   : > { %v2702_v2 = vpop.xlane.xlu0 %2701  ;;  %v2441_v30 = vpop.xlane.xlu1 %2440  ;;  %v2793_v50 = vsel %vm2312_vm3, %v7794_v60, 0.0 }
 0x40e   : > { %6136 = vrcp.f32 %v2702_v2  ;;  %2773 = vadd.xlane.f32.xlu0 %v2772_v43  ;;  %v2547_v44 = vsub.f32 %v7458_v51, %v2441_v30  ;;  %v2953_v30 = vmul.f32 %v6133_v0, %v7452_v22 }
 0x40f   : > { %6138 = vpow2.f32 %v2635_v6  ;;  %v2799_v6 = vsel %vm2312_vm3, %v7786_v37, 0.0 }
 0x410   : > { %2788 = vadd.xlane.f32.xlu1 %v2787_v23  ;;  %6140 = vpow2.f32 %v2645_v48  ;;  %v2653_v24 = vmul.f32 1.442695, %v2547_v44 }
 0x411   : > { %v7777_v40 = vpop.xlane.xlu0 %2725  ;;  %v2435_v35 = vpop.xlane.xlu1 %2434  ;;  %6142 = vpow2.f32 %v2647_v5 }
 0x412   : > { %2791 = vadd.xlane.f32.xlu0 %v2790_v63  ;;  %6144 = vpow2.f32 %v2641_v62  ;;  %v2545_v51 = vsub.f32 %v7448_v36, %v2435_v35  ;;  %v2802_v36 = vsel %vm2312_vm3, %v7788_v41, 0.0 }
 0x413   : > { %6146 = vpow2.f32 %v2643_v59 }
 0x414   : > { %2782 = vadd.xlane.f32.xlu1 %v2781_v33  ;;  %6148 = vpow2.f32 %v2653_v24  ;;  %v2649_v23 = vmul.f32 1.442695, %v2545_v51 }
 0x415   : > { %v2444_v38 = vpop.xlane.xlu0 %2443  ;;  %v2705_v11 = vpop.xlane.xlu1 %2704 }
 0x416   : > { %v2548_v61 = vsub.f32 %v7464_v42, %v2444_v38  ;;  %2785 = vadd.xlane.f32.xlu0 %v2784_v52  ;;  %v8613_v38 = vmov 0.0  }
 0x418   : > { %v6137_v58 = vpop.eup %6136  ;;  %v2655_v2 = vmul.f32 1.442695, %v2548_v61  ;;  %2800 = vadd.xlane.f32.xlu1 %v2799_v6 }
 0x419   : > { %v2954_v43 = vmul.f32 %v6137_v58, %v7480_v7  ;;  %v2438_v48 = vpop.xlane.xlu0 %2437  ;;  %v7800_v18 = vpop.xlane.xlu1 %2734 }
 0x41a   : > { %v7804_v42 = vpop.eup %6138  ;;  %v2546_v5 = vsub.f32 %v7454_v47, %v2438_v48  ;;  %2803 = vadd.xlane.f32.xlu0 %v2802_v36  ;;  %6150 = vpow2.f32 %v2655_v2 }
 0x41b   : > { %v3017_v35 = vpack.c.bf16 %v2954_v43, %v2953_v30  ;;  %v7809_v22 = vpop.eup %6140  ;;  %6152 = vrcp.f32 %v2705_v11  ;;  %v2796_v44 = vsel %vm2312_vm3, %v7804_v42, 0.0 }
 0x41c   : > { %v2651_v7 = vmul.f32 1.442695, %v2546_v5  ;;  %2794 = vadd.xlane.f32.xlu1 %v2793_v50  ;;  %v7814_v33 = vpop.eup %6142  ;;  %6154 = vpow2.f32 %v2649_v23  ;;  %v2811_v59 = vsel %vm2312_vm3, %v7809_v22, 0.0 }
 0x41d   : > { %v2708_v63 = vpop.xlane.xlu0 %2707  ;;  %5634 = vmatmul.mubr.msk.bf16.vlgmr.msra.gmra.mrb[64].mxu0 %vm2312_vm3, %v3017_v35  ;;  %v2453_v62 = vpop.xlane.xlu1 %2452 }
 0x41e   : > { %5644 = vmatpush3.bf16.msra.mxu0 %v7329_v39  ;;  %v2551_v47 = vsub.f32 %v7468_v31, %v2453_v62  ;;  %2797 = vadd.xlane.f32.xlu0 %v2796_v44  ;;  %6156 = vrcp.f32 %v2708_v63  ;;  %v7823_v11 = vpop.eup %6144  ;;  %v2814_v31 = vsel %vm2312_vm3, %v7814_v33, 0.0 }
 0x41f   : > { %5645 = vmatprep.mubr.msk.bf16.mxu0 %vm6521_vm1, %v8613_v38  ;;  %5655 = vmatprep.subr.bf16.mxu0 %v8613_v38  ;;  %6158 = vpow2.f32 %v2651_v7  ;;  %v7829_v39 = vpop.eup %6146  ;;  %v2805_v24 = vsel %vm2312_vm3, %v7823_v11, 0.0  ;;  %v8614_v7 = vld [vmem:[#allocation47_spill] sm:$0xff] }
 0x420   : > { %v2661_v52 = vmul.f32 1.442695, %v2551_v47  ;;  %2812 = vadd.xlane.f32.xlu1 %v2811_v59  ;;  %v7833_v51 = vpop.eup %6148  ;;  %v2808_v6 = vsel %vm2312_vm3, %v7829_v39, 0.0  ;;  %v8616_v59 = vld [vmem:[#allocation25_spill] sm:$0xff] }
 0x421   : > { %v7825_v0 = vpop.xlane.xlu0 %2737  ;;  %v2823_v43 = vsel %vm2312_vm3, %v7833_v51, 0.0 }
 0x422   : > { %6160 = vpow2.f32 %v2661_v52  ;;  %2815 = vadd.xlane.f32.xlu0 %v2814_v31 }
 0x424   : > { %2806 = vadd.xlane.f32.xlu1 %v2805_v24  ;;  %v7837_v58 = vpop.eup %6150 }
 0x425   : > { %v2456_v61 = vpop.xlane.xlu0 %2455  ;;  %v6153_v30 = vpop.eup %6152  ;;  %v2826_v5 = vsel %vm2312_vm3, %v7837_v58, 0.0 }
 0x426   : > { %v2552_v2 = vsub.f32 %v7471_v27, %v2456_v61  ;;  %2809 = vadd.xlane.f32.xlu0 %v2808_v6  ;;  %v7842_v48 = vpop.eup %6154  ;;  %v2955_v35 = vmul.f32 %v6153_v30, %v7493_v57  ;;  %v8617_v61 = vld [vmem:[#allocation51_spill] sm:$0xff] }
 0x427   : > { %v2817_v27 = vsel %vm2312_vm3, %v7842_v48, 0.0 }
 0x428   : > { %v2663_v36 = vmul.f32 1.442695, %v2552_v2  ;;  %2824 = vadd.xlane.f32.xlu1 %v2823_v43  ;;  %v6157_v23 = vpop.eup %6156  ;;  %v8618_v43 = vld [vmem:[#allocation53_spill] sm:$0xff] }
 0x429   : > { %v7846_v50 = vpop.eup %6158  ;;  %v2956_v63 = vmul.f32 %v6157_v23, %v8614_v7 }
 0x42a   : > { %6162 = vpow2.f32 %v2663_v36  ;;  %2827 = vadd.xlane.f32.xlu0 %v2826_v5  ;;  %v2820_v47 = vsel %vm2312_vm3, %v7846_v50, 0.0 }
 0x42b   : > { %v3018_v44 = vpack.c.bf16 %v2956_v63, %v2955_v35 }
 0x42c   : > { %v7852_v62 = vpop.eup %6160  ;;  %2818 = vadd.xlane.f32.xlu1 %v2817_v27 }
 0x42d   : > { %8615 = vst [vmem:[#allocation47_spill] sm:$0xff] %v7852_v62  ;;  %5640 = vmatmul.mubr.msk.bf16.vlgmr.msra.gmra.mrb[80].mxu1 %vm2312_vm3, %v3018_v44  ;;  %v2835_v57 = vsel %vm2312_vm3, %v7852_v62, 0.0 }
 0x42e   : > { %2821 = vadd.xlane.f32.xlu0 %v2820_v47  ;;  %5650 = vmatpush3.bf16.msra.mxu1 %v8616_v59  ;;  %v8619_v47 = vld [vmem:[#allocation49_spill] sm:$0xff] }
 0x42f   : > { %5651 = vmatprep.mubr.msk.bf16.mxu1 %vm6521_vm1, %v8613_v38  ;;  %5661 = vmatprep.subr.bf16.mxu1 %v8613_v38 }
 0x430   : > { %2836 = vadd.xlane.f32.xlu1 %v2835_v57 }
 0x434   : > { %v7863_v52 = vpop.eup %6162 }
 0x435   : > { %v2838_v31 = vsel %vm2312_vm3, %v7863_v52, 0.0 }
 0x436   : > { %2839 = vadd.xlane.f32.xlu0 %v2838_v31 }
 0x451   : > { %v2447_v24 = vpop.xlane.xlu1 %2446 }
 0x452   : > { %v2549_v6 = vsub.f32 %v8617_v61, %v2447_v24  ;;  %v8620_v24 = vld [vmem:[#allocation55_spill] sm:$0xff] }
 0x453   : > { %v2450_v2 = vpop.xlane.xlu0 %2449 }
 0x454   : > { %v2657_v30 = vmul.f32 1.442695, %v2549_v6  ;;  %v2550_v36 = vsub.f32 %v8618_v43, %v2450_v2  ;;  %v8621_v43 = vld [vmem:[#allocation56_spill] sm:$0xff] }
 0x455   : > { %v2711_v23 = vpop.xlane.xlu1 %2710 }
 0x456   : > { %6164 = vpow2.f32 %v2657_v30  ;;  %v2659_v5 = vmul.f32 1.442695, %v2550_v36 }
 0x457   : > { %6166 = vrcp.f32 %v2711_v23  ;;  %v2714_v35 = vpop.xlane.xlu0 %2713 }
 0x458   : > { %6168 = vpow2.f32 %v2659_v5 }
 0x459   : > { %6170 = vrcp.f32 %v2714_v35  ;;  %v2465_v7 = vpop.xlane.xlu1 %2464 }
 0x45a   : > { %v2555_v63 = vsub.f32 %v7517_v53, %v2465_v7  ;;  %6172 = vrcp.f32 %v7777_v40 }
 0x45b   : > { %v2468_v27 = vpop.xlane.xlu0 %2467 }
 0x45c   : > { %v2669_v44 = vmul.f32 1.442695, %v2555_v63  ;;  %v2556_v59 = vsub.f32 %v8619_v47, %v2468_v27  ;;  %v8622_v27 = vld [vmem:[#allocation52_spill] sm:$0xff]  ;;  %v8623_v47 = vld [vmem:[#allocation54_spill] sm:$0xff] }
 0x45d   : > { %v2459_v57 = vpop.xlane.xlu1 %2458 }
 0x45e   : > { %6174 = vpow2.f32 %v2669_v44  ;;  %v2671_v31 = vmul.f32 1.442695, %v2556_v59  ;;  %v2553_v61 = vsub.f32 %v8620_v24, %v2459_v57  ;;  %v8624_v57 = vld [vmem:[#allocation50_spill] sm:$0xff] }
 0x45f   : > { %6176 = vrcp.f32 %v7753_v45  ;;  %v2462_v6 = vpop.xlane.xlu0 %2461 }
 0x460   : > { %v7874_v2 = vpop.eup %6164  ;;  %6178 = vpow2.f32 %v2671_v31  ;;  %v2665_v30 = vmul.f32 1.442695, %v2553_v61  ;;  %v2554_v53 = vsub.f32 %v8621_v43, %v2462_v6 }
 0x461   : > { %v6167_v36 = vpop.eup %6166  ;;  %6180 = vrcp.f32 %v7825_v0  ;;  %v2717_v23 = vpop.xlane.xlu1 %2716  ;;  %v2829_v40 = vsel %vm2312_vm3, %v7874_v2, 0.0 }
 0x462   : > { %v7880_v5 = vpop.eup %6168  ;;  %6182 = vpow2.f32 %v2665_v30  ;;  %v2667_v35 = vmul.f32 1.442695, %v2554_v53  ;;  %2830 = vadd.xlane.f32.xlu1 %v2829_v40  ;;  %v2957_v44 = vmul.f32 %v6167_v36, %v8622_v27  ;;  %v8627_v27 = vld [vmem:[#allocation59_spill] sm:$0xff] }
 0x463   : > { %v6171_v45 = vpop.eup %6170  ;;  %6184 = vrcp.f32 %v2717_v23  ;;  %v2720_v7 = vpop.xlane.xlu0 %2719  ;;  %v2832_v63 = vsel %vm2312_vm3, %v7880_v5, 0.0  ;;  %v8625_v23 = vld [vmem:[#allocation31_spill] sm:$0xff] }
 0x464   : > { %v2958_v59 = vmul.f32 %v6171_v45, %v8623_v47  ;;  %6186 = vpow2.f32 %v2667_v35  ;;  %2833 = vadd.xlane.f32.xlu0 %v2832_v63  ;;  %v6173_v61 = vpop.eup %6172 }
 0x465   : > { %6188 = vrcp.f32 %v2720_v7  ;;  %v2477_v0 = vpop.xlane.xlu1 %2476 }
 0x466   : > { %v2559_v31 = vsub.f32 %v8624_v57, %v2477_v0  ;;  %v3019_v24 = vpack.c.bf16 %v2958_v59, %v2957_v44  ;;  %6190 = vrcp.f32 %v7800_v18  ;;  %v8626_v18 = vld [vmem:[#allocation45_spill] sm:$0xff]  ;;  %v8628_v57 = vld [vmem:[#allocation44_spill] sm:$0xff] }
 0x467   : > { %v2480_v6 = vpop.xlane.xlu0 %2479  ;;  %v2962_v7 = vmul.f32 %v6173_v61, %v8626_v18 }
 0x468   : > { %v7888_v30 = vpop.eup %6174  ;;  %v2677_v43 = vmul.f32 1.442695, %v2559_v31  ;;  %v2560_v53 = vsub.f32 %v7525_v34, %v2480_v6  ;;  %5646 = vmatmul.mubr.msk.bf16.vlgmr.msra.gmra.mrb[68].mxu0 %vm2312_vm3, %v3019_v24  ;;  %v8629_v6 = vld [vmem:[#allocation60_spill] sm:$0xff] }
 0x469   : > { %v6177_v36 = vpop.eup %6176  ;;  %5656 = vmatpush3.bf16.msra.mxu0 %v8625_v23  ;;  %v2471_v40 = vpop.xlane.xlu1 %2470  ;;  %v2847_v35 = vsel %vm2312_vm3, %v7888_v30, 0.0  ;;  %5657 = vmatprep.mubr.msk.bf16.mxu0 %vm6521_vm1, %v8613_v38 }
 0x46a   : > { %v7897_v45 = vpop.eup %6178  ;;  %6192 = vpow2.f32 %v2677_v43  ;;  %v2679_v63 = vmul.f32 1.442695, %v2560_v53  ;;  %v2557_v34 = vsub.f32 %v8627_v27, %v2471_v40  ;;  %2848 = vadd.xlane.f32.xlu1 %v2847_v35  ;;  %5667 = vmatprep.subr.bf16.mxu0 %v8613_v38  ;;  %v2961_v31 = vmul.f32 %v6177_v36, %v8628_v57 }
 0x46b   : > { %v6181_v44 = vpop.eup %6180  ;;  %v2474_v47 = vpop.xlane.xlu0 %2473  ;;  %v2850_v59 = vsel %vm2312_vm3, %v7897_v45, 0.0 }
 0x46c   : > { %v7904_v0 = vpop.eup %6182  ;;  %6194 = vpow2.f32 %v2679_v63  ;;  %v2673_v24 = vmul.f32 1.442695, %v2557_v34  ;;  %v2558_v61 = vsub.f32 %v8629_v6, %v2474_v47  ;;  %2851 = vadd.xlane.f32.xlu0 %v2850_v59  ;;  %v3021_v18 = vpack.c.bf16 %v2962_v7, %v2961_v31  ;;  %v8630_v63 = vld [vmem:[#allocation57_spill] sm:$0xff]  ;;  %v8631_v47 = vld [vmem:[#allocation58_spill] sm:$0xff]  ;;  %v8633_v7 = vld [vmem:[#allocation48_spill] sm:$0xff] }
 0x46d   : > { %v6185_v43 = vpop.eup %6184  ;;  %v2729_v53 = vpop.xlane.xlu1 %2728  ;;  %v2841_v23 = vsel %vm2312_vm3, %v7904_v0, 0.0  ;;  %v2966_v31 = vmul.f32 %v6181_v44, %v8633_v7 }
 0x46e   : > { %v7910_v40 = vpop.eup %6186  ;;  %6196 = vpow2.f32 %v2673_v24  ;;  %v2675_v35 = vmul.f32 1.442695, %v2558_v61  ;;  %2842 = vadd.xlane.f32.xlu1 %v2841_v23  ;;  %v2959_v34 = vmul.f32 %v6185_v43, %v8630_v63  ;;  %v8632_v24 = vld [vmem:[#allocation32_spill] sm:$0xff] }
 0x46f   : > { %v6189_v27 = vpop.eup %6188  ;;  %6198 = vrcp.f32 %v2729_v53  ;;  %v2732_v62 = vpop.xlane.xlu0 %2731  ;;  %v2844_v36 = vsel %vm2312_vm3, %v7910_v40, 0.0 }
 0x470   : > { %v2960_v59 = vmul.f32 %v6189_v27, %v8631_v47  ;;  %6200 = vpow2.f32 %v2675_v35  ;;  %5658 = vmatmul.mubr.msk.bf16.vlgmr.msra.gmra.mrb[72].mxu0 %vm2312_vm3, %v3021_v18  ;;  %2845 = vadd.xlane.f32.xlu0 %v2844_v36  ;;  %v6191_v57 = vpop.eup %6190  ;;  %v8634_v35 = vld [vmem:[#allocation46_spill] sm:$0xff]  ;;  %v8636_v47 = vld [vmem:[#allocation61_spill] sm:$0xff] }
 0x471   : > { %6202 = vrcp.f32 %v2732_v62  ;;  %5668 = vmatpush3.bf16.msra.mxu0 %v8632_v24  ;;  %v2489_v6 = vpop.xlane.xlu1 %2488  ;;  %5669 = vmatprep.mubr.msk.bf16.mxu0 %vm6521_vm1, %v8613_v38  ;;  %v2965_v18 = vmul.f32 %v6191_v57, %v8634_v35  ;;  %v8635_v36 = vld [vmem:[#allocation26_spill] sm:$0xff] }
 0x472   : > { %v2563_v61 = vsub.f32 %v7527_v32, %v2489_v6  ;;  %v3020_v53 = vpack.c.bf16 %v2960_v59, %v2959_v34  ;;  %5679 = vmatprep.subr.bf16.mxu0 %v8613_v38 }
 0x473   : > { %v2492_v43 = vpop.xlane.xlu0 %2491  ;;  %v3023_v57 = vpack.c.bf16 %v2966_v31, %v2965_v18 }
 0x474   : > { %v7923_v23 = vpop.eup %6192  ;;  %v2685_v27 = vmul.f32 1.442695, %v2563_v61  ;;  %v2564_v62 = vsub.f32 %v7530_v21, %v2492_v43  ;;  %5652 = vmatmul.mubr.msk.bf16.vlgmr.msra.gmra.mrb[84].mxu1 %vm2312_vm3, %v3020_v53  ;;  %v8638_v43 = vld [vmem:[#allocation34_spill] sm:$0xff] }
 0x475   : > { %5662 = vmatpush3.bf16.msra.mxu1 %v8635_v36  ;;  %v2483_v63 = vpop.xlane.xlu1 %2482  ;;  %v2859_v44 = vsel %vm2312_vm3, %v7923_v23, 0.0  ;;  %5663 = vmatprep.mubr.msk.bf16.mxu1 %vm6521_vm1, %v8613_v38 }
 0x476   : > { %v7933_v32 = vpop.eup %6194  ;;  %6204 = vpow2.f32 %v2685_v27  ;;  %v2687_v34 = vmul.f32 1.442695, %v2564_v62  ;;  %v2561_v59 = vsub.f32 %v8636_v47, %v2483_v63  ;;  %2860 = vadd.xlane.f32.xlu1 %v2859_v44  ;;  %5673 = vmatprep.subr.bf16.mxu1 %v8613_v38  ;;  %v8639_v63 = vld [vmem:[#allocation62_spill] sm:$0xff] }
 0x477   : > { %v2486_v21 = vpop.xlane.xlu0 %2485  ;;  %v2862_v24 = vsel %vm2312_vm3, %v7933_v32, 0.0 }
 0x478   : > { %v7939_v6 = vpop.eup %6196  ;;  %6206 = vpow2.f32 %v2687_v34  ;;  %v2681_v7 = vmul.f32 1.442695, %v2561_v59  ;;  %v2562_v61 = vsub.f32 %v7617_v15, %v2486_v21  ;;  %5670 = vmatmul.mubr.msk.bf16.vlgmr.msra.gmra.mrb[76].mxu0 %vm2312_vm3, %v3023_v57  ;;  %2863 = vadd.xlane.f32.xlu0 %v2862_v24  ;;  %v8640_v34 = vld [vmem:[#allocation63_spill] sm:$0xff] }
 0x479   : > { %8637 = vst [vmem:[#allocation25_spill] sm:$0xff] %v7939_v6  ;;  %v6199_v53 = vpop.eup %6198  ;;  %5680 = vmatpush3.bf16.msra.mxu0 %v8638_v43  ;;  %v2741_v35 = vpop.xlane.xlu1 %2740  ;;  %v2853_v31 = vsel %vm2312_vm3, %v7939_v6, 0.0  ;;  %5681 = vmatprep.mubr.msk.bf16.mxu0 %vm6521_vm1, %v8613_v38 }
 0x47a   : > { %v7948_v18 = vpop.eup %6200  ;;  %6208 = vpow2.f32 %v2681_v7  ;;  %v2683_v27 = vmul.f32 1.442695, %v2562_v61  ;;  %2854 = vadd.xlane.f32.xlu1 %v2853_v31  ;;  %5691 = vmatprep.subr.bf16.mxu0 %v8613_v38  ;;  %v2963_v44 = vmul.f32 %v6199_v53, %v8639_v63  ;;  %v8641_v7 = vld [vmem:[#allocation27_spill] sm:$0xff] }
 0x47b   : > { %v6203_v15 = vpop.eup %6202  ;;  %6210 = vrcp.f32 %v2741_v35  ;;  %v2744_v62 = vpop.xlane.xlu0 %2743  ;;  %v2856_v36 = vsel %vm2312_vm3, %v7948_v18, 0.0 }
 0x47c   : > { %v2964_v47 = vmul.f32 %v6203_v15, %v8640_v34  ;;  %6212 = vpow2.f32 %v2683_v27  ;;  %2857 = vadd.xlane.f32.xlu0 %v2856_v36 }
 0x47d   : > { %6214 = vrcp.f32 %v2744_v62  ;;  %v7955_v59 = vpop.xlane.xlu1 %2500 }
 0x47e   : > { %v3022_v57 = vpack.c.bf16 %v2964_v47, %v2963_v44 }
 0x47f   : > { %v7957_v21 = vpop.xlane.xlu0 %2503 }
 0x480   : > { %v7959_v24 = vpop.eup %6204  ;;  %5664 = vmatmul.mubr.msk.bf16.vlgmr.msra.gmra.mrb[88].mxu1 %vm2312_vm3, %v3022_v57 }
 0x481   : > { %5674 = vmatpush3.bf16.msra.mxu1 %v8641_v7  ;;  %v7963_v61 = vpop.xlane.xlu1 %2494  ;;  %v2871_v53 = vsel %vm2312_vm3, %v7959_v24, 0.0  ;;  %5675 = vmatprep.mubr.msk.bf16.mxu1 %vm6521_vm1, %v8613_v38 }
 0x482   : > { %v7969_v43 = vpop.eup %6206  ;;  %2872 = vadd.xlane.f32.xlu1 %v2871_v53  ;;  %5685 = vmatprep.subr.bf16.mxu1 %v8613_v38 }
 0x483   : > { %v7972_v35 = vpop.xlane.xlu0 %2497  ;;  %v2874_v31 = vsel %vm2312_vm3, %v7969_v43, 0.0 }
 0x484   : > { %v7976_v27 = vpop.eup %6208  ;;  %2875 = vadd.xlane.f32.xlu0 %v2874_v31 }
 0x485   : > { %8642 = vst [vmem:[#allocation51_spill] sm:$0xff] %v7976_v27  ;;  %v6211_v15 = vpop.eup %6210  ;;  %v2753_v62 = vpop.xlane.xlu1 %2752  ;;  %v2865_v36 = vsel %vm2312_vm3, %v7976_v27, 0.0  ;;  %v8644_v27 = vld [vmem:[#allocation16_spill] sm:$0xff] }
 0x486   : > { %v7980_v63 = vpop.eup %6212  ;;  %2866 = vadd.xlane.f32.xlu1 %v2865_v36  ;;  %6216 = vrcp.f32 %v2753_v62  ;;  %v2967_v57 = vmul.f32 %v6211_v15, %v7651_v56  ;;  %v8643_v36 = vld [vmem:[#allocation28_spill] sm:$0xff] }
 0x487   : > { %v6215_v44 = vpop.eup %6214  ;;  %v2756_v34 = vpop.xlane.xlu0 %2755  ;;  %v2868_v47 = vsel %vm2312_vm3, %v7980_v63, 0.0 }
 0x488   : > { %v2968_v7 = vmul.f32 %v6215_v44, %v7657_v13  ;;  %2869 = vadd.xlane.f32.xlu0 %v2868_v47  ;;  %6218 = vrcp.f32 %v2756_v34 }
 0x489   : > { %v2747_v53 = vpop.xlane.xlu1 %2746 }
 0x48a   : > { %6220 = vrcp.f32 %v2747_v53  ;;  %v3024_v31 = vpack.c.bf16 %v2968_v7, %v2967_v57 }
 0x48b   : > { %v2750_v6 = vpop.xlane.xlu0 %2749 }
 0x48c   : > { %6222 = vrcp.f32 %v2750_v6  ;;  %5676 = vmatmul.mubr.msk.bf16.vlgmr.msra.gmra.mrb[92].mxu1 %vm2312_vm3, %v3024_v31 }
 0x48d   : > { %5686 = vmatpush3.bf16.msra.mxu1 %v8643_v36  ;;  %v2765_v62 = vpop.xlane.xlu1 %2764  ;;  %5687 = vmatprep.mubr.msk.bf16.mxu1 %vm6521_vm1, %v8613_v38 }
 0x48e   : > { %6224 = vrcp.f32 %v2765_v62  ;;  %5697 = vmatprep.subr.bf16.mxu1 %v8613_v38 }
 0x48f   : > { %v2768_v56 = vpop.xlane.xlu0 %2767 }
 0x490   : > { %6226 = vrcp.f32 %v2768_v56  ;;  %v6217_v13 = vpop.eup %6216 }
 0x491   : > { %v2759_v15 = vpop.xlane.xlu1 %2758  ;;  %v2971_v6 = vmul.f32 %v6217_v13, %v7687_v26  ;;  %v8645_v26 = vld [vmem:[#allocation29_spill] sm:$0xff] }
 0x492   : > { %6228 = vrcp.f32 %v2759_v15  ;;  %v6219_v44 = vpop.eup %6218 }
 0x493   : > { %v2762_v34 = vpop.xlane.xlu0 %2761  ;;  %v2972_v57 = vmul.f32 %v6219_v44, %v7693_v49 }
 0x494   : > { %v6221_v47 = vpop.eup %6220  ;;  %6230 = vrcp.f32 %v2762_v34 }
 0x495   : > { %v2777_v7 = vpop.xlane.xlu1 %2776  ;;  %v3026_v31 = vpack.c.bf16 %v2972_v57, %v2971_v6  ;;  %v2969_v36 = vmul.f32 %v6221_v47, %v7699_v54  ;;  %v8646_v47 = vld [vmem:[#allocation41_spill] sm:$0xff] }
 0x496   : > { %v6223_v53 = vpop.eup %6222  ;;  %6232 = vrcp.f32 %v2777_v7 }
 0x497   : > { %v2970_v62 = vmul.f32 %v6223_v53, %v7707_v28  ;;  %v2780_v56 = vpop.xlane.xlu0 %2779  ;;  %4083 = vrot.lane.b32.xlu1 %v8644_v27, %s6525_s27  ;;  %5688 = vmatmul.mubr.msk.bf16.vlgmr.msra.gmra.mrb[96].mxu1 %vm2312_vm3, %v3026_v31 }
 0x498   : > { %v6225_v15 = vpop.eup %6224  ;;  %6234 = vrcp.f32 %v2780_v56  ;;  %5698 = vmatpush3.bf16.msra.mxu1 %v8645_v26  ;;  %5699 = vmatprep.mubr.msk.bf16.mxu1 %vm6521_vm1, %v8613_v38 }
 0x499   : > { %v2771_v49 = vpop.xlane.xlu1 %2770  ;;  %v3025_v13 = vpack.c.bf16 %v2970_v62, %v2969_v36  ;;  %5709 = vmatprep.subr.bf16.mxu1 %v8613_v38  ;;  %v2975_v54 = vmul.f32 %v6225_v15, %v7713_v19  ;;  %v8647_v19 = vld [vmem:[#allocation15_spill] sm:$0xff]  ;;  %v8648_v62 = vld [vmem:[#allocation30_spill] sm:$0xff] }
 0x49a   : > { %v6227_v44 = vpop.eup %6226  ;;  %6236 = vrcp.f32 %v2771_v49 }
 0x49b   : > { %v2976_v28 = vmul.f32 %v6227_v44, %v7719_v29  ;;  %v2774_v27 = vpop.xlane.xlu0 %2773  ;;  %5682 = vmatmul.mubr.msk.bf16.vlgmr.msra.gmra.mrb[80].mxu0 %vm2312_vm3, %v3025_v13  ;;  %v8649_v44 = vld [vmem:[#allocation36_spill] sm:$0xff] }
 0x49c   : > { %v6229_v34 = vpop.eup %6228  ;;  %6238 = vrcp.f32 %v2774_v27  ;;  %5692 = vmatpush3.bf16.msra.mxu0 %v8646_v47  ;;  %5693 = vmatprep.mubr.msk.bf16.mxu0 %vm6521_vm1, %v8613_v38 }
 0x49d   : > { %v2789_v6 = vpop.xlane.xlu1 %2788  ;;  %v3028_v57 = vpack.c.bf16 %v2976_v28, %v2975_v54  ;;  %5703 = vmatprep.subr.bf16.mxu0 %v8613_v38  ;;  %v2973_v29 = vmul.f32 %v6229_v34, %v7727_v17  ;;  %v2565_v54 = vsub.f32 %v7633_v1, %v7963_v61  ;;  %v2567_v1 = vsub.f32 %v7545_v46, %v7955_v59 }
 0x49e   : > { %v6231_v7 = vpop.eup %6230  ;;  %6240 = vrcp.f32 %v2789_v6  ;;  %4130 = vrot.lane.b32.xlu0 %v8647_v19, %s6525_s27 }
 0x49f   : > { %v2974_v53 = vmul.f32 %v6231_v7, %v7733_v4  ;;  %v2792_v31 = vpop.xlane.xlu0 %2791  ;;  %5700 = vmatmul.mubr.msk.bf16.vlgmr.msra.gmra.mrb[100].mxu1 %vm2312_vm3, %v3028_v57  ;;  %v2689_v61 = vmul.f32 1.442695, %v2565_v54  ;;  %v8650_v7 = vld [vmem:[#allocation33_spill] sm:$0xff] }
 0x4a0   : > { %v6233_v36 = vpop.eup %6232  ;;  %6242 = vrcp.f32 %v2792_v31  ;;  %5710 = vmatpush3.bf16.msra.mxu1 %v8648_v62  ;;  %5711 = vmatprep.mubr.msk.bf16.mxu1 %vm6521_vm1, %v8613_v38  ;;  %v8651_v31 = vld [vmem:[#allocation42_spill] sm:$0xff] }
 0x4a1   : > { %v2783_v56 = vpop.xlane.xlu1 %2782  ;;  %v3027_v15 = vpack.c.bf16 %v2974_v53, %v2973_v29  ;;  %5721 = vmatprep.subr.bf16.mxu1 %v8613_v38  ;;  %v2979_v17 = vmul.f32 %v6233_v36, %v7740_v8  ;;  %v2693_v36 = vmul.f32 1.442695, %v2567_v1  ;;  %v8654_v1 = vld [vmem:[#allocation37_spill] sm:$0xff] }
 0x4a2   : > { %v6235_v26 = vpop.eup %6234  ;;  %6244 = vrcp.f32 %v2783_v56 }
 0x4a3   : > { %v2980_v4 = vmul.f32 %v6235_v26, %v7746_v16  ;;  %v2786_v49 = vpop.xlane.xlu0 %2785  ;;  %5694 = vmatmul.mubr.msk.bf16.vlgmr.msra.gmra.mrb[84].mxu0 %vm2312_vm3, %v3027_v15  ;;  %v2566_v16 = vsub.f32 %v7639_v20, %v7972_v35 }
 0x4a4   : > { %v6237_v13 = vpop.eup %6236  ;;  %6246 = vrcp.f32 %v2786_v49  ;;  %5704 = vmatpush3.bf16.msra.mxu0 %v8649_v44  ;;  %5705 = vmatprep.mubr.msk.bf16.mxu0 %vm6521_vm1, %v8613_v38 }
 0x4a5   : > { %v2801_v28 = vpop.xlane.xlu1 %2800  ;;  %v3030_v27 = vpack.c.bf16 %v2980_v4, %v2979_v17  ;;  %5715 = vmatprep.subr.bf16.mxu0 %v8613_v38  ;;  %v2977_v34 = vmul.f32 %v6237_v13, %v7750_v3  ;;  %v2568_v3 = vsub.f32 %v7555_v10, %v7957_v21  ;;  %v8652_v17 = vld [vmem:[#allocation35_spill] sm:$0xff] }
 0x4a6   : > { %v6239_v8 = vpop.eup %6238  ;;  %6248 = vrcp.f32 %v2801_v28  ;;  %v8653_v28 = vld [vmem:[#allocation38_spill] sm:$0xff] }
 0x4a7   : > { %v2978_v47 = vmul.f32 %v6239_v8, %v7757_v12  ;;  %v2804_v6 = vpop.xlane.xlu0 %2803  ;;  %5712 = vmatmul.mubr.msk.bf16.vlgmr.msra.gmra.mrb[104].mxu1 %vm2312_vm3, %v3030_v27  ;;  %v2691_v12 = vmul.f32 1.442695, %v2566_v16 }
 0x4a8   : > { %v6241_v57 = vpop.eup %6240  ;;  %6250 = vrcp.f32 %v2804_v6  ;;  %5722 = vmatpush3.bf16.msra.mxu1 %v8650_v7  ;;  %5723 = vmatprep.mubr.msk.bf16.mxu1 %vm6521_vm1, %v8613_v38 }
 0x4a9   : > { %v2795_v19 = vpop.xlane.xlu1 %2794  ;;  %v3029_v29 = vpack.c.bf16 %v2978_v47, %v2977_v34  ;;  %5733 = vmatprep.subr.bf16.mxu1 %v8613_v38  ;;  %v2983_v35 = vmul.f32 %v6241_v57, %v7763_v55  ;;  %v2695_v55 = vmul.f32 1.442695, %v2568_v3 }
 0x4aa   : > { %v6243_v20 = vpop.eup %6242  ;;  %6252 = vrcp.f32 %v2795_v19 }
 0x4ab   : > { %v2984_v46 = vmul.f32 %v6243_v20, %v7768_v14  ;;  %v2798_v59 = vpop.xlane.xlu0 %2797  ;;  %5706 = vmatmul.mubr.msk.bf16.vlgmr.msra.gmra.mrb[88].mxu0 %vm2312_vm3, %v3029_v29 }
 0x4ac   : > { %v6245_v53 = vpop.eup %6244  ;;  %6254 = vrcp.f32 %v2798_v59  ;;  %5716 = vmatpush3.bf16.msra.mxu0 %v8651_v31  ;;  %5717 = vmatprep.mubr.msk.bf16.mxu0 %vm6521_vm1, %v8613_v38 }
 0x4ad   : > { %6256 = vpow2.f32 %v2689_v61  ;;  %v2813_v62 = vpop.xlane.xlu1 %2812  ;;  %v3032_v56 = vpack.c.bf16 %v2984_v46, %v2983_v35  ;;  %5727 = vmatprep.subr.bf16.mxu0 %v8613_v38  ;;  %v2981_v14 = vmul.f32 %v6245_v53, %v7774_v25  ;;  %v8655_v35 = vld [vmem:[#allocation43_spill] sm:$0xff] }
 0x4ae   : > { %v6247_v10 = vpop.eup %6246  ;;  %6258 = vrcp.f32 %v2813_v62 }
 0x4af   : > { %6260 = vpow2.f32 %v2691_v12  ;;  %v2982_v21 = vmul.f32 %v6247_v10, %v7781_v9  ;;  %v2816_v15 = vpop.xlane.xlu0 %2815  ;;  %5724 = vmatmul.mubr.msk.bf16.vlgmr.msra.gmra.mrb[108].mxu1 %vm2312_vm3, %v3032_v56  ;;  %v8656_v10 = vld [vmem:[#allocation39_spill] sm:$0xff] }
 0x4b0   : > { %v6249_v26 = vpop.eup %6248  ;;  %6262 = vrcp.f32 %v2816_v15  ;;  %5734 = vmatpush3.bf16.msra.mxu1 %v8652_v17  ;;  %5735 = vmatprep.mubr.msk.bf16.mxu1 %vm6521_vm1, %v8613_v38  ;;  %v8657_v15 = vld [vmem:[#allocation40_spill] sm:$0xff] }
 0x4b1   : > { %6264 = vpow2.f32 %v2693_v36  ;;  %v2807_v4 = vpop.xlane.xlu1 %2806  ;;  %v3031_v49 = vpack.c.bf16 %v2982_v21, %v2981_v14  ;;  %5745 = vmatprep.subr.bf16.mxu1 %v8613_v38  ;;  %v2987_v25 = vmul.f32 %v6249_v26, %v7786_v37 }
 0x4b2   : > { %v6251_v13 = vpop.eup %6250  ;;  %6266 = vrcp.f32 %v2807_v4 }
 0x4b3   : > { %6268 = vpow2.f32 %v2695_v55  ;;  %v2988_v9 = vmul.f32 %v6251_v13, %v7788_v41  ;;  %v2810_v44 = vpop.xlane.xlu0 %2809  ;;  %5718 = vmatmul.mubr.msk.bf16.vlgmr.msra.gmra.mrb[92].mxu0 %vm2312_vm3, %v3031_v49  ;;  %v8659_v13 = vld [vmem:[#allocation19_spill] sm:$0xff] }
 0x4b4   : > { %v6253_v54 = vpop.eup %6252  ;;  %6270 = vrcp.f32 %v2810_v44  ;;  %5728 = vmatpush3.bf16.msra.mxu0 %v8653_v28  ;;  %5729 = vmatprep.mubr.msk.bf16.mxu0 %vm6521_vm1, %v8613_v38  ;;  %v8664_v44 = vld [vmem:[#allocation23_spill] sm:$0xff] }
 0x4b5   : > { %v2825_v27 = vpop.xlane.xlu1 %2824  ;;  %v3034_v8 = vpack.c.bf16 %v2988_v9, %v2987_v25  ;;  %5739 = vmatprep.subr.bf16.mxu0 %v8613_v38  ;;  %v2985_v37 = vmul.f32 %v6253_v54, %v7794_v60  ;;  %v8662_v25 = vld [vmem:[#allocation21_spill] sm:$0xff]  ;;  %v8663_v9 = vld [vmem:[#allocation22_spill] sm:$0xff]  ;;  %v8665_v54 = vld [vmem:[#allocation24_spill] sm:$0xff] }
 0x4b6   : > { %v6255_v16 = vpop.eup %6254  ;;  %6272 = vrcp.f32 %v2825_v27 }
 0x4b7   : > { %v8061_v34 = vpop.eup %6256  ;;  %v2986_v41 = vmul.f32 %v6255_v16, %v7804_v42  ;;  %v2828_v47 = vpop.xlane.xlu0 %2827  ;;  %5736 = vmatmul.mubr.msk.bf16.vlgmr.msra.gmra.mrb[112].mxu1 %vm2312_vm3, %v3034_v8 }
 0x4b8   : > { %v6259_v6 = vpop.eup %6258  ;;  %6274 = vrcp.f32 %v2828_v47  ;;  %5746 = vmatpush3.bf16.msra.mxu1 %v8654_v1  ;;  %5747 = vmatprep.mubr.msk.bf16.mxu1 %vm6521_vm1, %v8613_v38  ;;  %v2877_v60 = vsel %vm2312_vm3, %v8061_v34, 0.0 }
 0x4b9   : > { %v8066_v57 = vpop.eup %6260  ;;  %v2819_v61 = vpop.xlane.xlu1 %2818  ;;  %v3033_v7 = vpack.c.bf16 %v2986_v41, %v2985_v37  ;;  %5757 = vmatprep.subr.bf16.mxu1 %v8613_v38  ;;  %v2991_v29 = vmul.f32 %v6259_v6, %v7809_v22 }
 0x4ba   : > { %v6263_v19 = vpop.eup %6262  ;;  %6276 = vrcp.f32 %v2819_v61  ;;  %v2880_v46 = vsel %vm2312_vm3, %v8066_v57, 0.0 }
 0x4bb   : > { %v8074_v42 = vpop.eup %6264  ;;  %v2992_v20 = vmul.f32 %v6263_v19, %v7814_v33  ;;  %v2822_v3 = vpop.xlane.xlu0 %2821  ;;  %2878 = vadd.xlane.f32.xlu1 %v2877_v60  ;;  %5730 = vmatmul.mubr.msk.bf16.vlgmr.msra.gmra.mrb[96].mxu0 %vm2312_vm3, %v3033_v7 }
 0x4bc   : > { %v6267_v12 = vpop.eup %6266  ;;  %6278 = vrcp.f32 %v2822_v3  ;;  %5740 = vmatpush3.bf16.msra.mxu0 %v8655_v35  ;;  %5741 = vmatprep.mubr.msk.bf16.mxu0 %vm6521_vm1, %v8613_v38  ;;  %v2883_v53 = vsel %vm2312_vm3, %v8074_v42, 0.0 }
 0x4bd   : > { %v8084_v59 = vpop.eup %6268  ;;  %2881 = vadd.xlane.f32.xlu0 %v2880_v46  ;;  %v3036_v22 = vpack.c.bf16 %v2992_v20, %v2991_v29  ;;  %5751 = vmatprep.subr.bf16.mxu0 %v8613_v38  ;;  %v2989_v31 = vmul.f32 %v6267_v12, %v7823_v11  ;;  %v2837_v28 = vpop.xlane.xlu1 %2836 }
 0x4be   : > { %v6271_v33 = vpop.eup %6270  ;;  %v2886_v56 = vsel %vm2312_vm3, %v8084_v59, 0.0 }
 0x4bf   : > { %v2990_v36 = vmul.f32 %v6271_v33, %v7829_v39  ;;  %2884 = vadd.xlane.f32.xlu1 %v2883_v53  ;;  %5748 = vmatmul.mubr.msk.bf16.vlgmr.msra.gmra.mrb[116].mxu1 %vm2312_vm3, %v3036_v22 }
 0x4c0   : > { %v6273_v62 = vpop.eup %6272  ;;  %5758 = vmatpush3.bf16.msra.mxu1 %v8656_v10  ;;  %5759 = vmatprep.mubr.msk.bf16.mxu1 %vm6521_vm1, %v8613_v38 }
 0x4c1   : > { %2887 = vadd.xlane.f32.xlu0 %v2886_v56  ;;  %v3035_v55 = vpack.c.bf16 %v2990_v36, %v2989_v31  ;;  %5769 = vmatprep.subr.bf16.mxu1 %v8613_v38  ;;  %v2995_v11 = vmul.f32 %v6273_v62, %v7833_v51 }
 0x4c2   : > { %v6275_v14 = vpop.eup %6274 }
 0x4c3   : > { %v2996_v39 = vmul.f32 %v6275_v14, %v7837_v58  ;;  %5742 = vmatmul.mubr.msk.bf16.vlgmr.msra.gmra.mrb[100].mxu0 %vm2312_vm3, %v3035_v55  ;;  %v8658_v58 = vld [vmem:[#allocation17_spill] sm:$0xff]  ;;  %v2840_v8 = vpop.xlane.xlu0 %2839 }
 0x4c4   : > { %v6277_v21 = vpop.eup %6276  ;;  %5752 = vmatpush3.bf16.msra.mxu0 %v8657_v15  ;;  %5753 = vmatprep.mubr.msk.bf16.mxu0 %vm6521_vm1, %v8613_v38 }
 0x4c5   : > { %v3038_v26 = vpack.c.bf16 %v2996_v39, %v2995_v11  ;;  %5763 = vmatprep.subr.bf16.mxu0 %v8613_v38  ;;  %v2993_v4 = vmul.f32 %v6277_v21, %v7842_v48  ;;  %v8660_v48 = vld [vmem:[#allocation18_spill] sm:$0xff] }
 0x4c6   : > { %v6279_v17 = vpop.eup %6278 }
 0x4c7   : > { %v2994_v49 = vmul.f32 %v6279_v17, %v7846_v50  ;;  %5760 = vmatmul.mubr.msk.bf16.vlgmr.msra.gmra.mrb[120].mxu1 %vm2312_vm3, %v3038_v26  ;;  %v8661_v50 = vld [vmem:[#allocation20_spill] sm:$0xff] }
 0x4c8   : > { %5771 = vmatprep.mubr.msk.bf16.mxu1 %vm6521_vm1, %v8613_v38 }
 0x4c9   : > { %v3037_v51 = vpack.c.bf16 %v2994_v49, %v2993_v4 }
 0x4cb   : > { %5754 = vmatmul.mubr.msk.bf16.vlgmr.msra.gmra.mrb[104].mxu0 %vm2312_vm3, %v3037_v51 }
 0x4cc   : > { %5765 = vmatprep.mubr.msk.bf16.mxu0 %vm6521_vm1, %v8613_v38 }
 0x4d0   : > { %4177 = vrot.lane.b32.xlu1 %v8658_v58, %s6525_s27 }
 0x4d4   : > { %4271 = vrot.lane.b32.xlu1 %v8659_v13, %s6525_s27 }
 0x4d7   : > { %4224 = vrot.lane.b32.xlu0 %v8660_v48, %s6525_s27 }
 0x4d8   : > { %4318 = vrot.lane.b32.xlu1 %v8661_v50, %s6525_s27 }
 0x4db   : > { %4365 = vrot.lane.b32.xlu0 %v8662_v25, %s6525_s27 }
 0x4dc   : > { %4412 = vrot.lane.b32.xlu1 %v8663_v9, %s6525_s27 }
 0x4df   : > { %4459 = vrot.lane.b32.xlu0 %v8664_v44, %s6525_s27 }
 0x4e0   : > { %4506 = vrot.lane.b32.xlu1 %v8665_v54, %s6525_s27 }
 0x4ef   : > { %v2831_v41 = vpop.xlane.xlu1 %2830 }
 0x4f0   : > { %v8129_v27 = vpop.f32.mrb[64].mxu0 }
 0x4f1   : > { %v5635_v16 = vpop.f32.mrb[65].mxu0  ;;  %v2834_v6 = vpop.xlane.xlu0 %2833 }
 0x4f2   : > { %v8131_v37 = vpop.f32.mrb[66].mxu0 }
 0x4f3   : > { %v5636_v47 = vpop.f32.mrb[67].mxu0 }
 0x4f7   : > { %v2849_v1 = vpop.xlane.xlu1 %2848 }
 0x4f8   : > { %6280 = vrcp.f32 %v2849_v1 }
 0x4f9   : > { %v2852_v61 = vpop.xlane.xlu0 %2851 }
 0x4fa   : > { %6282 = vrcp.f32 %v2852_v61 }
 0x4fb   : > { %v2843_v7 = vpop.xlane.xlu1 %2842 }
 0x4fd   : > { %v2846_v19 = vpop.xlane.xlu0 %2845 }
 0x500   : > { %v8133_v60 = vpop.f32.mrb[80].mxu1 }
 0x501   : > { %v5641_v20 = vpop.f32.mrb[81].mxu1 }
 0x502   : > { %v6281_v29 = vpop.eup %6280  ;;  %v8135_v3 = vpop.f32.mrb[82].mxu1 }
 0x503   : > { %v2861_v12 = vpop.xlane.xlu1 %2860  ;;  %v5642_v46 = vpop.f32.mrb[83].mxu1  ;;  %v8138_v22 = vmul.f32 %v6281_v29, %v7888_v30 }
 0x504   : > { %v6283_v35 = vpop.eup %6282  ;;  %6284 = vrcp.f32 %v2861_v12 }
 0x505   : > { %v8141_v33 = vmul.f32 %v6283_v35, %v7897_v45  ;;  %v2864_v53 = vpop.xlane.xlu0 %2863 }
 0x506   : > { %6286 = vrcp.f32 %v2864_v53 }
 0x507   : > { %v3042_v31 = vpack.c.bf16 %v8141_v33, %v8138_v22  ;;  %6288 = vrcp.f32 %v2834_v6  ;;  %v2855_v36 = vpop.xlane.xlu1 %2854 }
 0x508   : > { %6290 = vrcp.f32 %v2840_v8 }
 0x509   : > { %6292 = vrcp.f32 %v2831_v41  ;;  %v2858_v62 = vpop.xlane.xlu0 %2857 }
 0x50a   : > { %6294 = vrcp.f32 %v2837_v28 }
 0x50e   : > { %v6285_v56 = vpop.eup %6284 }
 0x50f   : > { %v2873_v10 = vpop.xlane.xlu1 %2872  ;;  %v8146_v30 = vmul.f32 %v6285_v56, %v7923_v23 }
 0x510   : > { %v6287_v55 = vpop.eup %6286  ;;  %6296 = vrcp.f32 %v2873_v10 }
 0x511   : > { %v8149_v45 = vmul.f32 %v6287_v55, %v7933_v32  ;;  %v2876_v14 = vpop.xlane.xlu0 %2875  ;;  %v6289_v11 = vpop.eup %6288  ;;  %v8666_v32 = vld [vmem:[#allocation47_spill] sm:$0xff] }
 0x512   : > { %6298 = vrcp.f32 %v2876_v14  ;;  %v6291_v39 = vpop.eup %6290  ;;  %v2998_v17 = vmul.f32 %v6289_v11, %v7880_v5 }
 0x513   : > { %v2867_v21 = vpop.xlane.xlu1 %2866  ;;  %v3044_v15 = vpack.c.bf16 %v8149_v45, %v8146_v30  ;;  %v6293_v26 = vpop.eup %6292  ;;  %v3000_v51 = vmul.f32 %v6291_v39, %v7863_v52  ;;  %6300 = vrcp.f32 %v2846_v19 }
 0x514   : > { %v6295_v49 = vpop.eup %6294  ;;  %v2997_v23 = vmul.f32 %v6293_v26, %v7874_v2  ;;  %6302 = vrcp.f32 %v2843_v7 }
 0x515   : > { %v2870_v4 = vpop.xlane.xlu0 %2869  ;;  %v2999_v13 = vmul.f32 %v6295_v49, %v8666_v32  ;;  %6304 = vrcp.f32 %v2858_v62 }
 0x516   : > { %v3039_v50 = vpack.c.bf16 %v2998_v17, %v2997_v23  ;;  %6306 = vrcp.f32 %v2855_v36 }
 0x517   : > { %v4084_v58 = vpop.permute.xlu1 %4083  ;;  %v3040_v9 = vpack.c.bf16 %v3000_v51, %v2999_v13  ;;  %6308 = vrcp.f32 %v2870_v4 }
 0x518   : > { %5764 = vmatpush3.bf16.msra.mxu0 %v4084_v58  ;;  %6310 = vrcp.f32 %v2867_v21  ;;  %v8667_v21 = vld [vmem:[#allocation25_spill] sm:$0xff] }
 0x519   : > { %v4131_v48 = vpop.permute.xlu0 %4130  ;;  %5775 = vmatprep.subr.bf16.mxu0 %v8613_v38 }
 0x51a   : > { %v6297_v25 = vpop.eup %6296  ;;  %5770 = vmatpush3.bf16.msra.mxu1 %v4131_v48 }
 0x51b   : > { %5766 = vmatmul.mubr.msk.bf16.vlgmr.msra.gmra.mrb[108].mxu0 %vm2312_vm3, %v3039_v50  ;;  %5781 = vmatprep.subr.bf16.mxu1 %v8613_v38  ;;  %v8163_v52 = vmul.f32 %v6297_v25, %v7959_v24  ;;  %v8668_v25 = vld [vmem:[#allocation51_spill] sm:$0xff] }
 0x51c   : > { %v6299_v5 = vpop.eup %6298  ;;  %5777 = vmatprep.mubr.msk.bf16.mxu0 %vm6521_vm1, %v8613_v38 }
 0x51d   : > { %v8166_v2 = vmul.f32 %v6299_v5, %v7969_v43  ;;  %5772 = vmatmul.mubr.msk.bf16.vlgmr.msra.gmra.mrb[124].mxu1 %vm2312_vm3, %v3040_v9  ;;  %v6301_v35 = vpop.eup %6300 }
 0x51e   : > { %5783 = vmatprep.mubr.msk.bf16.mxu1 %vm6521_vm1, %v8613_v38  ;;  %v6303_v53 = vpop.eup %6302  ;;  %v3002_v10 = vmul.f32 %v6301_v35, %v7910_v40 }
 0x51f   : > { %v3046_v44 = vpack.c.bf16 %v8166_v2, %v8163_v52  ;;  %v3001_v11 = vmul.f32 %v6303_v53, %v7904_v0  ;;  %v6305_v36 = vpop.eup %6304 }
 0x520   : > { %v6307_v51 = vpop.eup %6306  ;;  %v3006_v4 = vmul.f32 %v6305_v36, %v7948_v18 }
 0x521   : > { %v3041_v26 = vpack.c.bf16 %v3002_v10, %v3001_v11  ;;  %v3005_v58 = vmul.f32 %v6307_v51, %v8667_v21  ;;  %v6309_v18 = vpop.eup %6308 }
 0x522   : > { %v6311_v33 = vpop.eup %6310 }
 0x523   : > { %v3043_v13 = vpack.c.bf16 %v3006_v4, %v3005_v58  ;;  %v3009_v9 = vmul.f32 %v6311_v33, %v8668_v25 }
 0x53b   : > { %v8173_v54 = vpop.f32.mrb[68].mxu0 }
 0x53c   : > { %v5647_v28 = vpop.f32.mrb[69].mxu0 }
 0x53d   : > { %v8175_v8 = vpop.f32.mrb[70].mxu0 }
 0x53e   : > { %v5648_v16 = vpop.f32.mrb[71].mxu0 }
 0x543   : > { %v8177_v24 = vpop.f32.mrb[72].mxu0 }
 0x544   : > { %v5659_v43 = vpop.f32.mrb[73].mxu0 }
 0x545   : > { %v8179_v41 = vpop.f32.mrb[74].mxu0 }
 0x546   : > { %v5660_v47 = vpop.f32.mrb[75].mxu0 }
 0x547   : > { %v8181_v6 = vpop.f32.mrb[84].mxu1 }
 0x548   : > { %v5653_v1 = vpop.f32.mrb[85].mxu1  ;;  %v2879_v61 = vpop.xlane.xlu1 %2878 }
 0x549   : > { %v8183_v29 = vpop.f32.mrb[86].mxu1 }
 0x54a   : > { %v5654_v20 = vpop.f32.mrb[87].mxu1  ;;  %v2882_v12 = vpop.xlane.xlu0 %2881 }
 0x54b   : > { %v8185_v46 = vpop.f32.mrb[76].mxu0  ;;  %6312 = vrcp.f32 %v2882_v12 }
 0x54c   : > { %v5671_v7 = vpop.f32.mrb[77].mxu0  ;;  %v2885_v19 = vpop.xlane.xlu1 %2884  ;;  %6314 = vrcp.f32 %v2879_v61 }
 0x54d   : > { %v8187_v56 = vpop.f32.mrb[78].mxu0 }
 0x54e   : > { %v5672_v55 = vpop.f32.mrb[79].mxu0  ;;  %v2888_v14 = vpop.xlane.xlu0 %2887 }
 0x54f   : > { %6316 = vrcp.f32 %v2888_v14 }
 0x550   : > { %v4178_v62 = vpop.permute.xlu1 %4177  ;;  %6318 = vrcp.f32 %v2885_v19 }
 0x551   : > { %5776 = vmatpush3.bf16.msra.mxu0 %v4178_v62 }
 0x552   : > { %v4225_v39 = vpop.permute.xlu0 %4224  ;;  %5787 = vmatprep.subr.bf16.mxu0 %v8613_v38 }
 0x553   : > { %v8192_v17 = vpop.f32.mrb[88].mxu1  ;;  %5782 = vmatpush3.bf16.msra.mxu1 %v4225_v39 }
 0x554   : > { %v5665_v49 = vpop.f32.mrb[89].mxu1  ;;  %5778 = vmatmul.mubr.msk.bf16.vlgmr.msra.gmra.mrb[112].mxu0 %vm2312_vm3, %v3041_v26  ;;  %v4272_v40 = vpop.permute.xlu1 %4271  ;;  %5793 = vmatprep.subr.bf16.mxu1 %v8613_v38 }
 0x555   : > { %v8196_v0 = vpop.f32.mrb[90].mxu1  ;;  %5788 = vmatpush3.bf16.msra.mxu0 %v4272_v40  ;;  %5789 = vmatprep.mubr.msk.bf16.mxu0 %vm6521_vm1, %v8613_v38  ;;  %v6313_v30 = vpop.eup %6312 }
 0x556   : > { %v5666_v23 = vpop.f32.mrb[91].mxu1  ;;  %5784 = vmatmul.mubr.msk.bf16.vlgmr.msra.gmra.mrb[128].mxu1 %vm2312_vm3, %v3042_v31  ;;  %5799 = vmatprep.subr.bf16.mxu0 %v8613_v38  ;;  %v4366_v48 = vpop.permute.xlu0 %4365  ;;  %v3010_v31 = vmul.f32 %v6309_v18, %v7980_v63  ;;  %v3014_v47 = vmul.f32 %v6313_v30, %v8066_v57 }
 0x557   : > { %5795 = vmatprep.mubr.msk.bf16.mxu1 %vm6521_vm1, %v8613_v38  ;;  %v6315_v45 = vpop.eup %6314 }
 0x558   : > { %v4319_v32 = vpop.permute.xlu1 %4318  ;;  %v3045_v16 = vpack.c.bf16 %v3010_v31, %v3009_v9  ;;  %v3013_v20 = vmul.f32 %v6315_v45, %v8061_v34 }
 0x559   : > { %5794 = vmatpush3.bf16.msra.mxu1 %v4319_v32  ;;  %v6317_v43 = vpop.eup %6316 }
 0x55a   : > { %5805 = vmatprep.subr.bf16.mxu1 %v8613_v38  ;;  %v6319_v61 = vpop.eup %6318  ;;  %v3016_v12 = vmul.f32 %v6317_v43, %v8084_v59  ;;  %v3047_v7 = vpack.c.bf16 %v3014_v47, %v3013_v20 }
 0x55b   : > { %v3015_v35 = vmul.f32 %v6319_v61, %v8074_v42 }
 0x55c   : > { %5790 = vmatmul.mubr.msk.bf16.vlgmr.msra.gmra.mrb[116].mxu0 %vm2312_vm3, %v3043_v13  ;;  %v4413_v22 = vpop.permute.xlu1 %4412 }
 0x55d   : > { %5800 = vmatpush3.bf16.msra.mxu0 %v4366_v48  ;;  %5801 = vmatprep.mubr.msk.bf16.mxu0 %vm6521_vm1, %v8613_v38  ;;  %v3048_v53 = vpack.c.bf16 %v3016_v12, %v3015_v35 }
 0x55e   : > { %5796 = vmatmul.mubr.msk.bf16.vlgmr.msra.gmra.mrb[132].mxu1 %vm2312_vm3, %v3044_v15  ;;  %5811 = vmatprep.subr.bf16.mxu0 %v8613_v38  ;;  %v4460_v15 = vpop.permute.xlu0 %4459 }
 0x55f   : > { %v8219_v50 = vpop.f32.mrb[92].mxu1  ;;  %5806 = vmatpush3.bf16.msra.mxu1 %v4413_v22  ;;  %5807 = vmatprep.mubr.msk.bf16.mxu1 %vm6521_vm1, %v8613_v38 }
 0x560   : > { %v5677_v5 = vpop.f32.mrb[93].mxu1  ;;  %5817 = vmatprep.subr.bf16.mxu1 %v8613_v38  ;;  %v4507_v1 = vpop.permute.xlu1 %4506 }
 0x561   : > { %v8225_v28 = vpop.f32.mrb[94].mxu1 }
 0x562   : > { %v5678_v63 = vpop.f32.mrb[95].mxu1 }
 0x564   : > { %5802 = vmatmul.mubr.msk.bf16.vlgmr.msra.gmra.mrb[120].mxu0 %vm2312_vm3, %v3045_v16 }
 0x565   : > { %5812 = vmatpush3.bf16.msra.mxu0 %v4460_v15  ;;  %5813 = vmatprep.mubr.msk.bf16.mxu0 %vm6521_vm1, %v8613_v38 }
 0x566   : > { %5808 = vmatmul.mubr.msk.bf16.vlgmr.msra.gmra.mrb[136].mxu1 %vm2312_vm3, %v3046_v44 }
 0x567   : > { %5818 = vmatpush3.bf16.msra.mxu1 %v4507_v1  ;;  %5819 = vmatprep.mubr.msk.bf16.mxu1 %vm6521_vm1, %v8613_v38 }
 0x56a   : > { %v3512_v19 = vpop.f32.mrb[96].mxu1 }
 0x56b   : > { %v5689_v57 = vpop.f32.mrb[97].mxu1 }
 0x56c   : > { %5814 = vmatmul.mubr.msk.bf16.vlgmr.msra.gmra.mrb[124].mxu0 %vm2312_vm3, %v3047_v7  ;;  %v3515_v52 = vpop.f32.mrb[98].mxu1 }
 0x56d   : > { %v5940_v2 = vpack.i.bf16 %v3515_v52, %v3512_v19  ;;  %v5690_v44 = vpop.f32.mrb[99].mxu1 }
 0x56e   : > { %v3465_v10 = vpop.f32.mrb[80].mxu0  ;;  %5820 = vmatmul.mubr.msk.bf16.vlgmr.msra.gmra.mrb[140].mxu1 %vm2312_vm3, %v3048_v53 }
 0x56f   : > { %v5683_v55 = vpop.f32.mrb[81].mxu0  ;;  %5941 = vrot.lane.b32.xlu1 %v5940_v2, %s6526_s6 }
 0x570   : > { %v3468_v38 = vpop.f32.mrb[82].mxu0 }
 0x571   : > { %v5945_v34 = vpack.i.bf16 %v3468_v38, %v3465_v10  ;;  %v5684_v59 = vpop.f32.mrb[83].mxu0 }
 0x572   : > { %v3606_v42 = vpop.f32.mrb[100].mxu1 }
 0x573   : > { %5946 = vrot.lane.b32.xlu0 %v5945_v34, %s6526_s6  ;;  %v5701_v14 = vpop.f32.mrb[101].mxu1 }
 0x574   : > { %v3609_v11 = vpop.f32.mrb[102].mxu1 }
 0x575   : > { %v5950_v62 = vpack.i.bf16 %v3609_v11, %v3606_v42  ;;  %v5702_v39 = vpop.f32.mrb[103].mxu1 }
 0x576   : > { %v3559_v26 = vpop.f32.mrb[84].mxu0 }
 0x577   : > { %v5695_v36 = vpop.f32.mrb[85].mxu0  ;;  %5951 = vrot.lane.b32.xlu1 %v5950_v62, %s6526_s6 }
 0x578   : > { %v3562_v49 = vpop.f32.mrb[86].mxu0 }
 0x579   : > { %v5955_v40 = vpack.i.bf16 %v3562_v49, %v3559_v26  ;;  %v5696_v51 = vpop.f32.mrb[87].mxu0 }
 0x57a   : > { %v3700_v4 = vpop.f32.mrb[104].mxu1 }
 0x57b   : > { %5956 = vrot.lane.b32.xlu0 %v5955_v40, %s6526_s6  ;;  %v5713_v23 = vpop.f32.mrb[105].mxu1 }
 0x57c   : > { %v3703_v21 = vpop.f32.mrb[106].mxu1 }
 0x57d   : > { %v5960_v58 = vpack.i.bf16 %v3703_v21, %v3700_v4  ;;  %v5714_v32 = vpop.f32.mrb[107].mxu1 }
 0x57e   : > { %v3653_v13 = vpop.f32.mrb[88].mxu0 }
 0x57f   : > { %v5707_v18 = vpop.f32.mrb[89].mxu0  ;;  %5961 = vrot.lane.b32.xlu1 %v5960_v58, %s6526_s6 }
 0x580   : > { %v3656_v48 = vpop.f32.mrb[90].mxu0 }
 0x581   : > { %v5965_v22 = vpack.i.bf16 %v3656_v48, %v3653_v13  ;;  %v5708_v33 = vpop.f32.mrb[91].mxu0 }
 0x582   : > { %v8247_v31 = vpop.f32.mrb[108].mxu1 }
 0x583   : > { %5966 = vrot.lane.b32.xlu0 %v5965_v22, %s6526_s6  ;;  %v5725_v25 = vpop.f32.mrb[109].mxu1 }
 0x584   : > { %v8250_v9 = vpop.f32.mrb[110].mxu1 }
 0x585   : > { %v6025_v5 = vpack.i.bf16 %v8250_v9, %v8247_v31  ;;  %v5726_v63 = vpop.f32.mrb[111].mxu1 }
 0x586   : > { %v8254_v16 = vpop.f32.mrb[92].mxu0 }
 0x587   : > { %v5719_v30 = vpop.f32.mrb[93].mxu0 }
 0x588   : > { %v8256_v45 = vpop.f32.mrb[94].mxu0  ;;  %v6062_v30 = vld [vmem:[#allocation8] sm:$0xff]  }
 0x589   : > { %v6020_v15 = vpack.i.bf16 %v8256_v45, %v8254_v16  ;;  %v5720_v43 = vpop.f32.mrb[95].mxu0  ;;  %5823 = vmatprep.subr.bf16.mxu0 %v6062_v30 }
 0x58a   : > { %v3888_v47 = vpop.f32.mrb[112].mxu1  ;;  %5824 = vmatpush3.bf16.msra.mxu0 %v6062_v30  ;;  %v6063_v43 = vld [vmem:[#allocation8 + $0x8] sm:$0xff]  }
 0x58b   : > { %v5737_v1 = vpop.f32.mrb[113].mxu1  ;;  %5825 = vmatprep.subr.bf16.mxu0 %v6063_v43 }
 0x58c   : > { %v3891_v61 = vpop.f32.mrb[114].mxu1 }
 0x58d   : > { %v5970_v20 = vpack.i.bf16 %v3891_v61, %v3888_v47  ;;  %v5738_v12 = vpop.f32.mrb[115].mxu1 }
 0x58e   : > { %v3841_v35 = vpop.f32.mrb[96].mxu0  ;;  %5826 = vmatpush3.bf16.msra.mxu0 %v6063_v43 }
 0x58f   : > { %v5731_v7 = vpop.f32.mrb[97].mxu0  ;;  %5971 = vrot.lane.b32.xlu1 %v5970_v20, %s6527_s17 }
 0x590   : > { %v3844_v19 = vpop.f32.mrb[98].mxu0 }
 0x591   : > { %v5975_v57 = vpack.i.bf16 %v3844_v19, %v3841_v35  ;;  %v5732_v53 = vpop.f32.mrb[99].mxu0 }
 0x592   : > { %v3982_v52 = vpop.f32.mrb[116].mxu1 }
 0x593   : > { %5976 = vrot.lane.b32.xlu0 %v5975_v57, %s6527_s17  ;;  %v5749_v2 = vpop.f32.mrb[117].mxu1 }
 0x594   : > { %v3985_v44 = vpop.f32.mrb[118].mxu1 }
 0x595   : > { %v5980_v10 = vpack.i.bf16 %v3985_v44, %v3982_v52  ;;  %v5750_v55 = vpop.f32.mrb[119].mxu1 }
 0x596   : > { %v3935_v38 = vpop.f32.mrb[100].mxu0 }
 0x597   : > { %v5743_v34 = vpop.f32.mrb[101].mxu0  ;;  %5981 = vrot.lane.b32.xlu1 %v5980_v10, %s6527_s17 }
 0x598   : > { %v3938_v59 = vpop.f32.mrb[102].mxu0 }
 0x599   : > { %v5985_v42 = vpack.i.bf16 %v3938_v59, %v3935_v38  ;;  %v5744_v14 = vpop.f32.mrb[103].mxu0 }
 0x59a   : > { %v4076_v11 = vpop.f32.mrb[120].mxu1 }
 0x59b   : > { %5986 = vrot.lane.b32.xlu0 %v5985_v42, %s6527_s17  ;;  %v5761_v62 = vpop.f32.mrb[121].mxu1 }
 0x59c   : > { %v4079_v39 = vpop.f32.mrb[122].mxu1 }
 0x59d   : > { %v6005_v26 = vpack.i.bf16 %v4079_v39, %v4076_v11  ;;  %v5762_v36 = vpop.f32.mrb[123].mxu1 }
 0x59e   : > { %v4029_v49 = vpop.f32.mrb[104].mxu0 }
 0x59f   : > { %v5755_v40 = vpop.f32.mrb[105].mxu0 }
 0x5a0   : > { %v4032_v51 = vpop.f32.mrb[106].mxu0 }
 0x5a1   : > { %v6000_v4 = vpack.i.bf16 %v4032_v51, %v4029_v49  ;;  %v5756_v23 = vpop.f32.mrb[107].mxu0 }
 0x5ee   : > { %v4123_v21 = vpop.f32.mrb[108].mxu0 }
 0x5ef   : > { %v5767_v58 = vpop.f32.mrb[109].mxu0 }
 0x5f0   : > { %v4126_v32 = vpop.f32.mrb[110].mxu0  ;;  %v4170_v13 = vpop.f32.mrb[124].mxu1 }
 0x5f1   : > { %v6040_v18 = vpack.i.bf16 %v4126_v32, %v4123_v21  ;;  %v5768_v48 = vpop.f32.mrb[111].mxu0  ;;  %v5773_v22 = vpop.f32.mrb[125].mxu1 }
 0x5f2   : > { %v4173_v33 = vpop.f32.mrb[126].mxu1  ;;  %v5947_v48 = vpop.permute.xlu0 %5946 }
 0x5f3   : > { %v6045_v25 = vpack.i.bf16 %v4173_v33, %v4170_v13  ;;  %v5774_v63 = vpop.f32.mrb[127].mxu1  ;;  %v5942_v22 = vpop.permute.xlu1 %5941 }
 0x5f6   : > { %v5957_v33 = vpop.permute.xlu0 %5956 }
 0x5f7   : > { %v5952_v63 = vpop.permute.xlu1 %5951 }
 0x5fb   : > { %v8286_v30 = vpop.permute.xlu1 %5961 }
 0x627   : > { %v4217_v47 = vpop.f32.mrb[112].mxu0 }
 0x628   : > { %v5779_v1 = vpop.f32.mrb[113].mxu0 }
 0x629   : > { %v4220_v61 = vpop.f32.mrb[114].mxu0  ;;  %v4264_v20 = vpop.f32.mrb[128].mxu1 }
 0x62a   : > { %v5995_v12 = vpack.i.bf16 %v4220_v61, %v4217_v47  ;;  %v5780_v35 = vpop.f32.mrb[115].mxu0  ;;  %v5785_v7 = vpop.f32.mrb[129].mxu1  ;;  %v5948_v61 = vunpack.i.l.bf16 %v5947_v48 }
 0x62b   : > { %v4267_v19 = vpop.f32.mrb[130].mxu1  ;;  %v5972_v47 = vpop.permute.xlu1 %5971 }
 0x62c   : > { %v5990_v57 = vpack.i.bf16 %v4267_v19, %v4264_v20  ;;  %v5786_v53 = vpop.f32.mrb[131].mxu1  ;;  %5996 = vrot.lane.b32.xlu0 %v5995_v12, %s6528_s13  ;;  %v5944_v20 = vunpack.i.h.bf16 %v5942_v22  ;;  %v5943_v12 = vunpack.i.l.bf16 %v5942_v22 }
 0x62d   : > { %v5973_v53 = vunpack.i.l.bf16 %v5972_v47 }
 0x62e   : > { %5991 = vrot.lane.b32.xlu1 %v5990_v57, %s6528_s13  ;;  %v5974_v57 = vunpack.i.h.bf16 %v5972_v47 }
 0x62f   : > { %v4311_v52 = vpop.f32.mrb[116].mxu0  ;;  %v5982_v19 = vpop.permute.xlu1 %5981 }
 0x630   : > { %6001 = vrot.lane.b32.xlu0 %v6000_v4, %s6527_s17  ;;  %v5791_v2 = vpop.f32.mrb[117].mxu0 }
 0x631   : > { %v4314_v44 = vpop.f32.mrb[118].mxu0  ;;  %v4358_v10 = vpop.f32.mrb[132].mxu1 }
 0x632   : > { %v6015_v55 = vpack.i.bf16 %v4314_v44, %v4311_v52  ;;  %6006 = vrot.lane.b32.xlu1 %v6005_v26, %s6527_s17  ;;  %v5792_v38 = vpop.f32.mrb[119].mxu0  ;;  %v5797_v34 = vpop.f32.mrb[133].mxu1  ;;  %v4745_v44 = vsel %vm745_vm2, %v8129_v27, %v5948_v61  ;;  %v5954_v27 = vunpack.i.h.bf16 %v5952_v63 }
 0x633   : > { %v4361_v59 = vpop.f32.mrb[134].mxu1  ;;  %v4748_v38 = vsel %vm745_vm2, %v8135_v3, %v5944_v20  ;;  %v4747_v34 = vsel %vm745_vm2, %v8133_v60, %v5943_v12  ;;  %v5958_v60 = vunpack.i.l.bf16 %v5957_v33 }
 0x634   : > { %v6010_v42 = vpack.i.bf16 %v4361_v59, %v4358_v10  ;;  %6016 = vrot.lane.b32.xlu0 %v6015_v55, %s6528_s13  ;;  %v5798_v14 = vpop.f32.mrb[135].mxu1  ;;  %v4752_v22 = vsel %vm745_vm2, %v8183_v29, %v5954_v27 }
 0x636   : > { %6011 = vrot.lane.b32.xlu1 %v6010_v42, %s6528_s13 }
 0x637   : > { %v4405_v11 = vpop.f32.mrb[120].mxu0 }
 0x638   : > { %6021 = vrot.lane.b32.xlu0 %v6020_v15, %s6526_s6  ;;  %v5803_v62 = vpop.f32.mrb[121].mxu0 }
 0x639   : > { %v4408_v39 = vpop.f32.mrb[122].mxu0  ;;  %v4452_v36 = vpop.f32.mrb[136].mxu1 }
 0x63a   : > { %v6035_v49 = vpack.i.bf16 %v4408_v39, %v4405_v11  ;;  %v5804_v26 = vpop.f32.mrb[123].mxu0  ;;  %6026 = vrot.lane.b32.xlu1 %v6025_v5, %s6526_s6  ;;  %v5809_v40 = vpop.f32.mrb[137].mxu1  ;;  %s6440_s6 = scalar_lea.vmem %s6439_s15, 4096 }
 0x63b   : > { %v4455_v51 = vpop.f32.mrb[138].mxu1  ;;  %v5959_v40 = vunpack.i.h.bf16 %v5957_v33  ;;  %p6442_p2 = scmp.lt.s32.totalorder %s6440_s6, %s6434_s26 }
 0x63c   : > { %v6030_v4 = vpack.i.bf16 %v4455_v51, %v4452_v36  ;;  %6036 = vrot.lane.b32.xlu0 %v6035_v49, %s6528_s13  ;;  %v5810_v23 = vpop.f32.mrb[139].mxu1  ;;  %v4763_v36 = vsel %vm2312_vm3, %v4747_v34, %v5973_v53  ;;  %v4764_v49 = vsel %vm2312_vm3, %v4748_v38, %v5974_v57  ;;  %v5963_v53 = vunpack.i.l.bf16 %v8286_v30 }
 0x63d   : > { %v5953_v23 = vunpack.i.l.bf16 %v5952_v63  ;;  %p6443_p1 = por %p6442_p2, %p6441_p12 }
 0x63e   : > { %6031 = vrot.lane.b32.xlu1 %v6030_v4, %s6528_s13 }
 0x63f   : > { %v4499_v16 = vpop.f32.mrb[124].mxu0  ;;  %v4751_v33 = vsel %vm745_vm2, %v8181_v6, %v5953_v23  ;;  %p6444_p4 = pnand %p6443_p1, %p6437_p7 }
 0x640   : > { %6041 = vrot.lane.b32.xlu0 %v6040_v18, %s6527_s17  ;;  %v5815_v45 = vpop.f32.mrb[125].mxu0  ;;  %v8284_v18 = vpop.permute.xlu0 %5966 }
 0x641   : > { %v4502_v15 = vpop.f32.mrb[126].mxu0  ;;  %v4546_v21 = vpop.f32.mrb[140].mxu1  ;;  %v5969_v6 = vunpack.i.h.bf16 %v8284_v18 }
 0x642   : > { %v6050_v58 = vpack.i.bf16 %v4502_v15, %v4499_v16  ;;  %v5816_v32 = vpop.f32.mrb[127].mxu0  ;;  %6046 = vrot.lane.b32.xlu1 %v6045_v25, %s6527_s17  ;;  %v5821_v31 = vpop.f32.mrb[141].mxu1  ;;  %v5949_v25 = vunpack.i.h.bf16 %v5947_v48 }
 0x643   : > { %v4549_v9 = vpop.f32.mrb[142].mxu1  ;;  %v5983_v32 = vunpack.i.l.bf16 %v5982_v19 }
 0x644   : > { %v6055_v5 = vpack.i.bf16 %v4549_v9, %v4546_v21  ;;  %6051 = vrot.lane.b32.xlu0 %v6050_v58, %s6528_s13  ;;  %v5822_v13 = vpop.f32.mrb[143].mxu1  ;;  %v5977_v43 = vpop.permute.xlu0 %5976  ;;  %v4746_v2 = vsel %vm745_vm2, %v8131_v37, %v5949_v25  ;;  %v5984_v58 = vunpack.i.h.bf16 %v5982_v19  ;;  %v4750_v9 = vsel %vm745_vm2, %v8175_v8, %v5959_v40 }
 0x645   : > { %v5979_v35 = vunpack.i.h.bf16 %v5977_v43  ;;  %v5978_v7 = vunpack.i.l.bf16 %v5977_v43  ;;  %v4767_v20 = vsel %vm2312_vm3, %v4751_v33, %v5983_v32 }
 0x646   : > { %6056 = vrot.lane.b32.xlu1 %v6055_v5, %s6528_s13  ;;  %v4749_v5 = vsel %vm745_vm2, %v8173_v54, %v5958_v60  ;;  %v5964_v54 = vunpack.i.h.bf16 %v8286_v30  ;;  %v4768_v29 = vsel %vm2312_vm3, %v4752_v22, %v5984_v58 }
 0x647   : > { %v4762_v59 = vsel %vm2312_vm3, %v4746_v2, %v5979_v35  ;;  %v4761_v42 = vsel %vm2312_vm3, %v4745_v44, %v5978_v7  ;;  %v5968_v7 = vunpack.i.l.bf16 %v8284_v18  ;;  %v4754_v18 = vsel %vm745_vm2, %v8179_v41, %v5969_v6 }
 0x648   : > { %v5987_v1 = vpop.permute.xlu0 %5986  ;;  %v4756_v30 = vsel %vm745_vm2, %v8196_v0, %v5964_v54 }
 0x649   : > { %v5989_v16 = vunpack.i.h.bf16 %v5987_v1  ;;  %v5988_v45 = vunpack.i.l.bf16 %v5987_v1 }
 0x64b   : > { %v4766_v63 = vsel %vm2312_vm3, %v4750_v9, %v5989_v16  ;;  %v4765_v43 = vsel %vm2312_vm3, %v4749_v5, %v5988_v45 }
 0x69e   : > { %v5997_v52 = vpop.permute.xlu0 %5996 }
 0x69f   : > { %v5999_v10 = vunpack.i.h.bf16 %v5997_v52  ;;  %v5998_v55 = vunpack.i.l.bf16 %v5997_v52 }
 0x6a0   : > { %v5992_v14 = vpop.permute.xlu1 %5991 }
 0x6a1   : > { %v4779_v11 = vsel %vm4777_vm4, %v4762_v59, %v5999_v10  ;;  %v4778_v37 = vsel %vm4777_vm4, %v4761_v42, %v5998_v55  ;;  %v5994_v62 = vunpack.i.h.bf16 %v5992_v14  ;;  %v5993_v39 = vunpack.i.l.bf16 %v5992_v14 }
 0x6a2   : > { %v4794_v3 = vpack.c.bf16 %v4779_v11, %v4778_v37  ;;  %v6002_v26 = vpop.permute.xlu0 %6001  ;;  %v4753_v59 = vsel %vm745_vm2, %v8177_v24, %v5968_v7  ;;  %v4755_v11 = vsel %vm745_vm2, %v8192_v17, %v5963_v53 }
 0x6a3   : > { %v4780_v51 = vsel %vm4777_vm4, %v4763_v36, %v5993_v39  ;;  %v4781_v4 = vsel %vm4777_vm4, %v4764_v49, %v5994_v62  ;;  %v6004_v52 = vunpack.i.h.bf16 %v6002_v26  ;;  %v6003_v2 = vunpack.i.l.bf16 %v6002_v26 }
 0x6a4   : > { %v4795_v15 = vpack.c.bf16 %v4781_v4, %v4780_v51  ;;  %5827 = vmatprep.mubr.msk.bf16.mxu0 %vm539_vm0, %v4794_v3  ;;  %v6007_v21 = vpop.permute.xlu1 %6006 }
 0x6a5   : > { %v6009_v55 = vunpack.i.h.bf16 %v6007_v21  ;;  %v6008_v38 = vunpack.i.l.bf16 %v6007_v21  ;;  %v4770_v37 = vsel %vm2312_vm3, %v4754_v18, %v6004_v52  ;;  %v4769_v62 = vsel %vm2312_vm3, %v4753_v59, %v6003_v2 }
 0x6a6   : > { %v6017_v31 = vpop.permute.xlu0 %6016  ;;  %5828 = vmatmul.mubr.msk.bf16.vlgmr.msra.gmra.mrb[128].mxu0 %vm539_vm0, %v4795_v15 }
 0x6a7   : > { %v6019_v13 = vunpack.i.h.bf16 %v6017_v31  ;;  %v6018_v48 = vunpack.i.l.bf16 %v6017_v31  ;;  %v4771_v24 = vsel %vm2312_vm3, %v4755_v11, %v6008_v38  ;;  %v4772_v3 = vsel %vm2312_vm3, %v4756_v30, %v6009_v55 }
 0x6a8   : > { %v6012_v47 = vpop.permute.xlu1 %6011 }
 0x6a9   : > { %v4783_v1 = vsel %vm4777_vm4, %v4766_v63, %v6019_v13  ;;  %v4782_v8 = vsel %vm4777_vm4, %v4765_v43, %v6018_v48  ;;  %v6014_v25 = vunpack.i.h.bf16 %v6012_v47  ;;  %v6013_v61 = vunpack.i.l.bf16 %v6012_v47 }
 0x6aa   : > { %v4796_v12 = vpack.c.bf16 %v4783_v1, %v4782_v8  ;;  %v6022_v35 = vpop.permute.xlu0 %6021 }
 0x6ab   : > { %v4784_v19 = vsel %vm4777_vm4, %v4767_v20, %v6013_v61  ;;  %v4785_v57 = vsel %vm4777_vm4, %v4768_v29, %v6014_v25  ;;  %v6024_v26 = vunpack.i.h.bf16 %v6022_v35  ;;  %v6023_v60 = vunpack.i.l.bf16 %v6022_v35  ;;  %v8367_v29 = vld [vmem:[%s8510_s4] ss:$0 sm:$0xff] }
 0x6ac   : > { %v4797_v44 = vpack.c.bf16 %v4785_v57, %v4784_v19  ;;  %v6027_v10 = vpop.permute.xlu1 %6026  ;;  %5831 = vmatprep.mubr.msk.bf16.mxu0 %vm539_vm0, %v4796_v12 }
 0x6ad   : > { %v6029_v17 = vunpack.i.h.bf16 %v6027_v10  ;;  %v6028_v23 = vunpack.i.l.bf16 %v6027_v10  ;;  %v4758_v9 = vsel %vm745_vm2, %v8187_v56, %v6024_v26  ;;  %v4757_v5 = vsel %vm745_vm2, %v8185_v46, %v6023_v60 }
 0x6ae   : > { %v6037_v34 = vpop.permute.xlu0 %6036  ;;  %5832 = vmatmul.mubr.msk.bf16.gmra.mrb[132].mxu0 %vm539_vm0, %v4797_v44 }
 0x6af   : > { %v6039_v42 = vunpack.i.h.bf16 %v6037_v34  ;;  %v6038_v14 = vunpack.i.l.bf16 %v6037_v34  ;;  %v4760_v22 = vsel %vm745_vm2, %v8225_v28, %v6029_v17  ;;  %v4759_v33 = vsel %vm745_vm2, %v8219_v50, %v6028_v23 }
 0x6b0   : > { %v6032_v39 = vpop.permute.xlu1 %6031 }
 0x6b1   : > { %v4787_v27 = vsel %vm4777_vm4, %v4770_v37, %v6039_v42  ;;  %v4786_v41 = vsel %vm4777_vm4, %v4769_v62, %v6038_v14  ;;  %v6034_v36 = vunpack.i.h.bf16 %v6032_v39  ;;  %v6033_v49 = vunpack.i.l.bf16 %v6032_v39 }
 0x6b2   : > { %v4798_v0 = vpack.c.bf16 %v4787_v27, %v4786_v41  ;;  %v6042_v40 = vpop.permute.xlu0 %6041 }
 0x6b3   : > { %v4788_v51 = vsel %vm4777_vm4, %v4771_v24, %v6033_v49  ;;  %v4789_v4 = vsel %vm4777_vm4, %v4772_v3, %v6034_v36  ;;  %v6044_v45 = vunpack.i.h.bf16 %v6042_v40  ;;  %v6043_v15 = vunpack.i.l.bf16 %v6042_v40 }
 0x6b4   : > { %v4799_v16 = vpack.c.bf16 %v4789_v4, %v4788_v51  ;;  %v6047_v21 = vpop.permute.xlu1 %6046  ;;  %5835 = vmatprep.mubr.msk.bf16.mxu0 %vm539_vm0, %v4798_v0 }
 0x6b5   : > { %v6049_v58 = vunpack.i.h.bf16 %v6047_v21  ;;  %v6048_v32 = vunpack.i.l.bf16 %v6047_v21  ;;  %v4774_v63 = vsel %vm2312_vm3, %v4758_v9, %v6044_v45  ;;  %v4773_v43 = vsel %vm2312_vm3, %v4757_v5, %v6043_v15 }
 0x6b6   : > { %v6052_v31 = vpop.permute.xlu0 %6051  ;;  %5836 = vmatmul.mubr.msk.bf16.gmra.mrb[136].mxu0 %vm539_vm0, %v4799_v16 }
 0x6b7   : > { %v6054_v13 = vunpack.i.h.bf16 %v6052_v31  ;;  %v6053_v48 = vunpack.i.l.bf16 %v6052_v31  ;;  %v4775_v46 = vsel %vm2312_vm3, %v4759_v33, %v6048_v32  ;;  %v4776_v61 = vsel %vm2312_vm3, %v4760_v22, %v6049_v58 }
 0x6b8   : > { %v6057_v47 = vpop.permute.xlu1 %6056 }
 0x6b9   : > { %v4791_v1 = vsel %vm4777_vm4, %v4774_v63, %v6054_v13  ;;  %v4790_v56 = vsel %vm4777_vm4, %v4773_v43, %v6053_v48  ;;  %v6059_v8 = vunpack.i.h.bf16 %v6057_v47  ;;  %v6058_v25 = vunpack.i.l.bf16 %v6057_v47 }
 0x6ba   : > { %v4800_v28 = vpack.c.bf16 %v4791_v1, %v4790_v56 }
 0x6bb   : > { %v4792_v54 = vsel %vm4777_vm4, %v4775_v46, %v6058_v25  ;;  %v4793_v50 = vsel %vm4777_vm4, %v4776_v61, %v6059_v8 }
 0x6bc   : > { %v4801_v20 = vpack.c.bf16 %v4793_v50, %v4792_v54  ;;  %5839 = vmatprep.mubr.msk.bf16.mxu0 %vm539_vm0, %v4800_v28 }
 0x6be   : > { %5840 = vmatmul.mubr.msk.bf16.gmra.mrb[140].mxu0 %vm539_vm0, %v4801_v20 }
 0x779   : > { %v5829_v12 = vpop.f32.mrb[128].mxu0 }
 0x77a   : > { %v4892_v35 = vadd.f32 %v5829_v12, %v8367_v29  ;;  %v4883_v6 = vpop.f32.mrb[129].mxu0 }
 0x77b   : > { %v4884_v7 = vadd.f32 %v8367_v29, %v4883_v6  ;;  %v5830_v19 = vpop.f32.mrb[130].mxu0 }
 0x77c   : > { %v4964_v57 = vcombine.high %v4892_v35, %v4892_v35  ;;  %5003 = vst.msk [vmem:[%s8373_s29 + $0x20] sm:$0xf] %vm4994_vm5, %v4892_v35  ;;  %v4895_v53 = vadd.f32 %v5830_v19, %v8367_v29  ;;  %v4886_v52 = vpop.f32.mrb[131].mxu0 }
 0x77d   : > { %v4962_v2 = vcombine.high %v4884_v7, %v4884_v7  ;;  %4995 = vst.msk [vmem:[%s8373_s29] sm:$0xf] %vm4994_vm5, %v4884_v7  ;;  %v4887_v44 = vadd.f32 %v8367_v29, %v4886_v52 }
 0x77e   : > { %5005 = vst.msk [vmem:[%s8373_s29 + $0x28] sm:$0xf] %vm4994_vm5, %v4964_v57  ;;  %v4965_v10 = vcombine.high %v4895_v53, %v4895_v53  ;;  %5007 = vst.msk [vmem:[%s8373_s29 + $0x30] sm:$0xf] %vm4994_vm5, %v4895_v53 }
 0x77f   : > { %4997 = vst.msk [vmem:[%s8373_s29 + $0x8] sm:$0xf] %vm4994_vm5, %v4962_v2  ;;  %v4963_v55 = vcombine.high %v4887_v44, %v4887_v44  ;;  %4999 = vst.msk [vmem:[%s8373_s29 + $0x10] sm:$0xf] %vm4994_vm5, %v4887_v44 }
 0x780   : > { %5009 = vst.msk [vmem:[%s8373_s29 + $0x38] sm:$0xf] %vm4994_vm5, %v4965_v10 }
 0x781   : > { %5001 = vst.msk [vmem:[%s8373_s29 + $0x18] sm:$0xf] %vm4994_vm5, %v4963_v55  ;;  %v5833_v38 = vpop.f32.mrb[132].mxu0 }
 0x782   : > { %v4908_v34 = vadd.f32 %v5833_v38, %v8367_v29  ;;  %v4899_v18 = vpop.f32.mrb[133].mxu0 }
 0x783   : > { %v4900_v59 = vadd.f32 %v8367_v29, %v4899_v18  ;;  %v5834_v42 = vpop.f32.mrb[134].mxu0 }
 0x784   : > { %v4968_v14 = vcombine.high %v4908_v34, %v4908_v34  ;;  %5019 = vst.msk [vmem:[%s8373_s29 + $0x60] sm:$0xf] %vm4994_vm5, %v4908_v34  ;;  %v4911_v30 = vadd.f32 %v5834_v42, %v8367_v29  ;;  %v4902_v11 = vpop.f32.mrb[135].mxu0 }
 0x785   : > { %v4966_v37 = vcombine.high %v4900_v59, %v4900_v59  ;;  %5011 = vst.msk [vmem:[%s8373_s29 + $0x40] sm:$0xf] %vm4994_vm5, %v4900_v59  ;;  %v4903_v62 = vadd.f32 %v8367_v29, %v4902_v11 }
 0x786   : > { %5021 = vst.msk [vmem:[%s8373_s29 + $0x68] sm:$0xf] %vm4994_vm5, %v4968_v14  ;;  %v4969_v39 = vcombine.high %v4911_v30, %v4911_v30  ;;  %5023 = vst.msk [vmem:[%s8373_s29 + $0x70] sm:$0xf] %vm4994_vm5, %v4911_v30 }
 0x787   : > { %5013 = vst.msk [vmem:[%s8373_s29 + $0x48] sm:$0xf] %vm4994_vm5, %v4966_v37  ;;  %v4967_v27 = vcombine.high %v4903_v62, %v4903_v62  ;;  %5015 = vst.msk [vmem:[%s8373_s29 + $0x50] sm:$0xf] %vm4994_vm5, %v4903_v62 }
 0x788   : > { %5025 = vst.msk [vmem:[%s8373_s29 + $0x78] sm:$0xf] %vm4994_vm5, %v4969_v39 }
 0x789   : > { %5017 = vst.msk [vmem:[%s8373_s29 + $0x58] sm:$0xf] %vm4994_vm5, %v4967_v27  ;;  %v5837_v41 = vpop.f32.mrb[136].mxu0 }
 0x78a   : > { %v4924_v36 = vadd.f32 %v5837_v41, %v8367_v29  ;;  %v4915_v49 = vpop.f32.mrb[137].mxu0 }
 0x78b   : > { %v4916_v24 = vadd.f32 %v8367_v29, %v4915_v49  ;;  %v5838_v3 = vpop.f32.mrb[138].mxu0 }
 0x78c   : > { %v4972_v26 = vcombine.high %v4924_v36, %v4924_v36  ;;  %5004 = vst.msk [vmem:[%s8373_s29 + $0x24] sm:$0xf] %vm4994_vm5, %v4924_v36  ;;  %v4927_v0 = vadd.f32 %v5838_v3, %v8367_v29  ;;  %v4918_v40 = vpop.f32.mrb[139].mxu0 }
 0x78d   : > { %v4970_v60 = vcombine.high %v4916_v24, %v4916_v24  ;;  %4996 = vst.msk [vmem:[%s8373_s29 + $0x4] sm:$0xf] %vm4994_vm5, %v4916_v24  ;;  %v4919_v17 = vadd.f32 %v8367_v29, %v4918_v40 }
 0x78e   : > { %5006 = vst.msk [vmem:[%s8373_s29 + $0x2c] sm:$0xf] %vm4994_vm5, %v4972_v26  ;;  %v4973_v51 = vcombine.high %v4927_v0, %v4927_v0  ;;  %5008 = vst.msk [vmem:[%s8373_s29 + $0x34] sm:$0xf] %vm4994_vm5, %v4927_v0 }
 0x78f   : > { %4998 = vst.msk [vmem:[%s8373_s29 + $0xc] sm:$0xf] %vm4994_vm5, %v4970_v60  ;;  %v4971_v4 = vcombine.high %v4919_v17, %v4919_v17  ;;  %5000 = vst.msk [vmem:[%s8373_s29 + $0x14] sm:$0xf] %vm4994_vm5, %v4919_v17 }
 0x790   : > { %5010 = vst.msk [vmem:[%s8373_s29 + $0x3c] sm:$0xf] %vm4994_vm5, %v4973_v51 }
 0x791   : > { %5002 = vst.msk [vmem:[%s8373_s29 + $0x1c] sm:$0xf] %vm4994_vm5, %v4971_v4  ;;  %v5841_v23 = vpop.f32.mrb[140].mxu0 }
 0x792   : > { %v4940_v16 = vadd.f32 %v5841_v23, %v8367_v29  ;;  %v4931_v45 = vpop.f32.mrb[141].mxu0 }
 0x793   : > { %v4932_v15 = vadd.f32 %v8367_v29, %v4931_v45  ;;  %v5842_v21 = vpop.f32.mrb[142].mxu0 }
 0x794   : > { %v4976_v58 = vcombine.high %v4940_v16, %v4940_v16  ;;  %5020 = vst.msk [vmem:[%s8373_s29 + $0x64] sm:$0xf] %vm4994_vm5, %v4940_v16  ;;  %v4943_v32 = vadd.f32 %v5842_v21, %v8367_v29  ;;  %v4934_v31 = vpop.f32.mrb[143].mxu0 }
 0x795   : > { %v4974_v9 = vcombine.high %v4932_v15, %v4932_v15  ;;  %5012 = vst.msk [vmem:[%s8373_s29 + $0x44] sm:$0xf] %vm4994_vm5, %v4932_v15  ;;  %v4935_v5 = vadd.f32 %v8367_v29, %v4934_v31 }
 0x796   : > { %5022 = vst.msk [vmem:[%s8373_s29 + $0x6c] sm:$0xf] %vm4994_vm5, %v4976_v58  ;;  %v4977_v13 = vcombine.high %v4943_v32, %v4943_v32  ;;  %5024 = vst.msk [vmem:[%s8373_s29 + $0x74] sm:$0xf] %vm4994_vm5, %v4943_v32 }
 0x797   : > { %5014 = vst.msk [vmem:[%s8373_s29 + $0x4c] sm:$0xf] %vm4994_vm5, %v4974_v9  ;;  %v4975_v48 = vcombine.high %v4935_v5, %v4935_v5  ;;  %5016 = vst.msk [vmem:[%s8373_s29 + $0x54] sm:$0xf] %vm4994_vm5, %v4935_v5 }
 0x798   : > { %5026 = vst.msk [vmem:[%s8373_s29 + $0x7c] sm:$0xf] %vm4994_vm5, %v4977_v13 }
 0x799   : > { %5018 = vst.msk [vmem:[%s8373_s29 + $0x5c] sm:$0xf] %vm4994_vm5, %v4975_v48 }
 0x79a   : > { %6447 = shalt.err (!%p6444_p4)
}
 0x79b   : > { %s6448_s17 = scalar_lea.hbm %s8450_s16, 2048  ;;  %s6452_s28 = scalar_lea.hbm %s8511_s5, 4096 }
 0x79c   : > { %p6449_p9 = scmp.ne.s32.totalorder %s8450_s16, %s6448_s17  ;;  %p6453_p8 = scmp.lt.u32.totalorder %s8450_s16, %s8511_s5 }
 0x79d   : > { %p6454_p13 = scmp.lt.u32.totalorder %s6452_s28, %s6448_s17  ;;  %p6456_p10 = scmp.lt.u32.totalorder %s6448_s17, %s8450_s16 }
 0x79e   : > { %p6450_p0 = pnand %p6449_p9, %p6709_p5 }
 0x79f   : > { %p6455_p6 = por %p6454_p13, %p6453_p8 }
 0x7a0   : > { %p6451_p11 = pneg %p6450_p0 }
 0x7a1   : > { %p6457_p3 = por %p6456_p10, %p6455_p6 }
 0x7a3   : > { %p6458_p7 = pnand %p6457_p3, %p6451_p11 }
 0x7a5   : > { %6461 = shalt.err (!%p6458_p7)
}
 0x7a6   : > { %s6530_s22 = smov 4  }
 0x7a7   : > { %5861 = dma.vmem_to_hbm [thread:$0]  (%p6709_p5), %s8456_s10, 2048, %s8450_s16, %s5028_s24, %s6525_s27, %s6525_s27, %s6530_s22  }
 0x7a8 PF: > { %s5057_s11 = sand.u32 1, %s6496_s18   ;;  %p8669_p12 = scmp.ne.s32.totalorder %s8551_s25, 0 }
 0x7a9   : > { %p8670_p2 = scmp.ge.s32.totalorder %s6508_s21, 2  ;;  %s5058_s26 = scalar_lea.sflag [#allocation4], %s5057_s11 }
 0x7ab   : > { %p5878_p1 = pnand %p8670_p2, %p8669_p12 }
 0x7ad   : > { %6491 = dma.done.wait (!%p5878_p1), %s5058_s26, 2048  }
 0x7ae   : > { %6493 = vsyncadd (!%p5878_p1), %s5058_s26, 4294965248  ;;  %p20_p4 = scmp.ge.s32.totalorder %s6674_s30, 4   ;;  %s8671_s18 = smov %s6500_s19 }
 0x7af   : > { %s8672_s19 = smov %s6504_s20  ;;  %s8673_s20 = smov %s6705_s23 }
 0x7b0   : > { %s8674_s21 = smov %s6674_s30  ;;  %22 = sbr.rel (!%p20_p4) target bundleno = 7 (0x7), region = 97 }
 0x7b7   :  { %5063 = vsyncpa [#allocation3], 1 }
 0x7b8   :  { %5065 = vsyncpa [#allocation3 + $0x1], 1 }
 0x7b9   :  { %5066 = vsyncpa [#allocation6], 1 }
 0x7ba   :  { %5067 = vsyncpa [#allocation9], 1 }
 0x7bb   :  { %5068 = vsyncpa [#allocation4], 1 }
 0x7bc   :  { %5070 = vsyncpa [#allocation4 + $0x1], 1 }

</bundles_post_ra>
